<compile_context>
chip_gen: v7x
topology: tpu7x:2x2x1
jax: 0.10.0
libtpu: 0.0.40
codegen_flags: <defaults>
</compile_context>

<pallas_src>
import functools

import jax
import jax.numpy as jnp
from jax.experimental import pallas as pl
from jax.experimental.pallas import tpu as pltpu


# PyTorch flip dims [2],[3],[4] (D,H,W) -> spatial axes 0,1,2 of the
# (kd, kh, kw, Cin, Cout) weight tensor.
_FLIP_COMBS = [(), (0,), (1,), (2,), (0, 1), (0, 2), (1, 2), (0, 1, 2)]
_N_COMBO = len(_FLIP_COMBS)


def _round_up(a, b):
    return (a + b - 1) // b * b


def _tta_kernel(xc_ref, xn_ref, w_ref, b_ref, o_ref, a_scr,
                *, cin, off0, hpwp, wp):
    """Grid = (M_tiles,).  One fused matmul for all 8 flip combos.

    xc_ref: (Cin, tm) bf16 — flat padded input, current tile.
    xn_ref: (Cin, tm) bf16 — next tile (supplies the +/- 1-voxel halo).
    w_ref : (8*Cout, 27*Cin) bf16, rows cout-major (g = cout*8 + combo).
    b_ref : (8*Cout, 1) f32 bias (replicated over combos).
    o_ref : (Cout, tm) f32 TTA-averaged probabilities.
    a_scr : (27*Cin, tm) bf16 VMEM scratch — in-kernel "im2col" tile.
    """
    tm = o_ref.shape[1]
    cout = o_ref.shape[0]

    # Current tile + next tile = current window plus the full halo on the right;
    # output lane j of this tile corresponds to padded flat position
    # tile_start + off0 + j, so every tap offset lands in [0, 2*tm).
    xcat = jnp.concatenate([xc_ref[...], xn_ref[...]], axis=1)   # (Cin, 2*tm)

    # Assemble the 27 shifted taps (static slices) into the fused-K operand.
    t = 0
    for a in range(3):
        for b in range(3):
            for c in range(3):
                s = (a - 1) * hpwp + (b - 1) * wp + (c - 1)      # Python int
                start = off0 + s                                 # in [0, 2*off0]
                a_scr[t * cin:(t + 1) * cin, :] = xcat[:, start:start + tm]
                t += 1

    logits = jnp.dot(w_ref[...], a_scr[...],
                     preferred_element_type=jnp.float32) + b_ref[...]
    # Clamp so exp(-x) cannot overflow to inf before the approximate reciprocal.
    z = jnp.clip(logits, -30.0, 30.0)
    probs = pl.reciprocal(1.0 + jnp.exp(-z), approx=True)

    # Rows are cout-major -> each output channel owns an aligned group of 8
    # sublanes; reshape + sum is a clean in-vreg cross-sublane reduction.
    o_ref[...] = probs.reshape(cout, _N_COMBO, tm).sum(axis=1) * (1.0 / _N_COMBO)


def segment_with_tta(x, weight, bias, *, tm=8192):
    """x: (N, Cin, D, H, W) f32 NCDHW. weight: (Cout, Cin, 3, 3, 3). bias: (Cout,)."""
    N, Cin, D, H, W = x.shape
    Cout = weight.shape[0]
    Dp, Hp, Wp = D + 2, H + 2, W + 2
    hpwp = Hp * Wp
    L = N * Dp * hpwp                 # padded, flattened spatial length
    off0 = hpwp + Wp + 1              # max |tap shift| in flat index
    K = 27 * Cin
    G = Cout * _N_COMBO

    # --- glue (single cheap pass): channel-major, zero-padded, flat, bf16 ------
    x_cf = jnp.transpose(x, (1, 0, 2, 3, 4)).astype(jnp.bfloat16)     # (Cin,N,D,H,W)
    x_pad = jnp.pad(x_cf, ((0, 0), (0, 0), (1, 1), (1, 1), (1, 1)))   # (Cin,N,Dp,Hp,Wp)
    x_flat = x_pad.reshape(Cin, L)

    # --- fold the 8 flip combos into one (8*Cout, K) weight matrix -------------
    w_sp = jnp.transpose(weight, (2, 3, 4, 1, 0))                     # (3,3,3,Cin,Cout)
    w_mats = []
    for dims in _FLIP_COMBS:
        wf = jnp.flip(w_sp, axis=dims) if dims else w_sp
        w_mats.append(wf.reshape(K, Cout).T)                          # (Cout, K)
    w_all = jnp.stack(w_mats, axis=1).reshape(G, K).astype(jnp.bfloat16)
    bias_col = jnp.repeat(bias.astype(jnp.float32), _N_COMBO).reshape(G, 1)

    # --- tiling: output position j <-> padded flat position j + off0 -----------
    need = max(L - 2 * off0, 1)                        # flat outputs to cover
    tm_min = _round_up(max(2 * off0, 128), 128)        # halo must fit in 1 tile
    tm_eff = max(tm_min, min(_round_up(tm, 128), _round_up(need, 128)))
    n_blk = pl.cdiv(need, tm_eff)
    lx = (n_blk + 1) * tm_eff                          # "next" role never OOB
    x_flat = jnp.pad(x_flat, ((0, 0), (0, lx - L)))

    kern = functools.partial(_tta_kernel, cin=Cin, off0=off0, hpwp=hpwp, wp=Wp)

    y_flat = pl.pallas_call(
        kern,
        out_shape=jax.ShapeDtypeStruct((Cout, n_blk * tm_eff), jnp.float32),
        grid_spec=pltpu.PrefetchScalarGridSpec(
            num_scalar_prefetch=0,
            grid=(n_blk,),
            in_specs=[
                pl.BlockSpec((Cin, tm_eff), lambda i: (0, i)),      # current tile
                pl.BlockSpec((Cin, tm_eff), lambda i: (0, i + 1)),  # halo (next)
                pl.BlockSpec((G, K), lambda i: (0, 0)),             # fused weights
                pl.BlockSpec((G, 1), lambda i: (0, 0)),             # bias column
            ],
            out_specs=pl.BlockSpec((Cout, tm_eff), lambda i: (0, i)),
            scratch_shapes=[pltpu.VMEM((K, tm_eff), jnp.bfloat16)],
        ),
        compiler_params=pltpu.CompilerParams(
            dimension_semantics=("parallel",),
            vmem_limit_bytes=32 * 1024 * 1024),
    )(x_flat, x_flat, w_all, bias_col)

    # --- un-flatten: output j is padded flat position j + off0 -----------------
    y = y_flat[:, :need]
    y = jnp.pad(y, ((0, 0), (off0, off0)))                           # length L
    y = y.reshape(Cout, N, Dp, Hp, Wp)[:, :, 1:D + 1, 1:H + 1, 1:W + 1]
    return jnp.transpose(y, (1, 0, 2, 3, 4))                         # (N,Cout,D,H,W)


# ------------------------------- pure-JAX reference --------------------------
def _conv3d_ref(x, weight, bias):
    y = jax.lax.conv_general_dilated(
        x, weight, window_strides=(1, 1, 1), padding="SAME",
        dimension_numbers=("NCDHW", "OIDHW", "NCDHW"),
        precision=jax.lax.Precision.HIGHEST)
    return y + bias[None, :, None, None, None]


def tta_reference(x, weight, bias):
    combs = [(), (2,), (3,), (4,), (2, 3), (2, 4), (3, 4), (2, 3, 4)]
    y = None
    for dims in combs:
        xf = jnp.flip(x, dims) if dims else x
        yf = _conv3d_ref(xf, weight, bias)
        yf = jnp.flip(yf, dims) if dims else yf
        s = jax.nn.sigmoid(yf)
        y = s if y is None else y + s
    return y / len(combs)


if __name__ == "__main__":
    key = jax.random.PRNGKey(0)
    kx, kw, kb = jax.random.split(key, 3)

    N, Cin, Cout, D, H, W = 2, 4, 3, 8, 8, 8
    x = jax.random.normal(kx, (N, Cin, D, H, W), jnp.float32)
    weight = jax.random.normal(kw, (Cout, Cin, 3, 3, 3), jnp.float32) * 0.1
    bias = jax.random.normal(kb, (Cout,), jnp.float32) * 0.1

    y = jax.block_until_ready(segment_with_tta(x, weight, bias))
    y_ref = jax.block_until_ready(tta_reference(x, weight, bias))

    assert y.shape == (N, Cout, D, H, W), y.shape
    max_err = float(jnp.max(jnp.abs(y - y_ref)))
    # bf16 matmul operands (f32 accumulation) + approx reciprocal -> loose tol.
    assert jnp.allclose(y, y_ref, atol=1.5e-2, rtol=1.5e-2), max_err
    print("KERNEL_OK")
</pallas_src>

<mosaic_0001>
module attributes {stable_mosaic.version = 11 : i64} {
  func.func @_tta_kernel(%arg0: i32, %arg1: memref<4x1792xbf16, #tpu.memory_space<vmem>>, %arg2: memref<4x1792xbf16, #tpu.memory_space<vmem>>, %arg3: memref<24x108xbf16, #tpu.memory_space<vmem>>, %arg4: memref<24x1xf32, #tpu.memory_space<vmem>>, %arg5: memref<3x1792xf32, #tpu.memory_space<vmem>>, %arg6: memref<108x1792xbf16, #tpu.memory_space<vmem>>) attributes {dimension_semantics = [#tpu.dimension_semantics<parallel>], iteration_bounds = array<i64: 1>, scalar_prefetch = 0 : i64, scratch_operands = 1 : i64, tpu.core_type = #tpu.core_type<tc>, window_params = [{transform_indices = @transform_0, window_bounds = array<i64: 4, 1792>}, {transform_indices = @transform_1, window_bounds = array<i64: 4, 1792>}, {pipeline_mode = #tpu.pipeline_mode<synchronous>, transform_indices = @transform_2, window_bounds = array<i64: 24, 108>}, {pipeline_mode = #tpu.pipeline_mode<synchronous>, transform_indices = @transform_3, window_bounds = array<i64: 24, 1>}, {transform_indices = @transform_4, window_bounds = array<i64: 3, 1792>}]} {
    %c0 = arith.constant 0 : index
    %c0_0 = arith.constant 0 : index
    %0 = vector.load %arg1[%c0, %c0_0] : memref<4x1792xbf16, #tpu.memory_space<vmem>>, vector<4x1792xbf16>
    %c0_1 = arith.constant 0 : index
    %c0_2 = arith.constant 0 : index
    %1 = vector.load %arg2[%c0_1, %c0_2] : memref<4x1792xbf16, #tpu.memory_space<vmem>>, vector<4x1792xbf16>
    %2 = tpu.concatenate %0, %1 in 1 : vector<4x1792xbf16>, vector<4x1792xbf16> -> vector<4x3584xbf16>
    %3 = vector.extract_strided_slice %2 {offsets = [0, 0], sizes = [4, 1792], strides = [1, 1]} : vector<4x3584xbf16> to vector<4x1792xbf16>
    %c0_3 = arith.constant 0 : index
    %c0_4 = arith.constant 0 : index
    %4 = vector.load %arg6[%c0_3, %c0_4] : memref<108x1792xbf16, #tpu.memory_space<vmem>>, vector<4x1792xbf16>
    tpu.vector_store %arg6[%c0_3, %c0_4], %3 {strides = array<i32>} : memref<108x1792xbf16, #tpu.memory_space<vmem>>, vector<4x1792xbf16>,
    %5 = vector.extract_strided_slice %2 {offsets = [0, 1], sizes = [4, 1792], strides = [1, 1]} : vector<4x3584xbf16> to vector<4x1792xbf16>
    %c4 = arith.constant 4 : index
    %c0_5 = arith.constant 0 : index
    %6 = vector.load %arg6[%c4, %c0_5] : memref<108x1792xbf16, #tpu.memory_space<vmem>>, vector<4x1792xbf16>
    tpu.vector_store %arg6[%c4, %c0_5], %5 {strides = array<i32>} : memref<108x1792xbf16, #tpu.memory_space<vmem>>, vector<4x1792xbf16>,
    %7 = vector.extract_strided_slice %2 {offsets = [0, 2], sizes = [4, 1792], strides = [1, 1]} : vector<4x3584xbf16> to vector<4x1792xbf16>
    %c8 = arith.constant 8 : index
    %c0_6 = arith.constant 0 : index
    %8 = vector.load %arg6[%c8, %c0_6] : memref<108x1792xbf16, #tpu.memory_space<vmem>>, vector<4x1792xbf16>
    tpu.vector_store %arg6[%c8, %c0_6], %7 {strides = array<i32>} : memref<108x1792xbf16, #tpu.memory_space<vmem>>, vector<4x1792xbf16>,
    %9 = vector.extract_strided_slice %2 {offsets = [0, 10], sizes = [4, 1792], strides = [1, 1]} : vector<4x3584xbf16> to vector<4x1792xbf16>
    %c12 = arith.constant 12 : index
    %c0_7 = arith.constant 0 : index
    %10 = vector.load %arg6[%c12, %c0_7] : memref<108x1792xbf16, #tpu.memory_space<vmem>>, vector<4x1792xbf16>
    tpu.vector_store %arg6[%c12, %c0_7], %9 {strides = array<i32>} : memref<108x1792xbf16, #tpu.memory_space<vmem>>, vector<4x1792xbf16>,
    %11 = vector.extract_strided_slice %2 {offsets = [0, 11], sizes = [4, 1792], strides = [1, 1]} : vector<4x3584xbf16> to vector<4x1792xbf16>
    %c16 = arith.constant 16 : index
    %c0_8 = arith.constant 0 : index
    %12 = vector.load %arg6[%c16, %c0_8] : memref<108x1792xbf16, #tpu.memory_space<vmem>>, vector<4x1792xbf16>
    tpu.vector_store %arg6[%c16, %c0_8], %11 {strides = array<i32>} : memref<108x1792xbf16, #tpu.memory_space<vmem>>, vector<4x1792xbf16>,
    %13 = vector.extract_strided_slice %2 {offsets = [0, 12], sizes = [4, 1792], strides = [1, 1]} : vector<4x3584xbf16> to vector<4x1792xbf16>
    %c20 = arith.constant 20 : index
    %c0_9 = arith.constant 0 : index
    %14 = vector.load %arg6[%c20, %c0_9] : memref<108x1792xbf16, #tpu.memory_space<vmem>>, vector<4x1792xbf16>
    tpu.vector_store %arg6[%c20, %c0_9], %13 {strides = array<i32>} : memref<108x1792xbf16, #tpu.memory_space<vmem>>, vector<4x1792xbf16>,
    %15 = vector.extract_strided_slice %2 {offsets = [0, 20], sizes = [4, 1792], strides = [1, 1]} : vector<4x3584xbf16> to vector<4x1792xbf16>
    %c24 = arith.constant 24 : index
    %c0_10 = arith.constant 0 : index
    %16 = vector.load %arg6[%c24, %c0_10] : memref<108x1792xbf16, #tpu.memory_space<vmem>>, vector<4x1792xbf16>
    tpu.vector_store %arg6[%c24, %c0_10], %15 {strides = array<i32>} : memref<108x1792xbf16, #tpu.memory_space<vmem>>, vector<4x1792xbf16>,
    %17 = vector.extract_strided_slice %2 {offsets = [0, 21], sizes = [4, 1792], strides = [1, 1]} : vector<4x3584xbf16> to vector<4x1792xbf16>
    %c28 = arith.constant 28 : index
    %c0_11 = arith.constant 0 : index
    %18 = vector.load %arg6[%c28, %c0_11] : memref<108x1792xbf16, #tpu.memory_space<vmem>>, vector<4x1792xbf16>
    tpu.vector_store %arg6[%c28, %c0_11], %17 {strides = array<i32>} : memref<108x1792xbf16, #tpu.memory_space<vmem>>, vector<4x1792xbf16>,
    %19 = vector.extract_strided_slice %2 {offsets = [0, 22], sizes = [4, 1792], strides = [1, 1]} : vector<4x3584xbf16> to vector<4x1792xbf16>
    %c32 = arith.constant 32 : index
    %c0_12 = arith.constant 0 : index
    %20 = vector.load %arg6[%c32, %c0_12] : memref<108x1792xbf16, #tpu.memory_space<vmem>>, vector<4x1792xbf16>
    tpu.vector_store %arg6[%c32, %c0_12], %19 {strides = array<i32>} : memref<108x1792xbf16, #tpu.memory_space<vmem>>, vector<4x1792xbf16>,
    %21 = vector.extract_strided_slice %2 {offsets = [0, 100], sizes = [4, 1792], strides = [1, 1]} : vector<4x3584xbf16> to vector<4x1792xbf16>
    %c36 = arith.constant 36 : index
    %c0_13 = arith.constant 0 : index
    %22 = vector.load %arg6[%c36, %c0_13] : memref<108x1792xbf16, #tpu.memory_space<vmem>>, vector<4x1792xbf16>
    tpu.vector_store %arg6[%c36, %c0_13], %21 {strides = array<i32>} : memref<108x1792xbf16, #tpu.memory_space<vmem>>, vector<4x1792xbf16>,
    %23 = vector.extract_strided_slice %2 {offsets = [0, 101], sizes = [4, 1792], strides = [1, 1]} : vector<4x3584xbf16> to vector<4x1792xbf16>
    %c40 = arith.constant 40 : index
    %c0_14 = arith.constant 0 : index
    %24 = vector.load %arg6[%c40, %c0_14] : memref<108x1792xbf16, #tpu.memory_space<vmem>>, vector<4x1792xbf16>
    tpu.vector_store %arg6[%c40, %c0_14], %23 {strides = array<i32>} : memref<108x1792xbf16, #tpu.memory_space<vmem>>, vector<4x1792xbf16>,
    %25 = vector.extract_strided_slice %2 {offsets = [0, 102], sizes = [4, 1792], strides = [1, 1]} : vector<4x3584xbf16> to vector<4x1792xbf16>
    %c44 = arith.constant 44 : index
    %c0_15 = arith.constant 0 : index
    %26 = vector.load %arg6[%c44, %c0_15] : memref<108x1792xbf16, #tpu.memory_space<vmem>>, vector<4x1792xbf16>
    tpu.vector_store %arg6[%c44, %c0_15], %25 {strides = array<i32>} : memref<108x1792xbf16, #tpu.memory_space<vmem>>, vector<4x1792xbf16>,
    %27 = vector.extract_strided_slice %2 {offsets = [0, 110], sizes = [4, 1792], strides = [1, 1]} : vector<4x3584xbf16> to vector<4x1792xbf16>
    %c48 = arith.constant 48 : index
    %c0_16 = arith.constant 0 : index
    %28 = vector.load %arg6[%c48, %c0_16] : memref<108x1792xbf16, #tpu.memory_space<vmem>>, vector<4x1792xbf16>
    tpu.vector_store %arg6[%c48, %c0_16], %27 {strides = array<i32>} : memref<108x1792xbf16, #tpu.memory_space<vmem>>, vector<4x1792xbf16>,
    %29 = vector.extract_strided_slice %2 {offsets = [0, 111], sizes = [4, 1792], strides = [1, 1]} : vector<4x3584xbf16> to vector<4x1792xbf16>
    %c52 = arith.constant 52 : index
    %c0_17 = arith.constant 0 : index
    %30 = vector.load %arg6[%c52, %c0_17] : memref<108x1792xbf16, #tpu.memory_space<vmem>>, vector<4x1792xbf16>
    tpu.vector_store %arg6[%c52, %c0_17], %29 {strides = array<i32>} : memref<108x1792xbf16, #tpu.memory_space<vmem>>, vector<4x1792xbf16>,
    %31 = vector.extract_strided_slice %2 {offsets = [0, 112], sizes = [4, 1792], strides = [1, 1]} : vector<4x3584xbf16> to vector<4x1792xbf16>
    %c56 = arith.constant 56 : index
    %c0_18 = arith.constant 0 : index
    %32 = vector.load %arg6[%c56, %c0_18] : memref<108x1792xbf16, #tpu.memory_space<vmem>>, vector<4x1792xbf16>
    tpu.vector_store %arg6[%c56, %c0_18], %31 {strides = array<i32>} : memref<108x1792xbf16, #tpu.memory_space<vmem>>, vector<4x1792xbf16>,
    %33 = vector.extract_strided_slice %2 {offsets = [0, 120], sizes = [4, 1792], strides = [1, 1]} : vector<4x3584xbf16> to vector<4x1792xbf16>
    %c60 = arith.constant 60 : index
    %c0_19 = arith.constant 0 : index
    %34 = vector.load %arg6[%c60, %c0_19] : memref<108x1792xbf16, #tpu.memory_space<vmem>>, vector<4x1792xbf16>
    tpu.vector_store %arg6[%c60, %c0_19], %33 {strides = array<i32>} : memref<108x1792xbf16, #tpu.memory_space<vmem>>, vector<4x1792xbf16>,
    %35 = vector.extract_strided_slice %2 {offsets = [0, 121], sizes = [4, 1792], strides = [1, 1]} : vector<4x3584xbf16> to vector<4x1792xbf16>
    %c64 = arith.constant 64 : index
    %c0_20 = arith.constant 0 : index
    %36 = vector.load %arg6[%c64, %c0_20] : memref<108x1792xbf16, #tpu.memory_space<vmem>>, vector<4x1792xbf16>
    tpu.vector_store %arg6[%c64, %c0_20], %35 {strides = array<i32>} : memref<108x1792xbf16, #tpu.memory_space<vmem>>, vector<4x1792xbf16>,
    %37 = vector.extract_strided_slice %2 {offsets = [0, 122], sizes = [4, 1792], strides = [1, 1]} : vector<4x3584xbf16> to vector<4x1792xbf16>
    %c68 = arith.constant 68 : index
    %c0_21 = arith.constant 0 : index
    %38 = vector.load %arg6[%c68, %c0_21] : memref<108x1792xbf16, #tpu.memory_space<vmem>>, vector<4x1792xbf16>
    tpu.vector_store %arg6[%c68, %c0_21], %37 {strides = array<i32>} : memref<108x1792xbf16, #tpu.memory_space<vmem>>, vector<4x1792xbf16>,
    %39 = vector.extract_strided_slice %2 {offsets = [0, 200], sizes = [4, 1792], strides = [1, 1]} : vector<4x3584xbf16> to vector<4x1792xbf16>
    %c72 = arith.constant 72 : index
    %c0_22 = arith.constant 0 : index
    %40 = vector.load %arg6[%c72, %c0_22] : memref<108x1792xbf16, #tpu.memory_space<vmem>>, vector<4x1792xbf16>
    tpu.vector_store %arg6[%c72, %c0_22], %39 {strides = array<i32>} : memref<108x1792xbf16, #tpu.memory_space<vmem>>, vector<4x1792xbf16>,
    %41 = vector.extract_strided_slice %2 {offsets = [0, 201], sizes = [4, 1792], strides = [1, 1]} : vector<4x3584xbf16> to vector<4x1792xbf16>
    %c76 = arith.constant 76 : index
    %c0_23 = arith.constant 0 : index
    %42 = vector.load %arg6[%c76, %c0_23] : memref<108x1792xbf16, #tpu.memory_space<vmem>>, vector<4x1792xbf16>
    tpu.vector_store %arg6[%c76, %c0_23], %41 {strides = array<i32>} : memref<108x1792xbf16, #tpu.memory_space<vmem>>, vector<4x1792xbf16>,
    %43 = vector.extract_strided_slice %2 {offsets = [0, 202], sizes = [4, 1792], strides = [1, 1]} : vector<4x3584xbf16> to vector<4x1792xbf16>
    %c80 = arith.constant 80 : index
    %c0_24 = arith.constant 0 : index
    %44 = vector.load %arg6[%c80, %c0_24] : memref<108x1792xbf16, #tpu.memory_space<vmem>>, vector<4x1792xbf16>
    tpu.vector_store %arg6[%c80, %c0_24], %43 {strides = array<i32>} : memref<108x1792xbf16, #tpu.memory_space<vmem>>, vector<4x1792xbf16>,
    %45 = vector.extract_strided_slice %2 {offsets = [0, 210], sizes = [4, 1792], strides = [1, 1]} : vector<4x3584xbf16> to vector<4x1792xbf16>
    %c84 = arith.constant 84 : index
    %c0_25 = arith.constant 0 : index
    %46 = vector.load %arg6[%c84, %c0_25] : memref<108x1792xbf16, #tpu.memory_space<vmem>>, vector<4x1792xbf16>
    tpu.vector_store %arg6[%c84, %c0_25], %45 {strides = array<i32>} : memref<108x1792xbf16, #tpu.memory_space<vmem>>, vector<4x1792xbf16>,
    %47 = vector.extract_strided_slice %2 {offsets = [0, 211], sizes = [4, 1792], strides = [1, 1]} : vector<4x3584xbf16> to vector<4x1792xbf16>
    %c88 = arith.constant 88 : index
    %c0_26 = arith.constant 0 : index
    %48 = vector.load %arg6[%c88, %c0_26] : memref<108x1792xbf16, #tpu.memory_space<vmem>>, vector<4x1792xbf16>
    tpu.vector_store %arg6[%c88, %c0_26], %47 {strides = array<i32>} : memref<108x1792xbf16, #tpu.memory_space<vmem>>, vector<4x1792xbf16>,
    %49 = vector.extract_strided_slice %2 {offsets = [0, 212], sizes = [4, 1792], strides = [1, 1]} : vector<4x3584xbf16> to vector<4x1792xbf16>
    %c92 = arith.constant 92 : index
    %c0_27 = arith.constant 0 : index
    %50 = vector.load %arg6[%c92, %c0_27] : memref<108x1792xbf16, #tpu.memory_space<vmem>>, vector<4x1792xbf16>
    tpu.vector_store %arg6[%c92, %c0_27], %49 {strides = array<i32>} : memref<108x1792xbf16, #tpu.memory_space<vmem>>, vector<4x1792xbf16>,
    %51 = vector.extract_strided_slice %2 {offsets = [0, 220], sizes = [4, 1792], strides = [1, 1]} : vector<4x3584xbf16> to vector<4x1792xbf16>
    %c96 = arith.constant 96 : index
    %c0_28 = arith.constant 0 : index
    %52 = vector.load %arg6[%c96, %c0_28] : memref<108x1792xbf16, #tpu.memory_space<vmem>>, vector<4x1792xbf16>
    tpu.vector_store %arg6[%c96, %c0_28], %51 {strides = array<i32>} : memref<108x1792xbf16, #tpu.memory_space<vmem>>, vector<4x1792xbf16>,
    %53 = vector.extract_strided_slice %2 {offsets = [0, 221], sizes = [4, 1792], strides = [1, 1]} : vector<4x3584xbf16> to vector<4x1792xbf16>
    %c100 = arith.constant 100 : index
    %c0_29 = arith.constant 0 : index
    %54 = vector.load %arg6[%c100, %c0_29] : memref<108x1792xbf16, #tpu.memory_space<vmem>>, vector<4x1792xbf16>
    tpu.vector_store %arg6[%c100, %c0_29], %53 {strides = array<i32>} : memref<108x1792xbf16, #tpu.memory_space<vmem>>, vector<4x1792xbf16>,
    %55 = vector.extract_strided_slice %2 {offsets = [0, 222], sizes = [4, 1792], strides = [1, 1]} : vector<4x3584xbf16> to vector<4x1792xbf16>
    %c104 = arith.constant 104 : index
    %c0_30 = arith.constant 0 : index
    %56 = vector.load %arg6[%c104, %c0_30] : memref<108x1792xbf16, #tpu.memory_space<vmem>>, vector<4x1792xbf16>
    tpu.vector_store %arg6[%c104, %c0_30], %55 {strides = array<i32>} : memref<108x1792xbf16, #tpu.memory_space<vmem>>, vector<4x1792xbf16>,
    %c0_31 = arith.constant 0 : index
    %c0_32 = arith.constant 0 : index
    %57 = vector.load %arg3[%c0_31, %c0_32] : memref<24x108xbf16, #tpu.memory_space<vmem>>, vector<24x108xbf16>
    %c0_33 = arith.constant 0 : index
    %c0_34 = arith.constant 0 : index
    %58 = vector.load %arg6[%c0_33, %c0_34] : memref<108x1792xbf16, #tpu.memory_space<vmem>>, vector<108x1792xbf16>
    %cst = arith.constant dense<0.000000e+00> : vector<24x1792xf32>
    %59 = tpu.matmul %57, %58, %cst {dimension_numbers = #tpu.dot_dimension_numbers<[1], [0], [0], [1], [0, 0, 1, 1], [], []>} : vector<24x108xbf16>, vector<108x1792xbf16>, vector<24x1792xf32> -> vector<24x1792xf32>
    %c0_35 = arith.constant 0 : index
    %c0_36 = arith.constant 0 : index
    %60 = vector.load %arg4[%c0_35, %c0_36] : memref<24x1xf32, #tpu.memory_space<vmem>>, vector<24x1xf32>
    %61 = vector.broadcast %60 : vector<24x1xf32> to vector<24x1792xf32>
    %62 = arith.addf %59, %61 : vector<24x1792xf32>
    %cst_37 = arith.constant -3.000000e+01 : f32
    %cst_38 = arith.constant 3.000000e+01 : f32
    %63 = vector.broadcast %cst_37 : f32 to vector<24x1792xf32>
    %64 = arith.maximumf %63, %62 : vector<24x1792xf32>
    %65 = vector.broadcast %cst_38 : f32 to vector<24x1792xf32>
    %66 = arith.minimumf %65, %64 : vector<24x1792xf32>
    %cst_39 = arith.constant 0.000000e+00 : f32
    %67 = vector.broadcast %cst_39 : f32 to vector<24x1792xf32>
    %68 = arith.subf %67, %66 : vector<24x1792xf32>
    %69 = math.exp %68 : vector<24x1792xf32>
    %cst_40 = arith.constant 1.000000e+00 : f32
    %70 = vector.broadcast %cst_40 : f32 to vector<24x1792xf32>
    %71 = arith.addf %70, %69 : vector<24x1792xf32>
    %72 = tpu.reciprocal %71 {approx = true} : vector<24x1792xf32> -> vector<24x1792xf32>
    %73 = vector.shape_cast %72 : vector<24x1792xf32> to vector<3x8x1792xf32>
    %cst_41 = arith.constant dense<0.000000e+00> : vector<3x1792xf32>
    %74 = vector.multi_reduction <add>, %73, %cst_41 [1] : vector<3x8x1792xf32> to vector<3x1792xf32>
    %cst_42 = arith.constant 1.250000e-01 : f32
    %75 = vector.broadcast %cst_42 : f32 to vector<3x1792xf32>
    %76 = arith.mulf %74, %75 : vector<3x1792xf32>
    %c0_43 = arith.constant 0 : index
    %c0_44 = arith.constant 0 : index
    %77 = vector.load %arg5[%c0_43, %c0_44] : memref<3x1792xf32, #tpu.memory_space<vmem>>, vector<3x1792xf32>
    tpu.vector_store %arg5[%c0_43, %c0_44], %76 {strides = array<i32>} : memref<3x1792xf32, #tpu.memory_space<vmem>>, vector<3x1792xf32>,
    return
  }
  func.func @transform_0(%arg0: i32) -> (i32, i32) {
    %c0_i32 = arith.constant 0 : i32
    %c0_i32_0 = arith.constant 0 : i32
    return %c0_i32, %arg0 : i32, i32
  }
  func.func @transform_1(%arg0: i32) -> (i32, i32) {
    %c1_i32 = arith.constant 1 : i32
    %0 = arith.addi %arg0, %c1_i32 : i32
    %c0_i32 = arith.constant 0 : i32
    %c0_i32_0 = arith.constant 0 : i32
    return %c0_i32, %0 : i32, i32
  }
  func.func @transform_2(%arg0: i32) -> (i32, i32) {
    %c0_i32 = arith.constant 0 : i32
    %c0_i32_0 = arith.constant 0 : i32
    %c0_i32_1 = arith.constant 0 : i32
    return %c0_i32, %c0_i32_0 : i32, i32
  }
  func.func @transform_3(%arg0: i32) -> (i32, i32) {
    %c0_i32 = arith.constant 0 : i32
    %c0_i32_0 = arith.constant 0 : i32
    %c0_i32_1 = arith.constant 0 : i32
    return %c0_i32, %c0_i32_0 : i32, i32
  }
  func.func @transform_4(%arg0: i32) -> (i32, i32) {
    %c0_i32 = arith.constant 0 : i32
    %c0_i32_0 = arith.constant 0 : i32
    return %c0_i32, %arg0 : i32, i32
  }
}

</mosaic_0001>

<bundles_post_ra>
// kernel: tpu_custom_call.1
= control target key start
LH: loop header
LB: loop body
LE: loop exit
PB: predicated region body
PF: predicated region fallthrough
CT: control target
= control target key end

     0   :  { %9 = vsyncpa [#allocation4], 0  ;;  %s5781_s0 = inlined_call_operand.hbm [shape: bf16[4,3584], index: 0, kind: input, shape index: {}]   ;;  %s5782_s1 = inlined_call_operand.hbm [shape: bf16[4,3584], index: 1, kind: input, shape index: {}]   ;;  %s5783_s2 = inlined_call_operand.vmem [shape: bf16[24,108], index: 2, kind: input, shape index: {}]   ;;  %s5784_s3 = inlined_call_operand.vmem [shape: f32[24,1], index: 3, kind: input, shape index: {}]   ;;  %s5785_s4 = inlined_call_operand.hbm [shape: f32[3,1792], index: 4, kind: output, shape index: {}]  }
   0x1   :  { %10 = vsyncpa [#allocation7], 0 }
   0x2   :  { %11 = vsyncpa [#allocation5], 0  ;;  %s3991_s17 = scalar_lea.hbm %s5782_s1, 448  ;;  %s3932_s18 = smov [#allocation3]  }
   0x3   :  { %s18_s19 = sshll.u32 %s3932_s18, 4  ;;  %s3933_s20 = smov [#allocation6]   ;;  %s19_s19 = int_to_ptr.vmem [resolvable:$true] %s18_s19 }
   0x4   :  { %s32_s21 = sshll.u32 %s3933_s20, 4  ;;  %s3857_s24 = scalar_lea.hbm %s5781_s0, 448  ;;  %s33_s21 = int_to_ptr.vmem [resolvable:$true] %s32_s21 }
   0x5   :  { %p3858_p0 = scmp.ne.s32.totalorder %s5781_s0, %s3857_s24  ;;  %s3859_s29 = scalar_lea.hbm %s5781_s0, 896 }
   0x6   :  { %p3860_p1 = scmp.lt.u32.totalorder %s3859_s29, %s3857_s24  ;;  %p3861_p2 = scmp.lt.u32.totalorder %s3857_s24, %s5781_s0 }
   0x8   :  { %p3862_p3 = por %p3861_p2, %p3860_p1 }
   0xa   :  { %p3863_p4 = pnand %p3862_p3, %p3858_p0 }
   0xc   :  { %3866 = shalt.err (!%p3863_p4)
}
   0xd   :  { %s3867_s6 = scalar_lea.vmem %s19_s19, 448  ;;  %p3872_p6 = scmp.lt.s32.totalorder %s19_s19, %s19_s19 }
   0xe   :  { %p3868_p5 = scmp.ne.s32.totalorder %s19_s19, %s3867_s6  ;;  %p3873_p7 = scmp.lt.s32.totalorder %s3867_s6, %s3867_s6 }
  0x10   :  { %p3874_p8 = por %p3873_p7, %p3872_p6 }
  0x12   :  { %p3875_p9 = pnand %p3874_p8, %p3868_p5 }
  0x14   :  { %3878 = shalt.err (!%p3875_p9)
}
  0x15   :  { %21 = dma.hbm_to_vmem [thread:$0]  %s5781_s0, 448, %s19_s19, [#allocation4]  }
  0x16   :  { %s3903_s11 = scalar_lea.hbm %s5782_s1, 896  ;;  %p3882_p11 = scmp.lt.u32.totalorder %s3991_s17, %s5782_s1 }
  0x17   :  { %p3880_p10 = scmp.ne.s32.totalorder %s3991_s17, %s3903_s11  ;;  %p3883_p12 = scmp.lt.u32.totalorder %s3903_s11, %s3903_s11 }
  0x18   :  { %p3885_p0 = scmp.lt.u32.totalorder %s3903_s11, %s3991_s17 }
  0x19   :  { %p3884_p13 = por %p3883_p12, %p3882_p11 }
  0x1b   :  { %p3886_p1 = por %p3885_p0, %p3884_p13 }
  0x1d   :  { %p3887_p2 = pnand %p3886_p1, %p3880_p10 }
  0x1f   :  { %3890 = shalt.err (!%p3887_p2)
}
  0x20   :  { %s3891_s14 = scalar_lea.vmem %s33_s21, 448  ;;  %p3896_p4 = scmp.lt.s32.totalorder %s33_s21, %s33_s21 }
  0x21   :  { %p3892_p3 = scmp.ne.s32.totalorder %s33_s21, %s3891_s14  ;;  %p3897_p5 = scmp.lt.s32.totalorder %s3891_s14, %s3891_s14 }
  0x23   :  { %p3898_p6 = por %p3897_p5, %p3896_p4 }
  0x25   :  { %p3899_p7 = pnand %p3898_p6, %p3892_p3 }
  0x27   :  { %3902 = shalt.err (!%p3899_p7)
}
  0x28   :  { %35 = dma.hbm_to_vmem [thread:$0]  %s3991_s17, 448, %s33_s21, [#allocation7]  }
  0x29   :  { %3926 = dma.done.wait [#allocation4], 448  }
  0x2a   :  { %3927 = vsyncadd [#allocation4], 4294966848 }
  0x2b   :  { %3928 = dma.done.wait [#allocation7], 448  }
  0x2c   :  { %3929 = vsyncadd [#allocation7], 4294966848  ;;  %v62_v0 = vlaneseq  ;;  %v3934_v1 = vmov 1983009808   ;;  %v49_v6 = vld [vmem:[#allocation3] sm:$0xff]  ;;  %v50_v7 = vld [vmem:[#allocation3 + $0x8] sm:$0xff] }
  0x2d   :  { %v60_v2 = vunpack.c.l.s4 %v3934_v1  ;;  %v58_v9 = vcombine.high %v49_v6, %v49_v6  ;;  %v75_v11 = vcombine.high %v50_v7, %v50_v7  ;;  %s3935_s0 = smov 126   ;;  %s3936_s1 = smov 127   ;;  %v51_v28 = vld [vmem:[#allocation3 + $0x10] sm:$0xff]  ;;  %vm195_vm0 = vcmask 1043456  }
  0x2e   :  { %v63_v3 = vshrl.u32 %v62_v0, 7  ;;  %s3937_s15 = smov 118   ;;  %s3938_s16 = smov 117   ;;  %v92_v32 = vcombine.high %v51_v28, %v51_v28  ;;  %vm250_vm1 = vcmask 1031168   ;;  %vm303_vm2 = vcmask 965632  }
  0x2f   :  { %v61_v4 = vunpack.c.0.s8 %v60_v2  ;;  %s3939_s17 = smov 116   ;;  %s3940_s18 = smov 108   ;;  %v3305_v58 = vld.sshfl [vmem:[#allocation3 + $0x18] sm:$0x33 pattern:$0x76325410] }
  0x30   :  { %s3941_s19 = smov 107   ;;  %s3942_s20 = smov 106   ;;  %vm197_vm3 = vcmask 1039360   ;;  %v4235_v61 = vcombine.high %v3305_v58, %v3305_v58  ;;  %vm356_vm4 = vcmask 957440   ;;  %vm409_vm5 = vcmask 949248  }
  0x31   :  { %v4018_v5 = vsub.s32 %v61_v4, %v63_v3  ;;  %s3943_s21 = smov 28   ;;  %s3944_s22 = smov 27   ;;  %vm462_vm6 = vcmask 883712   ;;  %vm515_vm7 = vcmask 875520   ;;  %vm568_vm8 = vcmask 867328  }
  0x32   :  { %s3945_s23 = smov 26   ;;  %s3946_s24 = smov 18   ;;  %vm5817_vm9 = vcmask 228352   ;;  %vm5809_vm10 = vcmask 220160   ;;  %vm5808_vm11 = vcmask 211968   ;;  %vm5788_vm12 = vcmask 146432  }
  0x33   :  { %v65_v8 = vrot.slane %v49_v6, %v4018_v5  ;;  %v82_v10 = vrot.slane %v50_v7, %v4018_v5  ;;  %v72_v14 = vrot.slane %v58_v9, %v4018_v5  ;;  %v89_v15 = vrot.slane %v75_v11, %v4018_v5  ;;  %s3947_s25 = smov 17   ;;  %s3948_s26 = smov 16  }
  0x34   :  { %v4079_v29 = vrot.slane %v51_v28, %v4018_v5  ;;  %s3949_s27 = smov 8   ;;  %s3950_s28 = smov 7   ;;  %v4170_v34 = vrot.slane %v92_v32, %v4018_v5  ;;  %v4247_v5 = vcombine.low %v3305_v58, %v4235_v61  ;;  %vm5789_vm13 = vcmask 138240  }
  0x35   :  { %v73_v12 = vcombine.high %v65_v8, %v65_v8  ;;  %v90_v13 = vcombine.high %v82_v10, %v82_v10  ;;  %v74_v18 = vcombine.high %v72_v14, %v72_v14  ;;  %v4030_v20 = vcombine.high %v89_v15, %v89_v15  ;;  %s3951_s29 = smov 6   ;;  %s3952_s30 = smov 56  }
  0x36   :  { %v4089_v30 = vcombine.high %v4079_v29, %v4079_v29  ;;  %s3953_s5 = smov 55   ;;  %v4176_v35 = vcombine.high %v4170_v34, %v4170_v34  ;;  %s3954_s6 = smov 54   ;;  %160 = vst [vmem:[#allocation2 + $0x30] sm:$0x33] %v4247_v5  ;;  %vm5786_vm14 = vcmask 130048   ;;  %vm5787_vm15 = vcmask 64512  }
  0x37   :  { %v4024_v16 = vcombine.low %v65_v8, %v73_v12  ;;  %v4026_v17 = vcombine.low %v82_v10, %v90_v13  ;;  %v4028_v19 = vcombine.low %v73_v12, %v72_v14  ;;  %v4032_v21 = vcombine.low %v90_v13, %v89_v15  ;;  %s3955_s7 = smov 46   ;;  %s3956_s8 = smov 45  }
  0x38   :  { %v4041_v23 = vcombine.low %v72_v14, %v74_v18  ;;  %v4043_v24 = vcombine.low %v74_v18, %v82_v10  ;;  %v4046_v25 = vcombine.low %v89_v15, %v4030_v20  ;;  %v4095_v31 = vcombine.low %v4079_v29, %v4089_v30  ;;  %s3957_s9 = smov 44   ;;  %s3958_s10 = smov 36  }
  0x39   :  { %225 = vrot.lane.b32.xlu1 %v4024_v16, %s3935_s0  ;;  %154 = vst [vmem:[#allocation2] sm:$0x33] %v4024_v16  ;;  %v4038_v22 = vrot.slane %v4024_v16, 6  ;;  %156 = vst [vmem:[#allocation2 + $0x10] sm:$0x33] %v4026_v17  ;;  %v4057_v26 = vrot.slane %v4026_v17, 6  ;;  %v4185_v37 = vcombine.low %v4170_v34, %v4176_v35 }
  0x3a   :  { %155 = vst [vmem:[#allocation2 + $0x8] sm:$0x33] %v4041_v23  ;;  %157 = vst [vmem:[#allocation2 + $0x18] sm:$0x33] %v4046_v25  ;;  %v4066_v27 = vrot.slane %v4041_v23, 6  ;;  %v4165_v33 = vrot.slane %v4028_v19, 6 }
  0x3b   :  { %171 = vrot.lane.b32.xlu0 %v4038_v22, %s3936_s1  ;;  %158 = vst [vmem:[#allocation2 + $0x20] sm:$0x33] %v4095_v31  ;;  %v4181_v36 = vrot.slane %v4043_v24, 6  ;;  %159 = vst [vmem:[#allocation2 + $0x28] sm:$0x33] %v4185_v37  ;;  %v4197_v38 = vrot.slane %v4032_v21, 6 }
  0x3c   :  { %s3959_s11 = smov 35   ;;  %s3960_s12 = smov 34   ;;  %v4271_v32 = vrot.slane %v4046_v25, 6 }
  0x3d   :  { %229 = vrot.lane.b32.xlu1 %v4026_v17, %s3935_s0 }
  0x3f   :  { %278 = vrot.lane.b32.xlu0 %v4038_v22, %s3937_s15 }
  0x41   :  { %331 = vrot.lane.b32.xlu1 %v4024_v16, %s3938_s16 }
  0x43   :  { %175 = vrot.lane.b32.xlu0 %v4057_v26, %s3936_s1 }
  0x45   :  { %227 = vrot.lane.b32.xlu1 %v4041_v23, %s3935_s0 }
  0x47   :  { %282 = vrot.lane.b32.xlu0 %v4057_v26, %s3937_s15 }
  0x49   :  { %280 = vrot.lane.b32.xlu1 %v4066_v27, %s3937_s15 }
  0x4b   :  { %173 = vrot.lane.b32.xlu0 %v4066_v27, %s3936_s1 }
  0x4d   :  { %384 = vrot.lane.b32.xlu1 %v4038_v22, %s3939_s17 }
  0x4f   :  { %333 = vrot.lane.b32.xlu0 %v4041_v23, %s3938_s16 }
  0x51   :  { %437 = vrot.lane.b32.xlu1 %v4024_v16, %s3940_s18 }
  0x53   :  { %386 = vrot.lane.b32.xlu0 %v4066_v27, %s3939_s17 }
  0x55   :  { %490 = vrot.lane.b32.xlu1 %v4038_v22, %s3941_s19 }
  0x57   :  { %439 = vrot.lane.b32.xlu0 %v4041_v23, %s3940_s18 }
  0x59   :  { %335 = vrot.lane.b32.xlu1 %v4026_v17, %s3938_s16 }
  0x5b   :  { %492 = vrot.lane.b32.xlu0 %v4066_v27, %s3941_s19 }
  0x5d   :  { %441 = vrot.lane.b32.xlu1 %v4026_v17, %s3940_s18 }
  0x5f   :  { %388 = vrot.lane.b32.xlu0 %v4057_v26, %s3939_s17 }
  0x61   :  { %543 = vrot.lane.b32.xlu1 %v4024_v16, %s3942_s20 }
  0x63   :  { %494 = vrot.lane.b32.xlu0 %v4057_v26, %s3941_s19 }
  0x65   :  { %596 = vrot.lane.b32.xlu1 %v4038_v22, %s3943_s21 }
  0x67   :  { %545 = vrot.lane.b32.xlu0 %v4041_v23, %s3942_s20 }
  0x69   :  { %649 = vrot.lane.b32.xlu1 %v4024_v16, %s3944_s22 }
  0x6b   :  { %598 = vrot.lane.b32.xlu0 %v4066_v27, %s3943_s21 }
  0x6d   :  { %702 = vrot.lane.b32.xlu1 %v4038_v22, %s3945_s23 }
  0x6f   :  { %651 = vrot.lane.b32.xlu0 %v4041_v23, %s3944_s22 }
  0x71   :  { %547 = vrot.lane.b32.xlu1 %v4026_v17, %s3942_s20 }
  0x73   :  { %704 = vrot.lane.b32.xlu0 %v4066_v27, %s3945_s23 }
  0x75   :  { %653 = vrot.lane.b32.xlu1 %v4026_v17, %s3944_s22 }
  0x77   :  { %600 = vrot.lane.b32.xlu0 %v4057_v26, %s3943_s21 }
  0x79   :  { %755 = vrot.lane.b32.xlu1 %v4024_v16, %s3946_s24 }
  0x7b   :  { %706 = vrot.lane.b32.xlu0 %v4057_v26, %s3945_s23 }
  0x7d   :  { %808 = vrot.lane.b32.xlu1 %v4038_v22, %s3947_s25 }
  0x7f   :  { %757 = vrot.lane.b32.xlu0 %v4041_v23, %s3946_s24 }
  0x81   :  { %861 = vrot.lane.b32.xlu1 %v4024_v16, %s3948_s26 }
  0x83   :  { %810 = vrot.lane.b32.xlu0 %v4066_v27, %s3947_s25 }
  0x85   :  { %914 = vrot.lane.b32.xlu1 %v4038_v22, %s3949_s27 }
  0x87   :  { %863 = vrot.lane.b32.xlu0 %v4041_v23, %s3948_s26 }
  0x89   :  { %759 = vrot.lane.b32.xlu1 %v4026_v17, %s3946_s24 }
  0x8b   :  { %916 = vrot.lane.b32.xlu0 %v4066_v27, %s3949_s27 }
  0x8d   :  { %865 = vrot.lane.b32.xlu1 %v4026_v17, %s3948_s26 }
  0x8f   :  { %812 = vrot.lane.b32.xlu0 %v4057_v26, %s3947_s25 }
  0x91   :  { %967 = vrot.lane.b32.xlu1 %v4024_v16, %s3950_s28 }
  0x93   :  { %918 = vrot.lane.b32.xlu0 %v4057_v26, %s3949_s27 }
  0x95   :  { %1020 = vrot.lane.b32.xlu1 %v4038_v22, %s3951_s29 }
  0x97   :  { %969 = vrot.lane.b32.xlu0 %v4041_v23, %s3950_s28 }
  0x99   :  { %1082 = vrot.lane.b32.xlu1 %v4028_v19, %s3952_s30 }
  0x9b   :  { %1022 = vrot.lane.b32.xlu0 %v4066_v27, %s3951_s29 }
  0x9d   :  { %1143 = vrot.lane.b32.xlu1 %v4165_v33, %s3953_s5 }
  0x9f   :  { %1084 = vrot.lane.b32.xlu0 %v4043_v24, %s3952_s30 }
  0xa1   :  { %971 = vrot.lane.b32.xlu1 %v4026_v17, %s3950_s28 }
  0xa3   :  { %1145 = vrot.lane.b32.xlu0 %v4181_v36, %s3953_s5 }
  0xa5   :  { %1086 = vrot.lane.b32.xlu1 %v4032_v21, %s3952_s30 }
  0xa7   :  { %1024 = vrot.lane.b32.xlu0 %v4057_v26, %s3951_s29 }
  0xa9   :  { %1196 = vrot.lane.b32.xlu1 %v4028_v19, %s3954_s6 }
  0xab   :  { %v226_v39 = vpop.permute.xlu1 %225  ;;  %1147 = vrot.lane.b32.xlu0 %v4197_v38, %s3953_s5 }
  0xac   :  { %v241_v46 = vrot.slane %v226_v39, 4 }
  0xad   :  { %v172_v40 = vpop.permute.xlu0 %171  ;;  %1249 = vrot.lane.b32.xlu1 %v4165_v33, %s3955_s7 }
  0xae   :  { %v187_v59 = vrot.slane %v172_v40, 4 }
  0xaf   :  { %v4205_v41 = vpop.permute.xlu1 %229  ;;  %1198 = vrot.lane.b32.xlu0 %v4043_v24, %s3954_s6 }
  0xb0   :  { %v243_v47 = vrot.slane %v4205_v41, 4 }
  0xb1   :  { %v279_v42 = vpop.permute.xlu0 %278  ;;  %1302 = vrot.lane.b32.xlu1 %v4028_v19, %s3956_s8 }
  0xb2   :  { %v294_v52 = vrot.slane %v279_v42, 4 }
  0xb3   :  { %v332_v43 = vpop.permute.xlu1 %331  ;;  %1251 = vrot.lane.b32.xlu0 %v4181_v36, %s3955_s7 }
  0xb4   :  { %v347_v11 = vrot.slane %v332_v43, 4 }
  0xb5   :  { %v4213_v44 = vpop.permute.xlu0 %175  ;;  %1355 = vrot.lane.b32.xlu1 %v4165_v33, %s3957_s9 }
  0xb6   :  { %v189_v62 = vrot.slane %v4213_v44, 4 }
  0xb7   :  { %v228_v45 = vpop.permute.xlu1 %227  ;;  %1304 = vrot.lane.b32.xlu0 %v4043_v24, %s3956_s8 }
  0xb8   :  { %v242_v48 = vrot.slane %v228_v45, 4 }
  0xb9   :  { %v4220_v49 = vpop.permute.xlu0 %282  ;;  %1200 = vrot.lane.b32.xlu1 %v4032_v21, %s3954_s6 }
  0xba   :  { %v249_v50 = vsel %vm195_vm0, %v241_v46, %v242_v48  ;;  %v252_v51 = vsel %vm195_vm0, %v242_v48, %v243_v47  ;;  %v296_v56 = vrot.slane %v4220_v49, 4 }
  0xbb   :  { %v251_v53 = vsel %vm250_vm1, %v226_v39, %v249_v50  ;;  %v253_v54 = vsel %vm250_vm1, %v228_v45, %v252_v51  ;;  %v281_v55 = vpop.permute.xlu1 %280  ;;  %1357 = vrot.lane.b32.xlu0 %v4181_v36, %s3957_s9 }
  0xbc   :  { %271 = vst [vmem:[#allocation2 + $0x38] sm:$0x33] %v251_v53  ;;  %272 = vst [vmem:[#allocation2 + $0x40] sm:$0x33] %v253_v54  ;;  %v295_v57 = vrot.slane %v281_v55, 4 }
  0xbd   :  { %1306 = vrot.lane.b32.xlu1 %v4032_v21, %s3956_s8  ;;  %v174_v60 = vpop.permute.xlu0 %173 }
  0xbe   :  { %v302_v63 = vsel %vm195_vm0, %v294_v52, %v295_v57  ;;  %v305_v0 = vsel %vm195_vm0, %v295_v57, %v296_v56  ;;  %v188_v1 = vrot.slane %v174_v60, 4 }
  0xbf   :  { %v304_v2 = vsel %vm303_vm2, %v279_v42, %v302_v63  ;;  %v306_v3 = vsel %vm303_vm2, %v281_v55, %v305_v0  ;;  %v385_v4 = vpop.permute.xlu1 %384  ;;  %1253 = vrot.lane.b32.xlu0 %v4197_v38, %s3955_s7 }
  0xc0   :  { %324 = vst [vmem:[#allocation2 + $0x38] sm:$0xcc] %v304_v2  ;;  %325 = vst [vmem:[#allocation2 + $0x40] sm:$0xcc] %v306_v3  ;;  %v196_v6 = vsel %vm195_vm0, %v187_v59, %v188_v1  ;;  %v199_v7 = vsel %vm195_vm0, %v188_v1, %v189_v62  ;;  %v400_v17 = vrot.slane %v385_v4, 4 }
  0xc1   :  { %v198_v8 = vsel %vm197_vm3, %v172_v40, %v196_v6  ;;  %v200_v9 = vsel %vm197_vm3, %v174_v60, %v199_v7  ;;  %1408 = vrot.lane.b32.xlu1 %v4028_v19, %s3958_s10  ;;  %v334_v10 = vpop.permute.xlu0 %333  ;;  %v3961_v6 = vmov 0  }
  0xc2   :  { %218 = vst [vmem:[#allocation2] sm:$0xcc] %v198_v8  ;;  %219 = vst [vmem:[#allocation2 + $0x8] sm:$0xcc] %v200_v9  ;;  %v348_v12 = vrot.slane %v334_v10, 4  ;;  %2252 = vmatprep.mubr.bf16.mxu0 %v3961_v6  ;;  %2303 = vmatprep.mubr.bf16.mxu1 %v3961_v6 }
  0xc3   :  { %v438_v13 = vpop.permute.xlu1 %437  ;;  %1359 = vrot.lane.b32.xlu0 %v4197_v38, %s3957_s9  ;;  %3533 = vset.pattern.permute.xlu1 %v3961_v6 }
  0xc4   :  { %v355_v14 = vsel %vm195_vm0, %v347_v11, %v348_v12  ;;  %3532 = vset.pattern.permute.xlu0 %v3961_v6 }
  0xc5   :  { %v357_v15 = vsel %vm356_vm4, %v332_v43, %v355_v14  ;;  %1461 = vrot.lane.b32.xlu1 %v4165_v33, %s3959_s11  ;;  %v387_v16 = vpop.permute.xlu0 %386  ;;  %v453_v33 = vrot.slane %v438_v13, 4 }
  0xc6   :  { %377 = vst [vmem:[#allocation2 + $0x70] sm:$0x33] %v357_v15  ;;  %v401_v18 = vrot.slane %v387_v16, 4 }
  0xc7   :  { %v491_v22 = vpop.permute.xlu1 %490  ;;  %1410 = vrot.lane.b32.xlu0 %v4043_v24, %s3958_s10 }
  0xc8   :  { %v408_v23 = vsel %vm195_vm0, %v400_v17, %v401_v18  ;;  %v506_v51 = vrot.slane %v491_v22, 4 }
  0xc9   :  { %v410_v26 = vsel %vm409_vm5, %v385_v4, %v408_v23  ;;  %1514 = vrot.lane.b32.xlu1 %v4028_v19, %s3960_s12  ;;  %v440_v27 = vpop.permute.xlu0 %439  ;;  %v3536_v28 = vld [vmem:[#allocation2 + $0x4] ss:$56 sps:$4 sm:$0xff]   ;;  %v3540_v42 = vld [vmem:[#allocation2] ss:$56 sps:$4 sm:$0xff]   ;;  %v4313_v4 = vrot.slane %v4095_v31, 6 }
  0xca   :  { %430 = vst [vmem:[#allocation2 + $0x70] sm:$0xcc] %v410_v26  ;;  %v454_v39 = vrot.slane %v440_v27, 4  ;;  %v3538_v40 = vld [vmem:[#allocation2 + $0xc] ss:$56 sps:$4 sm:$0xff]   ;;  %2220 = vmatprep.subr.bf16.mxu0 %v3536_v28 }
  0xcb   :  { %v4273_v43 = vpop.permute.xlu1 %335  ;;  %1463 = vrot.lane.b32.xlu0 %v4181_v36, %s3959_s11  ;;  %v3541_v45 = vld [vmem:[#allocation2 + $0x8] ss:$56 sps:$4 sm:$0xff]   ;;  %2271 = vmatprep.subr.bf16.mxu1 %v3538_v40 }
  0xcc   :  { %v461_v19 = vsel %vm195_vm0, %v453_v33, %v454_v39  ;;  %v349_v46 = vrot.slane %v4273_v43, 4  ;;  %2221 = vmatpush1.bf16.msra.mxu0 %v3540_v42  ;;  %2272 = vmatpush1.bf16.msra.mxu1 %v3541_v45 }
  0xcd   :  { %v463_v48 = vsel %vm462_vm6, %v438_v13, %v461_v19  ;;  %177 = vrot.lane.b32.xlu1 %v4271_v32, %s3936_s1  ;;  %v493_v50 = vpop.permute.xlu0 %492 }
  0xce   :  { %483 = vst [vmem:[#allocation2 + $0xa8] sm:$0x33] %v463_v48  ;;  %v358_v36 = vsel %vm195_vm0, %v348_v12, %v349_v46  ;;  %v507_v52 = vrot.slane %v493_v50, 4 }
  0xcf   :  { %v359_v53 = vsel %vm356_vm4, %v334_v10, %v358_v36  ;;  %v4286_v54 = vpop.permute.xlu1 %441  ;;  %1516 = vrot.lane.b32.xlu0 %v4043_v24, %s3960_s12 }
  0xd0   :  { %378 = vst [vmem:[#allocation2 + $0x78] sm:$0x33] %v359_v53  ;;  %v514_v55 = vsel %vm195_vm0, %v506_v51, %v507_v52  ;;  %v455_v57 = vrot.slane %v4286_v54, 4 }
  0xd1   :  { %v516_v58 = vsel %vm515_vm7, %v491_v22, %v514_v55  ;;  %284 = vrot.lane.b32.xlu1 %v4271_v32, %s3937_s15  ;;  %v4295_v59 = vpop.permute.xlu0 %388 }
  0xd2   :  { %536 = vst [vmem:[#allocation2 + $0xa8] sm:$0xcc] %v516_v58  ;;  %v464_v60 = vsel %vm195_vm0, %v454_v39, %v455_v57  ;;  %v402_v63 = vrot.slane %v4295_v59, 4 }
  0xd3   :  { %v465_v24 = vsel %vm462_vm6, %v440_v27, %v464_v60  ;;  %v544_v0 = vpop.permute.xlu1 %543  ;;  %231 = vrot.lane.b32.xlu0 %v4046_v25, %s3935_s0 }
  0xd4   :  { %484 = vst [vmem:[#allocation2 + $0xb0] sm:$0x33] %v465_v24  ;;  %v411_v1 = vsel %vm195_vm0, %v401_v18, %v402_v63  ;;  %v559_v13 = vrot.slane %v544_v0, 4 }
  0xd5   :  { %v412_v2 = vsel %vm409_vm5, %v387_v16, %v411_v1  ;;  %1465 = vrot.lane.b32.xlu1 %v4197_v38, %s3959_s11  ;;  %v4310_v3 = vpop.permute.xlu0 %494 }
  0xd6   :  { %431 = vst [vmem:[#allocation2 + $0x78] sm:$0xcc] %v412_v2  ;;  %v508_v7 = vrot.slane %v4310_v3, 4 }
  0xd7   :  { %v597_v8 = vpop.permute.xlu1 %596  ;;  %1412 = vrot.lane.b32.xlu0 %v4032_v21, %s3958_s10 }
  0xd8   :  { %v517_v38 = vsel %vm195_vm0, %v507_v52, %v508_v7  ;;  %v612_v22 = vrot.slane %v597_v8, 4 }
  0xd9   :  { %v518_v9 = vsel %vm515_vm7, %v493_v50, %v517_v38  ;;  %179 = vrot.lane.b32.xlu1 %v4313_v4, %s3936_s1  ;;  %v546_v10 = vpop.permute.xlu0 %545  ;;  %v3542_v11 = vld [vmem:[#allocation2 + $0x74] ss:$56 sps:$4 sm:$0xff]   ;;  %v3544_v12 = vld [vmem:[#allocation2 + $0x70] ss:$56 sps:$4 sm:$0xff]  }
  0xda   :  { %537 = vst [vmem:[#allocation2 + $0xb0] sm:$0xcc] %v518_v9  ;;  %v560_v14 = vrot.slane %v546_v10, 4  ;;  %2222 = vmatprep.subr.bf16.mxu0 %v3542_v11 }
  0xdb   :  { %v650_v15 = vpop.permute.xlu1 %649  ;;  %1518 = vrot.lane.b32.xlu0 %v4032_v21, %s3960_s12  ;;  %2223 = vmatpush1.bf16.msra.mxu0 %v3544_v12 }
  0xdc   :  { %v567_v16 = vsel %vm195_vm0, %v559_v13, %v560_v14  ;;  %v665_v40 = vrot.slane %v650_v15, 4 }
  0xdd   :  { %v569_v17 = vsel %vm568_vm8, %v544_v0, %v567_v16  ;;  %286 = vrot.lane.b32.xlu1 %v4313_v4, %s3937_s15  ;;  %v599_v18 = vpop.permute.xlu0 %598 }
  0xde   :  { %589 = vst [vmem:[#allocation2 + $0xe0] sm:$0x33] %v569_v17  ;;  %v613_v23 = vrot.slane %v599_v18, 4 }
  0xdf   :  { %v703_v26 = vpop.permute.xlu1 %702  ;;  %233 = vrot.lane.b32.xlu0 %v4095_v31, %s3935_s0 }
  0xe0   :  { %v620_v21 = vsel %vm195_vm0, %v612_v22, %v613_v23  ;;  %v718_v36 = vrot.slane %v703_v26, 4 }
  0xe1   :  { %v622_v27 = vsel %vm5817_vm9, %v597_v8, %v620_v21  ;;  %390 = vrot.lane.b32.xlu1 %v4271_v32, %s3939_s17  ;;  %v652_v28 = vpop.permute.xlu0 %651  ;;  %v3545_v33 = vld [vmem:[#allocation2 + $0x7c] ss:$56 sps:$4 sm:$0xff]   ;;  %v3547_v39 = vld [vmem:[#allocation2 + $0x78] ss:$56 sps:$4 sm:$0xff]  }
  0xe2   :  { %642 = vst [vmem:[#allocation2 + $0xe0] sm:$0xcc] %v622_v27  ;;  %v666_v42 = vrot.slane %v652_v28, 4  ;;  %2273 = vmatprep.subr.bf16.mxu1 %v3545_v33 }
  0xe3   :  { %v4340_v45 = vpop.permute.xlu1 %547  ;;  %337 = vrot.lane.b32.xlu0 %v4046_v25, %s3938_s16  ;;  %2274 = vmatpush1.bf16.msra.mxu1 %v3547_v39 }
  0xe4   :  { %v673_v19 = vsel %vm195_vm0, %v665_v40, %v666_v42  ;;  %v561_v48 = vrot.slane %v4340_v45, 4 }
  0xe5   :  { %v675_v50 = vsel %vm5809_vm10, %v650_v15, %v673_v19  ;;  %496 = vrot.lane.b32.xlu1 %v4271_v32, %s3941_s19  ;;  %v705_v51 = vpop.permute.xlu0 %704 }
  0xe6   :  { %695 = vst [vmem:[#allocation2 + $0x118] sm:$0x33] %v675_v50  ;;  %v570_v52 = vsel %vm195_vm0, %v560_v14, %v561_v48  ;;  %v719_v53 = vrot.slane %v705_v51, 4 }
  0xe7   :  { %v571_v55 = vsel %vm568_vm8, %v546_v10, %v570_v52  ;;  %v4353_v58 = vpop.permute.xlu1 %653  ;;  %443 = vrot.lane.b32.xlu0 %v4046_v25, %s3940_s18 }
  0xe8   :  { %590 = vst [vmem:[#allocation2 + $0xe8] sm:$0x33] %v571_v55  ;;  %v726_v60 = vsel %vm195_vm0, %v718_v36, %v719_v53  ;;  %v667_v24 = vrot.slane %v4353_v58, 4 }
  0xe9   :  { %v728_v0 = vsel %vm5808_vm11, %v703_v26, %v726_v60  ;;  %392 = vrot.lane.b32.xlu1 %v4313_v4, %s3939_s17  ;;  %v4362_v1 = vpop.permute.xlu0 %600 }
  0xea   :  { %748 = vst [vmem:[#allocation2 + $0x118] sm:$0xcc] %v728_v0  ;;  %v676_v2 = vsel %vm195_vm0, %v666_v42, %v667_v24  ;;  %v614_v8 = vrot.slane %v4362_v1, 4 }
  0xeb   :  { %v677_v38 = vsel %vm5809_vm10, %v652_v28, %v676_v2  ;;  %v756_v9 = vpop.permute.xlu1 %755  ;;  %339 = vrot.lane.b32.xlu0 %v4095_v31, %s3938_s16 }
  0xec   :  { %696 = vst [vmem:[#allocation2 + $0x120] sm:$0x33] %v677_v38  ;;  %v623_v10 = vsel %vm195_vm0, %v613_v23, %v614_v8  ;;  %v771_v23 = vrot.slane %v756_v9, 4 }
  0xed   :  { %v624_v11 = vsel %vm5817_vm9, %v599_v18, %v623_v10  ;;  %498 = vrot.lane.b32.xlu1 %v4313_v4, %s3941_s19  ;;  %v4377_v12 = vpop.permute.xlu0 %706 }
  0xee   :  { %643 = vst [vmem:[#allocation2 + $0xe8] sm:$0xcc] %v624_v11  ;;  %v720_v13 = vrot.slane %v4377_v12, 4 }
  0xef   :  { %v809_v14 = vpop.permute.xlu1 %808  ;;  %445 = vrot.lane.b32.xlu0 %v4095_v31, %s3940_s18 }
  0xf0   :  { %v729_v15 = vsel %vm195_vm0, %v719_v53, %v720_v13  ;;  %v824_v39 = vrot.slane %v809_v14, 4 }
  0xf1   :  { %v730_v16 = vsel %vm5808_vm11, %v705_v51, %v729_v15  ;;  %602 = vrot.lane.b32.xlu1 %v4271_v32, %s3943_s21  ;;  %v758_v17 = vpop.permute.xlu0 %757  ;;  %v3548_v18 = vld [vmem:[#allocation2 + $0xe4] ss:$56 sps:$4 sm:$0xff]   ;;  %v3550_v22 = vld [vmem:[#allocation2 + $0xe0] ss:$56 sps:$4 sm:$0xff]  }
  0xf2   :  { %749 = vst [vmem:[#allocation2 + $0x120] sm:$0xcc] %v730_v16  ;;  %v772_v26 = vrot.slane %v758_v17, 4  ;;  %2224 = vmatprep.subr.bf16.mxu0 %v3548_v18 }
  0xf3   :  { %v862_v21 = vpop.permute.xlu1 %861  ;;  %549 = vrot.lane.b32.xlu0 %v4046_v25, %s3942_s20  ;;  %2225 = vmatpush1.bf16.msra.mxu0 %v3550_v22 }
  0xf4   :  { %v779_v27 = vsel %vm195_vm0, %v771_v23, %v772_v26  ;;  %v877_v53 = vrot.slane %v862_v21, 4 }
  0xf5   :  { %v781_v28 = vsel %vm5788_vm12, %v756_v9, %v779_v27  ;;  %708 = vrot.lane.b32.xlu1 %v4271_v32, %s3945_s23  ;;  %v811_v33 = vpop.permute.xlu0 %810 }
  0xf6   :  { %801 = vst [vmem:[#allocation2 + $0x150] sm:$0x33] %v781_v28  ;;  %v825_v40 = vrot.slane %v811_v33, 4 }
  0xf7   :  { %v915_v42 = vpop.permute.xlu1 %914  ;;  %655 = vrot.lane.b32.xlu0 %v4046_v25, %s3944_s22 }
  0xf8   :  { %v832_v19 = vsel %vm195_vm0, %v824_v39, %v825_v40  ;;  %v930_v10 = vrot.slane %v915_v42, 4 }
  0xf9   :  { %v834_v50 = vsel %vm5789_vm13, %v809_v14, %v832_v19  ;;  %604 = vrot.lane.b32.xlu1 %v4313_v4, %s3943_s21  ;;  %v864_v51 = vpop.permute.xlu0 %863  ;;  %v3551_v36 = vld [vmem:[#allocation2 + $0xec] ss:$56 sps:$4 sm:$0xff]   ;;  %v3553_v52 = vld [vmem:[#allocation2 + $0xe8] ss:$56 sps:$4 sm:$0xff]  }
  0xfa   :  { %854 = vst [vmem:[#allocation2 + $0x150] sm:$0xcc] %v834_v50  ;;  %v878_v55 = vrot.slane %v864_v51, 4  ;;  %2275 = vmatprep.subr.bf16.mxu1 %v3551_v36 }
  0xfb   :  { %v4400_v60 = vpop.permute.xlu1 %759  ;;  %551 = vrot.lane.b32.xlu0 %v4095_v31, %s3942_s20  ;;  %2276 = vmatpush1.bf16.msra.mxu1 %v3553_v52 }
  0xfc   :  { %v885_v0 = vsel %vm195_vm0, %v877_v53, %v878_v55  ;;  %v773_v2 = vrot.slane %v4400_v60, 4 }
  0xfd   :  { %v887_v38 = vsel %vm5786_vm14, %v862_v21, %v885_v0  ;;  %710 = vrot.lane.b32.xlu1 %v4313_v4, %s3945_s23  ;;  %v917_v9 = vpop.permute.xlu0 %916 }
  0xfe   :  { %907 = vst [vmem:[#allocation2 + $0x188] sm:$0x33] %v887_v38  ;;  %v782_v11 = vsel %vm195_vm0, %v772_v26, %v773_v2  ;;  %v931_v14 = vrot.slane %v917_v9, 4 }
  0xff   :  { %v783_v15 = vsel %vm5788_vm12, %v758_v17, %v782_v11  ;;  %v4413_v16 = vpop.permute.xlu1 %865  ;;  %657 = vrot.lane.b32.xlu0 %v4095_v31, %s3944_s22  ;;  %vm5790_vm12 = vcmask 457728  }
 0x100   :  { %802 = vst [vmem:[#allocation2 + $0x158] sm:$0x33] %v783_v15  ;;  %v938_v18 = vsel %vm195_vm0, %v930_v10, %v931_v14  ;;  %v879_v22 = vrot.slane %v4413_v16, 4 }
 0x101   :  { %v940_v23 = vsel %vm5787_vm15, %v915_v42, %v938_v18  ;;  %814 = vrot.lane.b32.xlu1 %v4271_v32, %s3947_s25  ;;  %v4422_v26 = vpop.permute.xlu0 %812 }
 0x102   :  { %960 = vst [vmem:[#allocation2 + $0x188] sm:$0xcc] %v940_v23  ;;  %v888_v17 = vsel %vm195_vm0, %v878_v55, %v879_v22  ;;  %v826_v21 = vrot.slane %v4422_v26, 4 }
 0x103   :  { %v889_v27 = vsel %vm5786_vm14, %v864_v51, %v888_v17  ;;  %v968_v28 = vpop.permute.xlu1 %967  ;;  %761 = vrot.lane.b32.xlu0 %v4046_v25, %s3946_s24  ;;  %vm5792_vm14 = vcmask 56320  }
 0x104   :  { %908 = vst [vmem:[#allocation2 + $0x190] sm:$0x33] %v889_v27  ;;  %v835_v39 = vsel %vm195_vm0, %v825_v40, %v826_v21  ;;  %v983_v55 = vrot.slane %v968_v28, 4 }
 0x105   :  { %v836_v42 = vsel %vm5789_vm13, %v811_v33, %v835_v39  ;;  %920 = vrot.lane.b32.xlu1 %v4271_v32, %s3949_s27  ;;  %v4437_v19 = vpop.permute.xlu0 %918  ;;  %vm5791_vm13 = vcmask 449536  }
 0x106   :  { %855 = vst [vmem:[#allocation2 + $0x158] sm:$0xcc] %v836_v42  ;;  %v932_v50 = vrot.slane %v4437_v19, 4 }
 0x107   :  { %v1021_v51 = vpop.permute.xlu1 %1020  ;;  %867 = vrot.lane.b32.xlu0 %v4046_v25, %s3948_s26 }
 0x108   :  { %v941_v36 = vsel %vm195_vm0, %v931_v14, %v932_v50  ;;  %v4456_v14 = vcombine.low %v4030_v20, %v4079_v29  ;;  %v1036_v15 = vrot.slane %v1021_v51, 4 }
 0x109   :  { %v942_v40 = vsel %vm5787_vm15, %v917_v9, %v941_v36  ;;  %816 = vrot.lane.b32.xlu1 %v4313_v4, %s3947_s25  ;;  %v970_v33 = vpop.permute.xlu0 %969  ;;  %v3554_v52 = vld [vmem:[#allocation2 + $0x154] ss:$56 sps:$4 sm:$0xff]   ;;  %v3556_v53 = vld [vmem:[#allocation2 + $0x150] ss:$56 sps:$4 sm:$0xff]   ;;  %vm5794_vm15 = vcmask 48128  }
 0x10a   :  { %961 = vst [vmem:[#allocation2 + $0x190] sm:$0xcc] %v942_v40  ;;  %v984_v0 = vrot.slane %v970_v33, 4  ;;  %2226 = vmatprep.subr.bf16.mxu0 %v3554_v52  ;;  %v4465_v20 = vrot.slane %v4456_v14, 6 }
 0x10b   :  { %v1083_v38 = vpop.permute.xlu1 %1082  ;;  %763 = vrot.lane.b32.xlu0 %v4095_v31, %s3946_s24  ;;  %2227 = vmatpush1.bf16.msra.mxu0 %v3556_v53 }
 0x10c   :  { %v991_v10 = vsel %vm195_vm0, %v983_v55, %v984_v0  ;;  %v1098_v42 = vrot.slane %v1083_v38, 4  ;;  %v4478_v55 = vcombine.low %v4089_v30, %v4170_v34 }
 0x10d   :  { %v993_v9 = vsel %vm5792_vm14, %v968_v28, %v991_v10  ;;  %922 = vrot.lane.b32.xlu1 %v4313_v4, %s3949_s27  ;;  %v1023_v11 = vpop.permute.xlu0 %1022 }
 0x10e   :  { %1013 = vst [vmem:[#allocation2 + $0x1c0] sm:$0x33] %v993_v9  ;;  %v1037_v18 = vrot.slane %v1023_v11, 4 }
 0x10f   :  { %v1144_v23 = vpop.permute.xlu1 %1143  ;;  %869 = vrot.lane.b32.xlu0 %v4095_v31, %s3948_s26 }
 0x110   :  { %v1044_v17 = vsel %vm195_vm0, %v1036_v15, %v1037_v18  ;;  %v1159_v10 = vrot.slane %v1144_v23, 4 }
 0x111   :  { %v1046_v27 = vsel %vm5794_vm15, %v1021_v51, %v1044_v17  ;;  %1026 = vrot.lane.b32.xlu1 %v4271_v32, %s3951_s29  ;;  %v1085_v28 = vpop.permute.xlu0 %1084  ;;  %v3557_v39 = vld [vmem:[#allocation2 + $0x15c] ss:$56 sps:$4 sm:$0xff]   ;;  %v3559_v29 = vld [vmem:[#allocation2 + $0x158] ss:$56 sps:$4 sm:$0xff]  }
 0x112   :  { %1066 = vst [vmem:[#allocation2 + $0x1c0] sm:$0xcc] %v1046_v27  ;;  %v1099_v36 = vrot.slane %v1085_v28, 4  ;;  %2277 = vmatprep.subr.bf16.mxu1 %v3557_v39  ;;  %v4496_v27 = vrot.slane %v4478_v55, 6 }
 0x113   :  { %v4467_v40 = vpop.permute.xlu1 %971  ;;  %973 = vrot.lane.b32.xlu0 %v4046_v25, %s3950_s28  ;;  %2278 = vmatpush1.bf16.msra.mxu1 %v3559_v29 }
 0x114   :  { %v1106_v51 = vsel %vm195_vm0, %v1098_v42, %v1099_v36  ;;  %v5803_v32 = vrot.slane %v4467_v40, 4 }
 0x115   :  { %v1108_v52 = vsel %vm5790_vm12, %v1083_v38, %v1106_v51  ;;  %1149 = vrot.lane.b32.xlu1 %v4465_v20, %s3953_s5  ;;  %v1146_v53 = vpop.permute.xlu0 %1145 }
 0x116   :  { %1128 = vst [vmem:[#allocation2 + $0x1f8] sm:$0x33] %v1108_v52  ;;  %v994_v25 = vsel %vm195_vm0, %v984_v0, %v5803_v32  ;;  %v1160_v9 = vrot.slane %v1146_v53, 4 }
 0x117   :  { %v995_v15 = vsel %vm5792_vm14, %v970_v33, %v994_v25  ;;  %v4484_v17 = vpop.permute.xlu1 %1086  ;;  %1088 = vrot.lane.b32.xlu0 %v4456_v14, %s3952_s30  ;;  %vm5796_vm14 = vcmask 367616  }
 0x118   :  { %1014 = vst [vmem:[#allocation2 + $0x1c8] sm:$0x33] %v995_v15  ;;  %v1167_v38 = vsel %vm195_vm0, %v1159_v10, %v1160_v9  ;;  %v5793_v30 = vrot.slane %v4484_v17, 4 }
 0x119   :  { %v1169_v34 = vsel %vm5791_vm13, %v1144_v23, %v1167_v38  ;;  %1028 = vrot.lane.b32.xlu1 %v4313_v4, %s3951_s29  ;;  %v4493_v0 = vpop.permute.xlu0 %1024 }
 0x11a   :  { %1189 = vst [vmem:[#allocation2 + $0x1f8] sm:$0xcc] %v1169_v34  ;;  %v1109_v33 = vsel %vm195_vm0, %v1099_v36, %v5793_v30  ;;  %v5804_v39 = vrot.slane %v4493_v0, 4 }
 0x11b   :  { %v1110_v29 = vsel %vm5790_vm12, %v1085_v28, %v1109_v33  ;;  %v1197_v42 = vpop.permute.xlu1 %1196  ;;  %975 = vrot.lane.b32.xlu0 %v4095_v31, %s3950_s28  ;;  %vm5802_vm12 = vcmask 441344  }
 0x11c   :  { %1129 = vst [vmem:[#allocation2 + $0x200] sm:$0x33] %v1110_v29  ;;  %v1047_v4 = vsel %vm195_vm0, %v1037_v18, %v5804_v39  ;;  %v1212_v25 = vrot.slane %v1197_v42, 4 }
 0x11d   :  { %v1048_v23 = vsel %vm5794_vm15, %v1023_v11, %v1047_v4  ;;  %1151 = vrot.lane.b32.xlu1 %v4496_v27, %s3953_s5  ;;  %v4511_v51 = vpop.permute.xlu0 %1147  ;;  %vm5798_vm15 = vcmask 359424  }
 0x11e   :  { %1067 = vst [vmem:[#allocation2 + $0x1c8] sm:$0xcc] %v1048_v23  ;;  %v5795_v36 = vrot.slane %v4511_v51, 4 }
 0x11f   :  { %v1250_v28 = vpop.permute.xlu1 %1249  ;;  %1090 = vrot.lane.b32.xlu0 %v4478_v55, %s3952_s30 }
 0x120   :  { %v1170_v31 = vsel %vm195_vm0, %v1160_v9, %v5795_v36  ;;  %v1265_v33 = vrot.slane %v1250_v28, 4 }
 0x121   :  { %v1171_v18 = vsel %vm5791_vm13, %v1146_v53, %v1170_v31  ;;  %1255 = vrot.lane.b32.xlu1 %v4465_v20, %s3955_s7  ;;  %v1199_v11 = vpop.permute.xlu0 %1198  ;;  %v3561_v52 = vld [vmem:[#allocation2 + $0x1c4] ss:$56 sps:$4 sm:$0xff]   ;;  %v3563_v10 = vld [vmem:[#allocation2 + $0x1c0] ss:$56 sps:$4 sm:$0xff]   ;;  %vm5805_vm13 = vcmask 375808  }
 0x122   :  { %1190 = vst [vmem:[#allocation2 + $0x200] sm:$0xcc] %v1171_v18  ;;  %v1213_v15 = vrot.slane %v1199_v11, 4  ;;  %2228 = vmatprep.subr.bf16.mxu0 %v3561_v52 }
 0x123   :  { %v1303_v38 = vpop.permute.xlu1 %1302  ;;  %1202 = vrot.lane.b32.xlu0 %v4456_v14, %s3954_s6  ;;  %2229 = vmatpush1.bf16.msra.mxu0 %v3563_v10 }
 0x124   :  { %v1220_v34 = vsel %vm195_vm0, %v1212_v25, %v1213_v15  ;;  %v1318_v10 = vrot.slane %v1303_v38, 4 }
 0x125   :  { %v1222_v53 = vsel %vm5802_vm12, %v1197_v42, %v1220_v34  ;;  %1361 = vrot.lane.b32.xlu1 %v4465_v20, %s3957_s9  ;;  %v1252_v9 = vpop.permute.xlu0 %1251 }
 0x126   :  { %1242 = vst [vmem:[#allocation2 + $0x230] sm:$0x33] %v1222_v53  ;;  %v1266_v29 = vrot.slane %v1252_v9, 4 }
 0x127   :  { %v1356_v4 = vpop.permute.xlu1 %1355  ;;  %1308 = vrot.lane.b32.xlu0 %v4456_v14, %s3956_s8 }
 0x128   :  { %v1273_v23 = vsel %vm195_vm0, %v1265_v33, %v1266_v29 }
 0x129   :  { %v1275_v31 = vsel %vm5805_vm13, %v1250_v28, %v1273_v23  ;;  %1257 = vrot.lane.b32.xlu1 %v4496_v27, %s3955_s7  ;;  %v1305_v42 = vpop.permute.xlu0 %1304  ;;  %v3564_v18 = vld [vmem:[#allocation2 + $0x1cc] ss:$56 sps:$4 sm:$0xff]   ;;  %v3566_v52 = vld [vmem:[#allocation2 + $0x1c8] ss:$56 sps:$4 sm:$0xff]  }
 0x12a   :  { %1295 = vst [vmem:[#allocation2 + $0x230] sm:$0xcc] %v1275_v31  ;;  %v1319_v25 = vrot.slane %v1305_v42, 4  ;;  %2279 = vmatprep.subr.bf16.mxu1 %v3564_v18  ;;  %v1371_v31 = vrot.slane %v1356_v4, 4 }
 0x12b   :  { %v4534_v34 = vpop.permute.xlu1 %1200  ;;  %1204 = vrot.lane.b32.xlu0 %v4478_v55, %s3954_s6  ;;  %2280 = vmatpush1.bf16.msra.mxu1 %v3566_v52 }
 0x12c   :  { %v1326_v53 = vsel %vm195_vm0, %v1318_v10, %v1319_v25  ;;  %v5800_v28 = vrot.slane %v4534_v34, 4 }
 0x12d   :  { %v1328_v33 = vsel %vm5796_vm14, %v1303_v38, %v1326_v53  ;;  %1363 = vrot.lane.b32.xlu1 %v4496_v27, %s3957_s9  ;;  %v1358_v23 = vpop.permute.xlu0 %1357 }
 0x12e   :  { %1348 = vst [vmem:[#allocation2 + $0x268] sm:$0x33] %v1328_v33  ;;  %v1223_v30 = vsel %vm195_vm0, %v1213_v15, %v5800_v28  ;;  %v1372_v36 = vrot.slane %v1358_v23, 4  ;;  %v4559_v33 = vrot.slane %v4185_v37, 6 }
 0x12f   :  { %v1224_v18 = vsel %vm5802_vm12, %v1199_v11, %v1223_v30  ;;  %v4547_v10 = vpop.permute.xlu1 %1306  ;;  %1310 = vrot.lane.b32.xlu0 %v4478_v55, %s3956_s8  ;;  %vm1539_vm12 = vcmask 277504  }
 0x130   :  { %1243 = vst [vmem:[#allocation2 + $0x238] sm:$0x33] %v1224_v18  ;;  %v1379_v38 = vsel %vm195_vm0, %v1371_v31, %v1372_v36  ;;  %v5797_v52 = vrot.slane %v4547_v10, 4 }
 0x131   :  { %v1381_v53 = vsel %vm5798_vm15, %v1356_v4, %v1379_v38  ;;  %1467 = vrot.lane.b32.xlu1 %v4465_v20, %s3959_s11  ;;  %v4556_v15 = vpop.permute.xlu0 %1253 }
 0x132   :  { %1401 = vst [vmem:[#allocation2 + $0x268] sm:$0xcc] %v1381_v53  ;;  %v1329_v30 = vsel %vm195_vm0, %v1319_v25, %v5797_v52  ;;  %v5801_v11 = vrot.slane %v4556_v15, 4 }
 0x133   :  { %v1330_v31 = vsel %vm5796_vm14, %v1305_v42, %v1329_v30  ;;  %v1409_v18 = vpop.permute.xlu1 %1408  ;;  %1414 = vrot.lane.b32.xlu0 %v4456_v14, %s3958_s10  ;;  %vm1433_vm14 = vcmask 293888  }
 0x134   :  { %1349 = vst [vmem:[#allocation2 + $0x270] sm:$0x33] %v1330_v31  ;;  %v1276_v20 = vsel %vm195_vm0, %v1266_v29, %v5801_v11 }
 0x135   :  { %v1277_v4 = vsel %vm5805_vm13, %v1252_v9, %v1276_v20  ;;  %181 = vrot.lane.b32.xlu1 %v4559_v33, %s3936_s1  ;;  %v4574_v38 = vpop.permute.xlu0 %1359  ;;  %v1424_v20 = vrot.slane %v1409_v18, 4  ;;  %vm2177_vm13 = vcmask 1045504  }
 0x136   :  { %1296 = vst [vmem:[#allocation2 + $0x238] sm:$0xcc] %v1277_v4  ;;  %v5799_v25 = vrot.slane %v4574_v38, 4 }
 0x137   :  { %v1462_v42 = vpop.permute.xlu1 %1461  ;;  %1520 = vrot.lane.b32.xlu0 %v4456_v14, %s3960_s12 }
 0x138   :  { %v1382_v53 = vsel %vm195_vm0, %v1372_v36, %v5799_v25 }
 0x139   :  { %v1383_v29 = vsel %vm5798_vm15, %v1358_v23, %v1382_v53  ;;  %288 = vrot.lane.b32.xlu1 %v4559_v33, %s3937_s15  ;;  %v4585_v9 = vpop.permute.xlu0 %1410  ;;  %v3567_v30 = vld [vmem:[#allocation2 + $0x234] ss:$56 sps:$4 sm:$0xff]   ;;  %v3569_v31 = vld [vmem:[#allocation2 + $0x230] ss:$56 sps:$4 sm:$0xff]   ;;  %v4595_v53 = vrot.slane %v4247_v5, 6  ;;  %vm1486_vm15 = vcmask 285696  }
 0x13a   :  { %1402 = vst [vmem:[#allocation2 + $0x270] sm:$0xcc] %v1383_v29  ;;  %v1425_v4 = vrot.slane %v4585_v9, 4  ;;  %2230 = vmatprep.subr.bf16.mxu0 %v3567_v30  ;;  %v1477_v29 = vrot.slane %v1462_v42, 4 }
 0x13b   :  { %v1515_v52 = vpop.permute.xlu1 %1514  ;;  %235 = vrot.lane.b32.xlu0 %v4185_v37, %s3935_s0  ;;  %2231 = vmatpush1.bf16.msra.mxu0 %v3569_v31 }
 0x13c   :  { %v1432_v14 = vsel %vm195_vm0, %v1424_v20, %v1425_v4  ;;  %v1530_v11 = vrot.slane %v1515_v52, 4 }
 0x13d   :  { %v1434_v36 = vsel %vm1433_vm14, %v1409_v18, %v1432_v14  ;;  %1469 = vrot.lane.b32.xlu1 %v4496_v27, %s3959_s11  ;;  %v1464_v23 = vpop.permute.xlu0 %1463 }
 0x13e   :  { %1454 = vst [vmem:[#allocation2 + $0x2a0] sm:$0x33] %v1434_v36  ;;  %v1478_v25 = vrot.slane %v1464_v23, 4 }
 0x13f   :  { %v178_v28 = vpop.permute.xlu1 %177  ;;  %1416 = vrot.lane.b32.xlu0 %v4478_v55, %s3958_s10 }
 0x140   :  { %v1485_v30 = vsel %vm195_vm0, %v1477_v29, %v1478_v25  ;;  %v190_v31 = vrot.slane %v178_v28, 4 }
 0x141   :  { %v1487_v18 = vsel %vm1486_vm15, %v1462_v42, %v1485_v30  ;;  %183 = vrot.lane.b32.xlu1 %v4595_v53, %s3936_s1  ;;  %v1517_v27 = vpop.permute.xlu0 %1516  ;;  %v3570_v20 = vld [vmem:[#allocation2 + $0x23c] ss:$56 sps:$4 sm:$0xff]   ;;  %v3572_v14 = vld [vmem:[#allocation2 + $0x238] ss:$56 sps:$4 sm:$0xff]  }
 0x142   :  { %1507 = vst [vmem:[#allocation2 + $0x2a0] sm:$0xcc] %v1487_v18  ;;  %v201_v36 = vsel %vm195_vm0, %v189_v62, %v190_v31  ;;  %v1531_v32 = vrot.slane %v1517_v27, 4  ;;  %2281 = vmatprep.subr.bf16.mxu1 %v3570_v20 }
 0x143   :  { %v202_v29 = vsel %vm197_vm3, %v4213_v44, %v201_v36  ;;  %v285_v39 = vpop.permute.xlu1 %284  ;;  %1522 = vrot.lane.b32.xlu0 %v4478_v55, %s3960_s12  ;;  %2282 = vmatpush1.bf16.msra.mxu1 %v3572_v14 }
 0x144   :  { %220 = vst [vmem:[#allocation2 + $0x10] sm:$0xcc] %v202_v29  ;;  %v1538_v42 = vsel %vm195_vm0, %v1530_v11, %v1531_v32  ;;  %v297_v30 = vrot.slane %v285_v39, 4 }
 0x145   :  { %v1540_v18 = vsel %vm1539_vm12, %v1515_v52, %v1538_v42  ;;  %290 = vrot.lane.b32.xlu1 %v4595_v53, %s3937_s15  ;;  %v232_v62 = vpop.permute.xlu0 %231 }
 0x146   :  { %1560 = vst [vmem:[#allocation2 + $0x2d8] sm:$0x33] %v1540_v18  ;;  %v307_v44 = vsel %vm195_vm0, %v296_v56, %v297_v30  ;;  %v244_v36 = vrot.slane %v232_v62, 4 }
 0x147   :  { %v308_v55 = vsel %vm303_vm2, %v4220_v49, %v307_v44  ;;  %v4619_v20 = vpop.permute.xlu1 %1465  ;;  %237 = vrot.lane.b32.xlu0 %v4247_v5, %s3935_s0 }
 0x148   :  { %326 = vst [vmem:[#allocation2 + $0x48] sm:$0xcc] %v308_v55  ;;  %v254_v52 = vsel %vm195_vm0, %v243_v47, %v244_v36  ;;  %v1479_v11 = vrot.slane %v4619_v20, 4 }
 0x149   :  { %v255_v14 = vsel %vm250_vm1, %v4205_v41, %v254_v52  ;;  %394 = vrot.lane.b32.xlu1 %v4559_v33, %s3939_s17  ;;  %v4631_v56 = vpop.permute.xlu0 %1412 }
 0x14a   :  { %273 = vst [vmem:[#allocation2 + $0x48] sm:$0x33] %v255_v14  ;;  %v1488_v49 = vsel %vm195_vm0, %v1478_v25, %v1479_v11  ;;  %v1426_v29 = vrot.slane %v4631_v56, 4 }
 0x14b   :  { %v1489_v42 = vsel %vm1486_vm15, %v1464_v23, %v1488_v49  ;;  %v4638_v47 = vpop.permute.xlu1 %179  ;;  %341 = vrot.lane.b32.xlu0 %v4185_v37, %s3938_s16 }
 0x14c   :  { %1508 = vst [vmem:[#allocation2 + $0x2a8] sm:$0xcc] %v1489_v42  ;;  %v1435_v41 = vsel %vm195_vm0, %v1425_v4, %v1426_v29  ;;  %v191_v18 = vrot.slane %v4638_v47, 4 }
 0x14d   :  { %v1436_v25 = vsel %vm1433_vm14, %v4585_v9, %v1435_v41  ;;  %500 = vrot.lane.b32.xlu1 %v4559_v33, %s3941_s19  ;;  %v4650_v23 = vpop.permute.xlu0 %1518  ;;  %v3573_v44 = vld [vmem:[#allocation2 + $0x2a4] ss:$56 sps:$4 sm:$0x3f]   ;;  %v3575_v4 = vld [vmem:[#allocation2 + $0x2a0] ss:$56 sps:$4 sm:$0x3f]  }
 0x14e   :  { %1455 = vst [vmem:[#allocation2 + $0x2a8] sm:$0x33] %v1436_v25  ;;  %v203_v55 = vsel %vm195_vm0, %v190_v31, %v191_v18  ;;  %v5806_v52 = vrot.slane %v4650_v23, 4  ;;  %3423 = vmatprep.subr.msk.bf16.mxu0 %vm2177_vm13, %v3573_v44  ;;  %v2179_v31 = vsel %vm2177_vm13, %v3575_v4, 0 }
 0x14f   :  { %v204_v14 = vsel %vm197_vm3, %v178_v28, %v203_v55  ;;  %v4657_v49 = vpop.permute.xlu1 %286  ;;  %447 = vrot.lane.b32.xlu0 %v4185_v37, %s3940_s18  ;;  %v4670_v28 = vld [vmem:[%s5783_s2] sm:$0xff]   ;;  %2233 = vmatpush1.bf16.msra.mxu0 %v2179_v31 }
 0x150   :  { %221 = vst [vmem:[#allocation2 + $0x18] sm:$0xcc] %v204_v14  ;;  %v1541_v9 = vsel %vm195_vm0, %v1531_v32, %v5806_v52  ;;  %v298_v42 = vrot.slane %v4657_v49, 4 }
 0x151   :  { %v1542_v41 = vsel %vm1539_vm12, %v1517_v27, %v1541_v9  ;;  %396 = vrot.lane.b32.xlu1 %v4595_v53, %s3939_s17  ;;  %v4675_v25 = vpop.permute.xlu0 %233  ;;  %v3576_v44 = vld [vmem:[#allocation2 + $0x10] ss:$56 sps:$4 sm:$0xff]   ;;  %v3578_v55 = vld [vmem:[#allocation2 + $0x14] ss:$56 sps:$4 sm:$0xff]  }
 0x152   :  { %1561 = vst [vmem:[#allocation2 + $0x2e0] sm:$0x33] %v1542_v41  ;;  %v309_v32 = vsel %vm195_vm0, %v297_v30, %v298_v42  ;;  %v245_v4 = vrot.slane %v4675_v25, 4  ;;  %2322 = vmatprep.subr.bf16.mxu0 %v3578_v55  ;;  %3424 = vmatmul.mubr.msk.bf16.vlgmr.msra.gmra.mrb[0].mxu0 %vm462_vm6, %v4670_v28 }
 0x153   :  { %v310_v14 = vsel %vm303_vm2, %v285_v39, %v309_v32  ;;  %v391_v52 = vpop.permute.xlu1 %390  ;;  %343 = vrot.lane.b32.xlu0 %v4247_v5, %s3938_s16  ;;  %2323 = vmatpush1.bf16.msra.mxu0 %v3576_v44 }
 0x154   :  { %327 = vst [vmem:[#allocation2 + $0x50] sm:$0xcc] %v310_v14  ;;  %v256_v27 = vsel %vm195_vm0, %v244_v36, %v245_v4  ;;  %v403_v9 = vrot.slane %v391_v52, 4  ;;  %2262 = vmatprep.mubr.bf16.mxu0 %v3961_v6 }
 0x155   :  { %v257_v30 = vsel %vm250_vm1, %v232_v62, %v256_v27  ;;  %502 = vrot.lane.b32.xlu1 %v4595_v53, %s3941_s19  ;;  %v338_v39 = vpop.permute.xlu0 %337 }
 0x156   :  { %274 = vst [vmem:[#allocation2 + $0x50] sm:$0x33] %v257_v30  ;;  %v413_v31 = vsel %vm195_vm0, %v402_v63, %v403_v9  ;;  %v350_v41 = vrot.slane %v338_v39, 4  ;;  %v4706_v63 = vld [vmem:[%s5783_s2 + $0x8] ss:$0 sps:$4 sm:$0xff]  }
 0x157   :  { %v414_v36 = vsel %vm409_vm5, %v4295_v59, %v413_v31  ;;  %v497_v55 = vpop.permute.xlu1 %496  ;;  %449 = vrot.lane.b32.xlu0 %v4247_v5, %s3940_s18 }
 0x158   :  { %432 = vst [vmem:[#allocation2 + $0x80] sm:$0xcc] %v414_v36  ;;  %v360_v62 = vsel %vm195_vm0, %v349_v46, %v350_v41  ;;  %v509_v44 = vrot.slane %v497_v55, 4 }
 0x159   :  { %v361_v32 = vsel %vm356_vm4, %v4273_v43, %v360_v62  ;;  %606 = vrot.lane.b32.xlu1 %v4559_v33, %s3943_s21  ;;  %v444_v59 = vpop.permute.xlu0 %443  ;;  %v3580_v14 = vld [vmem:[#allocation2 + $0x2ac] ss:$56 sps:$4 sm:$0x3f]   ;;  %v3582_v30 = vld [vmem:[#allocation2 + $0x2a8] ss:$56 sps:$4 sm:$0x3f]  }
 0x15a   :  { %379 = vst [vmem:[#allocation2 + $0x80] sm:$0x33] %v361_v32  ;;  %v519_v27 = vsel %vm195_vm0, %v508_v7, %v509_v44  ;;  %v456_v46 = vrot.slane %v444_v59, 4  ;;  %3426 = vmatprep.subr.msk.bf16.mxu1 %vm2177_vm13, %v3580_v14  ;;  %v2185_v7 = vsel %vm2177_vm13, %v3582_v30, 0  ;;  %3425 = vmatmul.mubr.msk.bf16.gmra.mrb[4].mxu0 %vm462_vm6, %v4706_v63 }
 0x15b   :  { %v520_v31 = vsel %vm515_vm7, %v4310_v3, %v519_v27  ;;  %v4717_v36 = vpop.permute.xlu1 %392  ;;  %553 = vrot.lane.b32.xlu0 %v4185_v37, %s3942_s20  ;;  %2284 = vmatpush1.bf16.msra.mxu1 %v2185_v7 }
 0x15c   :  { %538 = vst [vmem:[#allocation2 + $0xb8] sm:$0xcc] %v520_v31  ;;  %v466_v43 = vsel %vm195_vm0, %v455_v57, %v456_v46  ;;  %v404_v62 = vrot.slane %v4717_v36, 4  ;;  %2354 = vmatprep.mubr.bf16.mxu0 %v3961_v6 }
 0x15d   :  { %v467_v3 = vsel %vm462_vm6, %v4286_v54, %v466_v43  ;;  %712 = vrot.lane.b32.xlu1 %v4559_v33, %s3945_s23  ;;  %v4733_v32 = vpop.permute.xlu0 %339  ;;  %v3583_v14 = vld [vmem:[#allocation2 + $0x18] ss:$56 sps:$4 sm:$0xff]   ;;  %v3585_v27 = vld [vmem:[#allocation2 + $0x1c] ss:$56 sps:$4 sm:$0xff]  }
 0x15e   :  { %485 = vst [vmem:[#allocation2 + $0xb8] sm:$0x33] %v467_v3  ;;  %v415_v57 = vsel %vm195_vm0, %v403_v9, %v404_v62  ;;  %v351_v30 = vrot.slane %v4733_v32, 4  ;;  %2373 = vmatprep.subr.bf16.mxu1 %v3585_v27  ;;  %3427 = vmatmul.mubr.msk.bf16.vlgmr.msra.gmra.mrb[0].mxu1 %vm462_vm6, %v4670_v28 }
 0x15f   :  { %v416_v31 = vsel %vm409_vm5, %v391_v52, %v415_v57  ;;  %v4741_v54 = vpop.permute.xlu1 %498  ;;  %659 = vrot.lane.b32.xlu0 %v4185_v37, %s3944_s22  ;;  %2374 = vmatpush1.bf16.msra.mxu1 %v3583_v14 }
 0x160   :  { %433 = vst [vmem:[#allocation2 + $0x88] sm:$0xcc] %v416_v31  ;;  %v362_v43 = vsel %vm195_vm0, %v350_v41, %v351_v30  ;;  %v5807_v7 = vrot.slane %v4741_v54, 4  ;;  %2313 = vmatprep.mubr.bf16.mxu1 %v3961_v6 }
 0x161   :  { %v363_v9 = vsel %vm356_vm4, %v338_v39, %v362_v43  ;;  %608 = vrot.lane.b32.xlu1 %v4595_v53, %s3943_s21  ;;  %v4754_v52 = vpop.permute.xlu0 %445 }
 0x162   :  { %380 = vst [vmem:[#allocation2 + $0x88] sm:$0x33] %v363_v9  ;;  %v521_v3 = vsel %vm195_vm0, %v509_v44, %v5807_v7  ;;  %v457_v41 = vrot.slane %v4754_v52, 4 }
 0x163   :  { %v522_v27 = vsel %vm515_vm7, %v497_v55, %v521_v3  ;;  %v603_v57 = vpop.permute.xlu1 %602  ;;  %555 = vrot.lane.b32.xlu0 %v4247_v5, %s3942_s20 }
 0x164   :  { %539 = vst [vmem:[#allocation2 + $0xc0] sm:$0xcc] %v522_v27  ;;  %v468_v39 = vsel %vm195_vm0, %v456_v46, %v457_v41  ;;  %v615_v14 = vrot.slane %v603_v57, 4 }
 0x165   :  { %v469_v31 = vsel %vm462_vm6, %v444_v59, %v468_v39  ;;  %714 = vrot.lane.b32.xlu1 %v4595_v53, %s3945_s23  ;;  %v550_v44 = vpop.permute.xlu0 %549  ;;  %v3586_v43 = vld [vmem:[#allocation2 + $0x80] ss:$56 sps:$4 sm:$0xff]   ;;  %v3588_v9 = vld [vmem:[#allocation2 + $0x84] ss:$56 sps:$4 sm:$0xff]  }
 0x166   :  { %486 = vst [vmem:[#allocation2 + $0xc0] sm:$0x33] %v469_v31  ;;  %v625_v55 = vsel %vm195_vm0, %v614_v8, %v615_v14  ;;  %v562_v3 = vrot.slane %v550_v44, 4  ;;  %2324 = vmatprep.subr.bf16.mxu0 %v3588_v9  ;;  %3428 = vmatmul.mubr.msk.bf16.gmra.mrb[4].mxu1 %vm462_vm6, %v4706_v63 }
 0x167   :  { %v626_v27 = vsel %vm5817_vm9, %v4362_v1, %v625_v55  ;;  %v709_v7 = vpop.permute.xlu1 %708  ;;  %661 = vrot.lane.b32.xlu0 %v4247_v5, %s3944_s22  ;;  %2325 = vmatpush1.bf16.msra.mxu0 %v3586_v43 }
 0x168   :  { %644 = vst [vmem:[#allocation2 + $0xf0] sm:$0xcc] %v626_v27  ;;  %v572_v59 = vsel %vm195_vm0, %v561_v48, %v562_v3  ;;  %v721_v46 = vrot.slane %v709_v7, 4  ;;  %2405 = vmatprep.mubr.bf16.mxu1 %v3961_v6 }
 0x169   :  { %v573_v8 = vsel %vm568_vm8, %v4340_v45, %v572_v59  ;;  %818 = vrot.lane.b32.xlu1 %v4559_v33, %s3947_s25  ;;  %v656_v1 = vpop.permute.xlu0 %655 }
 0x16a   :  { %591 = vst [vmem:[#allocation2 + $0xf0] sm:$0x33] %v573_v8  ;;  %v731_v39 = vsel %vm195_vm0, %v720_v13, %v721_v46  ;;  %v668_v48 = vrot.slane %v656_v1, 4 }
 0x16b   :  { %v732_v31 = vsel %vm5808_vm11, %v4377_v12, %v731_v39  ;;  %v4792_v43 = vpop.permute.xlu1 %604  ;;  %765 = vrot.lane.b32.xlu0 %v4185_v37, %s3946_s24 }
 0x16c   :  { %750 = vst [vmem:[#allocation2 + $0x128] sm:$0xcc] %v732_v31  ;;  %v678_v45 = vsel %vm195_vm0, %v667_v24, %v668_v48  ;;  %v616_v9 = vrot.slane %v4792_v43, 4 }
 0x16d   :  { %v679_v55 = vsel %vm5809_vm10, %v4353_v58, %v678_v45  ;;  %924 = vrot.lane.b32.xlu1 %v4559_v33, %s3949_s27  ;;  %v4804_v13 = vpop.permute.xlu0 %551  ;;  %v3589_v12 = vld [vmem:[#allocation2 + $0x88] ss:$56 sps:$4 sm:$0xff]   ;;  %v3591_v27 = vld [vmem:[#allocation2 + $0x8c] ss:$56 sps:$4 sm:$0xff]  }
 0x16e   :  { %697 = vst [vmem:[#allocation2 + $0x128] sm:$0x33] %v679_v55  ;;  %v627_v59 = vsel %vm195_vm0, %v615_v14, %v616_v9  ;;  %v563_v8 = vrot.slane %v4804_v13, 4  ;;  %2375 = vmatprep.subr.bf16.mxu1 %v3591_v27 }
 0x16f   :  { %v628_v24 = vsel %vm5817_vm9, %v603_v57, %v627_v59  ;;  %v4811_v39 = vpop.permute.xlu1 %710  ;;  %871 = vrot.lane.b32.xlu0 %v4185_v37, %s3948_s26  ;;  %2376 = vmatpush1.bf16.msra.mxu1 %v3589_v12 }
 0x170   :  { %645 = vst [vmem:[#allocation2 + $0xf8] sm:$0xcc] %v628_v24  ;;  %v574_v58 = vsel %vm195_vm0, %v562_v3, %v563_v8  ;;  %v722_v31 = vrot.slane %v4811_v39, 4 }
 0x171   :  { %v575_v14 = vsel %vm568_vm8, %v550_v44, %v574_v58  ;;  %820 = vrot.lane.b32.xlu1 %v4595_v53, %s3947_s25  ;;  %v4822_v57 = vpop.permute.xlu0 %657 }
 0x172   :  { %592 = vst [vmem:[#allocation2 + $0xf8] sm:$0x33] %v575_v14  ;;  %v733_v45 = vsel %vm195_vm0, %v721_v46, %v722_v31  ;;  %v669_v55 = vrot.slane %v4822_v57, 4 }
 0x173   :  { %v734_v27 = vsel %vm5808_vm11, %v709_v7, %v733_v45  ;;  %v815_v3 = vpop.permute.xlu1 %814  ;;  %767 = vrot.lane.b32.xlu0 %v4247_v5, %s3946_s24  ;;  %v3854_v14 = vld.sshfl [vmem:[#allocation3 + $0x18] sm:$0x33 pattern:$0x76325410]  ;;  %vm5821_vm11 = vcmask 138240  }
 0x174   :  { %751 = vst [vmem:[#allocation2 + $0x130] sm:$0xcc] %v734_v27  ;;  %v680_v44 = vsel %vm195_vm0, %v668_v48, %v669_v55  ;;  %v827_v12 = vrot.slane %v815_v3, 4  ;;  %v4838_v7 = vcombine.low %v4176_v35, %v3854_v14 }
 0x175   :  { %v681_v59 = vsel %vm5809_vm10, %v656_v1, %v680_v44  ;;  %926 = vrot.lane.b32.xlu1 %v4595_v53, %s3949_s27  ;;  %v762_v46 = vpop.permute.xlu0 %761  ;;  %v3592_v24 = vld [vmem:[#allocation2 + $0xf0] ss:$56 sps:$4 sm:$0xff]   ;;  %v3594_v58 = vld [vmem:[#allocation2 + $0xf4] ss:$56 sps:$4 sm:$0xff]   ;;  %vm5822_vm10 = vcmask 146432  }
 0x176   :  { %698 = vst [vmem:[#allocation2 + $0x130] sm:$0x33] %v681_v59  ;;  %v837_v45 = vsel %vm195_vm0, %v826_v21, %v827_v12  ;;  %v774_v27 = vrot.slane %v762_v46, 4  ;;  %2326 = vmatprep.subr.bf16.mxu0 %v3594_v58 }
 0x177   :  { %v838_v48 = vsel %vm5821_vm11, %v4422_v26, %v837_v45  ;;  %v921_v1 = vpop.permute.xlu1 %920  ;;  %873 = vrot.lane.b32.xlu0 %v4247_v5, %s3948_s26  ;;  %2327 = vmatpush1.bf16.msra.mxu0 %v3592_v24  ;;  %v4855_v26 = vrot.slane %v4838_v7, 6  ;;  %v4860_v45 = vld.sshfl [vmem:[#allocation6] sm:$0xff pattern:$0x76325410]  ;;  %vm5823_vm11 = vcmask 64512  }
 0x178   :  { %856 = vst [vmem:[#allocation2 + $0x160] sm:$0xcc] %v838_v48  ;;  %v784_v35 = vsel %vm195_vm0, %v773_v2, %v774_v27  ;;  %v933_v44 = vrot.slane %v921_v1, 4 }
 0x179   :  { %v785_v59 = vsel %vm5822_vm10, %v4400_v60, %v784_v35  ;;  %1030 = vrot.lane.b32.xlu1 %v4559_v33, %s3951_s29  ;;  %v868_v21 = vpop.permute.xlu0 %867  ;;  %vm5824_vm10 = vcmask 130048  }
 0x17a   :  { %803 = vst [vmem:[#allocation2 + $0x160] sm:$0x33] %v785_v59  ;;  %v943_v58 = vsel %vm195_vm0, %v932_v50, %v933_v44  ;;  %v880_v14 = vrot.slane %v868_v21, 4 }
 0x17b   :  { %v944_v2 = vsel %vm5823_vm11, %v4437_v19, %v943_v58  ;;  %v4864_v24 = vpop.permute.xlu1 %816  ;;  %977 = vrot.lane.b32.xlu0 %v4185_v37, %s3950_s28  ;;  %v4880_v37 = vcombine.low %v4235_v61, %v4860_v45  ;;  %vm5825_vm11 = vcmask 138240  }
 0x17c   :  { %962 = vst [vmem:[#allocation2 + $0x198] sm:$0xcc] %v944_v2  ;;  %v890_v60 = vsel %vm195_vm0, %v879_v22, %v880_v14  ;;  %v828_v33 = vrot.slane %v4864_v24, 4 }
 0x17d   :  { %v891_v50 = vsel %vm5824_vm10, %v4413_v16, %v890_v60  ;;  %1153 = vrot.lane.b32.xlu1 %v4855_v26, %s3953_s5  ;;  %v4876_v48 = vpop.permute.xlu0 %763  ;;  %v3595_v19 = vld [vmem:[#allocation2 + $0xf8] ss:$56 sps:$4 sm:$0xff]   ;;  %v3597_v35 = vld [vmem:[#allocation2 + $0xfc] ss:$56 sps:$4 sm:$0xff]   ;;  %vm5826_vm10 = vcmask 146432   ;;  %v4901_v60 = vrot.slane %v4880_v37, 6 }
 0x17e   :  { %909 = vst [vmem:[#allocation2 + $0x198] sm:$0x33] %v891_v50  ;;  %v839_v22 = vsel %vm195_vm0, %v827_v12, %v828_v33  ;;  %v5816_v59 = vrot.slane %v4876_v48, 4  ;;  %2377 = vmatprep.subr.bf16.mxu1 %v3597_v35 }
 0x17f   :  { %v840_v16 = vsel %vm5825_vm11, %v815_v3, %v839_v22  ;;  %v4887_v58 = vpop.permute.xlu1 %922  ;;  %1092 = vrot.lane.b32.xlu0 %v4838_v7, %s3952_s30  ;;  %2378 = vmatpush1.bf16.msra.mxu1 %v3595_v19  ;;  %vm5827_vm11 = vcmask 64512  }
 0x180   :  { %857 = vst [vmem:[#allocation2 + $0x168] sm:$0xcc] %v840_v16  ;;  %v786_v61 = vsel %vm195_vm0, %v774_v27, %v5816_v59  ;;  %v5811_v2 = vrot.slane %v4887_v58, 4 }
 0x181   :  { %v787_v12 = vsel %vm5826_vm10, %v762_v46, %v786_v61  ;;  %1032 = vrot.lane.b32.xlu1 %v4595_v53, %s3951_s29  ;;  %v4898_v3 = vpop.permute.xlu0 %869  ;;  %vm5828_vm10 = vcmask 130048  }
 0x182   :  { %804 = vst [vmem:[#allocation2 + $0x168] sm:$0x33] %v787_v12  ;;  %v945_v50 = vsel %vm195_vm0, %v933_v44, %v5811_v2  ;;  %v5810_v27 = vrot.slane %v4898_v3, 4 }
 0x183   :  { %v946_v35 = vsel %vm5827_vm11, %v921_v1, %v945_v50  ;;  %v1027_v19 = vpop.permute.xlu1 %1026  ;;  %979 = vrot.lane.b32.xlu0 %v4247_v5, %s3950_s28  ;;  %v5829_v1 = vrot.slane %v4493_v0, 4  ;;  %vm5830_vm11 = vcmask 48128  }
 0x184   :  { %963 = vst [vmem:[#allocation2 + $0x1a0] sm:$0xcc] %v946_v35  ;;  %v892_v53 = vsel %vm195_vm0, %v880_v14, %v5810_v27  ;;  %v1039_v46 = vrot.slane %v1027_v19, 4 }
 0x185   :  { %v893_v22 = vsel %vm5828_vm10, %v868_v21, %v892_v53  ;;  %1155 = vrot.lane.b32.xlu1 %v4901_v60, %s3953_s5  ;;  %v974_v44 = vpop.permute.xlu0 %973  ;;  %v3598_v16 = vld [vmem:[#allocation2 + $0x160] ss:$56 sps:$4 sm:$0xff]   ;;  %v3600_v61 = vld [vmem:[#allocation2 + $0x164] ss:$56 sps:$4 sm:$0xff]   ;;  %v5831_v21 = vrot.slane %v4467_v40, 4  ;;  %vm5832_vm10 = vcmask 56320  }
 0x186   :  { %910 = vst [vmem:[#allocation2 + $0x1a0] sm:$0x33] %v893_v22  ;;  %v1049_v12 = vsel %vm195_vm0, %v5829_v1, %v1039_v46  ;;  %v986_v5 = vrot.slane %v974_v44, 4  ;;  %2328 = vmatprep.subr.bf16.mxu0 %v3600_v61 }
 0x187   :  { %v1050_v50 = vsel %vm5830_vm11, %v4493_v0, %v1049_v12  ;;  %v1150_v35 = vpop.permute.xlu1 %1149  ;;  %1094 = vrot.lane.b32.xlu0 %v4880_v37, %s3952_s30  ;;  %2329 = vmatpush1.bf16.msra.mxu0 %v3598_v16  ;;  %v5833_v0 = vrot.slane %v4511_v51, 4  ;;  %vm5834_vm11 = vcmask 449536  }
 0x188   :  { %1068 = vst [vmem:[#allocation2 + $0x1d0] sm:$0xcc] %v1050_v50  ;;  %v996_v14 = vsel %vm195_vm0, %v5831_v21, %v986_v5  ;;  %v1162_v53 = vrot.slane %v1150_v35, 4 }
 0x189   :  { %v997_v22 = vsel %vm5832_vm10, %v4467_v40, %v996_v14  ;;  %1259 = vrot.lane.b32.xlu1 %v4855_v26, %s3955_s7  ;;  %v1089_v1 = vpop.permute.xlu0 %1088  ;;  %v5835_v40 = vrot.slane %v4484_v17, 4  ;;  %vm5836_vm10 = vcmask 457728  }
 0x18a   :  { %1015 = vst [vmem:[#allocation2 + $0x1d0] sm:$0x33] %v997_v22  ;;  %v1172_v12 = vsel %vm195_vm0, %v5833_v0, %v1162_v53  ;;  %v1101_v61 = vrot.slane %v1089_v1, 4 }
 0x18b   :  { %v1173_v50 = vsel %vm5834_vm11, %v4511_v51, %v1172_v12  ;;  %v4935_v27 = vpop.permute.xlu1 %1028  ;;  %1206 = vrot.lane.b32.xlu0 %v4838_v7, %s3954_s6  ;;  %vm5837_vm11 = vcmask 48128  }
 0x18c   :  { %1191 = vst [vmem:[#allocation2 + $0x208] sm:$0xcc] %v1173_v50  ;;  %v1111_v16 = vsel %vm195_vm0, %v5835_v40, %v1101_v61  ;;  %v5815_v21 = vrot.slane %v4935_v27, 4 }
 0x18d   :  { %v1112_v14 = vsel %vm5836_vm10, %v4484_v17, %v1111_v16  ;;  %1365 = vrot.lane.b32.xlu1 %v4855_v26, %s3957_s9  ;;  %v4947_v22 = vpop.permute.xlu0 %975  ;;  %v3601_v51 = vld [vmem:[#allocation2 + $0x168] ss:$56 sps:$4 sm:$0xff]   ;;  %v3603_v0 = vld [vmem:[#allocation2 + $0x16c] ss:$56 sps:$4 sm:$0xff]   ;;  %vm5838_vm10 = vcmask 56320  }
 0x18e   :  { %1130 = vst [vmem:[#allocation2 + $0x208] sm:$0x33] %v1112_v14  ;;  %v1051_v12 = vsel %vm195_vm0, %v1039_v46, %v5815_v21  ;;  %v5814_v50 = vrot.slane %v4947_v22, 4  ;;  %2379 = vmatprep.subr.bf16.mxu1 %v3603_v0 }
 0x18f   :  { %v1052_v40 = vsel %vm5837_vm11, %v1027_v19, %v1051_v12  ;;  %v4954_v2 = vpop.permute.xlu1 %1151  ;;  %1312 = vrot.lane.b32.xlu0 %v4838_v7, %s3956_s8  ;;  %2380 = vmatpush1.bf16.msra.mxu1 %v3601_v51  ;;  %vm5839_vm11 = vcmask 449536  }
 0x190   :  { %1069 = vst [vmem:[#allocation2 + $0x1d8] sm:$0xcc] %v1052_v40  ;;  %v998_v17 = vsel %vm195_vm0, %v986_v5, %v5814_v50  ;;  %v5812_v16 = vrot.slane %v4954_v2, 4  ;;  %v4979_v40 = vcombine.low %v4860_v45, %v4860_v45 }
 0x191   :  { %v999_v46 = vsel %vm5838_vm10, %v974_v44, %v998_v17  ;;  %1261 = vrot.lane.b32.xlu1 %v4901_v60, %s3955_s7  ;;  %v4965_v19 = vpop.permute.xlu0 %1090  ;;  %vm5840_vm10 = vcmask 457728  }
 0x192   :  { %1016 = vst [vmem:[#allocation2 + $0x1d8] sm:$0x33] %v999_v46  ;;  %v1174_v14 = vsel %vm195_vm0, %v1162_v53, %v5812_v16  ;;  %v5813_v0 = vrot.slane %v4965_v19, 4 }
 0x193   :  { %v1175_v12 = vsel %vm5839_vm11, %v1150_v35, %v1174_v14  ;;  %v1256_v5 = vpop.permute.xlu1 %1255  ;;  %1208 = vrot.lane.b32.xlu0 %v4880_v37, %s3954_s6  ;;  %v5841_v14 = vrot.slane %v4556_v15, 4  ;;  %vm5842_vm11 = vcmask 375808  }
 0x194   :  { %1192 = vst [vmem:[#allocation2 + $0x210] sm:$0xcc] %v1175_v12  ;;  %v1113_v44 = vsel %vm195_vm0, %v1101_v61, %v5813_v0  ;;  %v1268_v51 = vrot.slane %v1256_v5, 4 }
 0x195   :  { %v1114_v53 = vsel %vm5840_vm10, %v1089_v1, %v1113_v44  ;;  %1367 = vrot.lane.b32.xlu1 %v4901_v60, %s3957_s9  ;;  %v1203_v35 = vpop.permute.xlu0 %1202  ;;  %v3604_v17 = vld [vmem:[#allocation2 + $0x1d0] ss:$56 sps:$4 sm:$0xff]   ;;  %v3606_v46 = vld [vmem:[#allocation2 + $0x1d4] ss:$56 sps:$4 sm:$0xff]   ;;  %v5843_v1 = vrot.slane %v4534_v34, 4  ;;  %vm5844_vm10 = vcmask 441344  }
 0x196   :  { %1131 = vst [vmem:[#allocation2 + $0x210] sm:$0x33] %v1114_v53  ;;  %v1278_v12 = vsel %vm195_vm0, %v5841_v14, %v1268_v51  ;;  %v1215_v16 = vrot.slane %v1203_v35, 4  ;;  %2330 = vmatprep.subr.bf16.mxu0 %v3606_v46  ;;  %v5845_v46 = vrot.slane %v4574_v38, 4 }
 0x197   :  { %v1279_v61 = vsel %vm5842_vm11, %v4556_v15, %v1278_v12  ;;  %v1362_v0 = vpop.permute.xlu1 %1361  ;;  %1314 = vrot.lane.b32.xlu0 %v4880_v37, %s3956_s8  ;;  %2331 = vmatpush1.bf16.msra.mxu0 %v3604_v17  ;;  %v4999_v15 = vrot.slane %v4979_v40, 6  ;;  %vm5846_vm11 = vcmask 359424  }
 0x198   :  { %1297 = vst [vmem:[#allocation2 + $0x240] sm:$0xcc] %v1279_v61  ;;  %v1225_v44 = vsel %vm195_vm0, %v5843_v1, %v1215_v16  ;;  %v1374_v50 = vrot.slane %v1362_v0, 4 }
 0x199   :  { %v1226_v53 = vsel %vm5844_vm10, %v4534_v34, %v1225_v44  ;;  %1471 = vrot.lane.b32.xlu1 %v4855_v26, %s3959_s11  ;;  %v1309_v14 = vpop.permute.xlu0 %1308  ;;  %v5847_v34 = vrot.slane %v4547_v10, 4  ;;  %vm5848_vm10 = vcmask 367616  }
 0x19a   :  { %1244 = vst [vmem:[#allocation2 + $0x240] sm:$0x33] %v1226_v53  ;;  %v1384_v12 = vsel %vm195_vm0, %v5845_v46, %v1374_v50  ;;  %v1321_v61 = vrot.slane %v1309_v14, 4 }
 0x19b   :  { %v1385_v1 = vsel %vm5846_vm11, %v4574_v38, %v1384_v12  ;;  %v5006_v17 = vpop.permute.xlu1 %1257  ;;  %1418 = vrot.lane.b32.xlu0 %v4838_v7, %s3958_s10  ;;  %vm5849_vm11 = vcmask 375808  }
 0x19c   :  { %1403 = vst [vmem:[#allocation2 + $0x278] sm:$0xcc] %v1385_v1  ;;  %v1331_v26 = vsel %vm195_vm0, %v5847_v34, %v1321_v61  ;;  %v1269_v44 = vrot.slane %v5006_v17, 4 }
 0x19d   :  { %v1332_v53 = vsel %vm5848_vm10, %v4547_v10, %v1331_v26  ;;  %185 = vrot.lane.b32.xlu1 %v4999_v15, %s3936_s1  ;;  %v5018_v46 = vpop.permute.xlu0 %1204  ;;  %v3607_v38 = vld [vmem:[#allocation2 + $0x1d8] ss:$56 sps:$4 sm:$0xff]   ;;  %v3609_v12 = vld [vmem:[#allocation2 + $0x1dc] ss:$56 sps:$4 sm:$0xff]   ;;  %vm5850_vm10 = vcmask 441344  }
 0x19e   :  { %1350 = vst [vmem:[#allocation2 + $0x278] sm:$0x33] %v1332_v53  ;;  %v1280_v1 = vsel %vm195_vm0, %v1268_v51, %v1269_v44  ;;  %v1216_v21 = vrot.slane %v5018_v46, 4  ;;  %2381 = vmatprep.subr.bf16.mxu1 %v3609_v12 }
 0x19f   :  { %v1281_v34 = vsel %vm5849_vm11, %v1256_v5, %v1280_v1  ;;  %v5025_v59 = vpop.permute.xlu1 %1363  ;;  %1524 = vrot.lane.b32.xlu0 %v4838_v7, %s3960_s12  ;;  %2382 = vmatpush1.bf16.msra.mxu1 %v3607_v38  ;;  %vm5851_vm11 = vcmask 359424  }
 0x1a0   :  { %1298 = vst [vmem:[#allocation2 + $0x248] sm:$0xcc] %v1281_v34  ;;  %v1227_v10 = vsel %vm195_vm0, %v1215_v16, %v1216_v21  ;;  %v1375_v26 = vrot.slane %v5025_v59, 4 }
 0x1a1   :  { %v1228_v51 = vsel %vm5850_vm10, %v1203_v35, %v1227_v10  ;;  %292 = vrot.lane.b32.xlu1 %v4999_v15, %s3937_s15  ;;  %v5036_v5 = vpop.permute.xlu0 %1310  ;;  %vm5852_vm10 = vcmask 367616  }
 0x1a2   :  { %1245 = vst [vmem:[#allocation2 + $0x248] sm:$0x33] %v1228_v51  ;;  %v1386_v7 = vsel %vm195_vm0, %v1374_v50, %v1375_v26  ;;  %v1322_v53 = vrot.slane %v5036_v5, 4 }
 0x1a3   :  { %v1387_v12 = vsel %vm5851_vm11, %v1362_v0, %v1386_v7  ;;  %v1468_v16 = vpop.permute.xlu1 %1467  ;;  %239 = vrot.lane.b32.xlu0 %v4979_v40, %s3935_s0  ;;  %vm5855_vm11 = vcmask 211968  }
 0x1a4   :  { %1404 = vst [vmem:[#allocation2 + $0x280] sm:$0xcc] %v1387_v12  ;;  %v1333_v35 = vsel %vm195_vm0, %v1321_v61, %v1322_v53  ;;  %v1480_v38 = vrot.slane %v1468_v16, 4 }
 0x1a5   :  { %v1334_v1 = vsel %vm5852_vm10, %v1309_v14, %v1333_v35  ;;  %1473 = vrot.lane.b32.xlu1 %v4901_v60, %s3959_s11  ;;  %v1415_v50 = vpop.permute.xlu0 %1414  ;;  %v3610_v34 = vld [vmem:[#allocation2 + $0x240] ss:$56 sps:$4 sm:$0xff]   ;;  %v3612_v10 = vld [vmem:[#allocation2 + $0x244] ss:$56 sps:$4 sm:$0xff]   ;;  %vm5856_vm10 = vcmask 220160  }
 0x1a6   :  { %1351 = vst [vmem:[#allocation2 + $0x280] sm:$0x33] %v1334_v1  ;;  %v1490_v0 = vsel %vm195_vm0, %v1479_v11, %v1480_v38  ;;  %v1427_v51 = vrot.slane %v1415_v50, 4  ;;  %2332 = vmatprep.subr.bf16.mxu0 %v3612_v10 }
 0x1a7   :  { %v1491_v7 = vsel %vm1486_vm15, %v4619_v20, %v1490_v0  ;;  %v182_v12 = vpop.permute.xlu1 %181  ;;  %1420 = vrot.lane.b32.xlu0 %v4880_v37, %s3958_s10  ;;  %2333 = vmatpush1.bf16.msra.mxu0 %v3610_v34 }
 0x1a8   :  { %1509 = vst [vmem:[#allocation2 + $0x2b0] sm:$0xcc] %v1491_v7  ;;  %v1437_v60 = vsel %vm195_vm0, %v1426_v29, %v1427_v51  ;;  %v192_v14 = vrot.slane %v182_v12, 4 }
 0x1a9   :  { %v1438_v61 = vsel %vm1433_vm14, %v4631_v56, %v1437_v60  ;;  %345 = vrot.lane.b32.xlu1 %v4979_v40, %s3938_s16  ;;  %v1521_v11 = vpop.permute.xlu0 %1520  ;;  %v5853_v56 = vrot.slane %v4650_v23, 4 }
 0x1aa   :  { %1456 = vst [vmem:[#allocation2 + $0x2b0] sm:$0x33] %v1438_v61  ;;  %v205_v20 = vsel %vm195_vm0, %v191_v18, %v192_v14  ;;  %v1533_v35 = vrot.slane %v1521_v11, 4 }
 0x1ab   :  { %v206_v1 = vsel %vm197_vm3, %v4638_v47, %v205_v20  ;;  %v289_v10 = vpop.permute.xlu1 %288  ;;  %1526 = vrot.lane.b32.xlu0 %v4880_v37, %s3960_s12 }
 0x1ac   :  { %222 = vst [vmem:[#allocation2 + $0x20] sm:$0xcc] %v206_v1  ;;  %v1543_v29 = vsel %vm195_vm0, %v5853_v56, %v1533_v35  ;;  %v299_v34 = vrot.slane %v289_v10, 4 }
 0x1ad   :  { %v1544_v0 = vsel %vm1539_vm12, %v4650_v23, %v1543_v29  ;;  %451 = vrot.lane.b32.xlu1 %v4979_v40, %s3940_s18  ;;  %v236_v18 = vpop.permute.xlu0 %235  ;;  %v3613_v7 = vld [vmem:[#allocation2 + $0x248] ss:$56 sps:$4 sm:$0xff]   ;;  %v3615_v60 = vld [vmem:[#allocation2 + $0x24c] ss:$56 sps:$4 sm:$0xff]  }
 0x1ae   :  { %1562 = vst [vmem:[#allocation2 + $0x2e8] sm:$0x33] %v1544_v0  ;;  %v311_v47 = vsel %vm195_vm0, %v298_v42, %v299_v34  ;;  %v246_v37 = vrot.slane %v236_v18, 4  ;;  %2383 = vmatprep.subr.bf16.mxu1 %v3615_v60 }
 0x1af   :  { %v312_v61 = vsel %vm303_vm2, %v4657_v49, %v311_v47  ;;  %v5084_v20 = vpop.permute.xlu1 %1469  ;;  %398 = vrot.lane.b32.xlu0 %v4999_v15, %s3939_s17  ;;  %2384 = vmatpush1.bf16.msra.mxu1 %v3613_v7 }
 0x1b0   :  { %328 = vst [vmem:[#allocation2 + $0x58] sm:$0xcc] %v312_v61  ;;  %v258_v23 = vsel %vm195_vm0, %v245_v4, %v246_v37  ;;  %v1481_v1 = vrot.slane %v5084_v20, 4 }
 0x1b1   :  { %v259_v42 = vsel %vm250_vm1, %v4675_v25, %v258_v23  ;;  %557 = vrot.lane.b32.xlu1 %v4979_v40, %s3942_s20  ;;  %v5096_v49 = vpop.permute.xlu0 %1416 }
 0x1b2   :  { %275 = vst [vmem:[#allocation2 + $0x58] sm:$0x33] %v259_v42  ;;  %v1492_v56 = vsel %vm195_vm0, %v1480_v38, %v1481_v1  ;;  %v1428_v29 = vrot.slane %v5096_v49, 4 }
 0x1b3   :  { %v1493_v4 = vsel %vm1486_vm15, %v1468_v16, %v1492_v56  ;;  %v5103_v0 = vpop.permute.xlu1 %183  ;;  %504 = vrot.lane.b32.xlu0 %v4999_v15, %s3941_s19 }
 0x1b4   :  { %1510 = vst [vmem:[#allocation2 + $0x2b8] sm:$0xcc] %v1493_v4  ;;  %v1439_v25 = vsel %vm195_vm0, %v1427_v51, %v1428_v29  ;;  %v193_v7 = vrot.slane %v5103_v0, 4 }
 0x1b5   :  { %v1440_v60 = vsel %vm1433_vm14, %v1415_v50, %v1439_v25  ;;  %663 = vrot.lane.b32.xlu1 %v4979_v40, %s3944_s22  ;;  %v5114_v38 = vpop.permute.xlu0 %1522  ;;  %v3617_v16 = vld [vmem:[#allocation2 + $0x2b4] ss:$56 sps:$4 sm:$0x3f]   ;;  %v3619_v23 = vld [vmem:[#allocation2 + $0x2b0] ss:$56 sps:$4 sm:$0x3f]  }
 0x1b6   :  { %1457 = vst [vmem:[#allocation2 + $0x2b8] sm:$0x33] %v1440_v60  ;;  %v207_v47 = vsel %vm195_vm0, %v192_v14, %v193_v7  ;;  %v1534_v61 = vrot.slane %v5114_v38, 4  ;;  %3429 = vmatprep.subr.msk.bf16.mxu0 %vm2177_vm13, %v3617_v16  ;;  %v2191_v14 = vsel %vm2177_vm13, %v3619_v23, 0 }
 0x1b7   :  { %v208_v51 = vsel %vm197_vm3, %v182_v12, %v207_v47  ;;  %v5121_v42 = vpop.permute.xlu1 %290  ;;  %610 = vrot.lane.b32.xlu0 %v4999_v15, %s3943_s21  ;;  %2335 = vmatpush1.bf16.msra.mxu0 %v2191_v14 }
 0x1b8   :  { %223 = vst [vmem:[#allocation2 + $0x28] sm:$0xcc] %v208_v51  ;;  %v1545_v50 = vsel %vm195_vm0, %v1533_v35, %v1534_v61  ;;  %v300_v56 = vrot.slane %v5121_v42, 4 }
 0x1b9   :  { %v1546_v4 = vsel %vm1539_vm12, %v1521_v11, %v1545_v50  ;;  %769 = vrot.lane.b32.xlu1 %v4979_v40, %s3946_s24  ;;  %v5134_v12 = vpop.permute.xlu0 %237  ;;  %v3620_v25 = vld [vmem:[#allocation2 + $0x20] ss:$56 sps:$4 sm:$0xff]   ;;  %v3622_v60 = vld [vmem:[#allocation2 + $0x24] ss:$56 sps:$4 sm:$0xff]  }
 0x1ba   :  { %1563 = vst [vmem:[#allocation2 + $0x2f0] sm:$0x33] %v1546_v4  ;;  %v313_v16 = vsel %vm195_vm0, %v299_v34, %v300_v56  ;;  %v247_v35 = vrot.slane %v5134_v12, 4  ;;  %2424 = vmatprep.subr.bf16.mxu0 %v3622_v60  ;;  %3430 = vmatmul.mubr.msk.bf16.vlgmr.msra.gmra.mrb[8].mxu0 %vm462_vm6, %v4670_v28 }
 0x1bb   :  { %v314_v47 = vsel %vm303_vm2, %v289_v10, %v313_v16  ;;  %v395_v23 = vpop.permute.xlu1 %394  ;;  %716 = vrot.lane.b32.xlu0 %v4999_v15, %s3945_s23  ;;  %2425 = vmatpush1.bf16.msra.mxu0 %v3620_v25 }
 0x1bc   :  { %329 = vst [vmem:[#allocation2 + $0x60] sm:$0xcc] %v314_v47  ;;  %v260_v11 = vsel %vm195_vm0, %v246_v37, %v247_v35  ;;  %v405_v51 = vrot.slane %v395_v23, 4  ;;  %2364 = vmatprep.mubr.bf16.mxu0 %v3961_v6  ;;  %v5854_v47 = vrot.slane %v4741_v54, 4 }
 0x1bd   :  { %v261_v34 = vsel %vm250_vm1, %v236_v18, %v260_v11  ;;  %875 = vrot.lane.b32.xlu1 %v4979_v40, %s3948_s26  ;;  %v342_v10 = vpop.permute.xlu0 %341 }
 0x1be   :  { %276 = vst [vmem:[#allocation2 + $0x60] sm:$0x33] %v261_v34  ;;  %v417_v50 = vsel %vm195_vm0, %v404_v62, %v405_v51  ;;  %v352_v14 = vrot.slane %v342_v10, 4 }
 0x1bf   :  { %v418_v37 = vsel %vm409_vm5, %v4717_v36, %v417_v50  ;;  %v501_v4 = vpop.permute.xlu1 %500  ;;  %822 = vrot.lane.b32.xlu0 %v4999_v15, %s3947_s25  ;;  %v5168_v36 = vcombine.high %v4860_v45, %v4860_v45 }
 0x1c0   :  { %434 = vst [vmem:[#allocation2 + $0x90] sm:$0xcc] %v418_v37  ;;  %v364_v18 = vsel %vm195_vm0, %v351_v30, %v352_v14  ;;  %v511_v25 = vrot.slane %v501_v4, 4 }
 0x1c1   :  { %v365_v60 = vsel %vm356_vm4, %v4733_v32, %v364_v18  ;;  %981 = vrot.lane.b32.xlu1 %v4979_v40, %s3950_s28  ;;  %v448_v62 = vpop.permute.xlu0 %447  ;;  %v3623_v16 = vld [vmem:[#allocation2 + $0x2bc] ss:$56 sps:$4 sm:$0x3f]   ;;  %v3625_v30 = vld [vmem:[#allocation2 + $0x2b8] ss:$56 sps:$4 sm:$0x3f]  }
 0x1c2   :  { %381 = vst [vmem:[#allocation2 + $0x90] sm:$0x33] %v365_v60  ;;  %v523_v11 = vsel %vm195_vm0, %v5854_v47, %v511_v25  ;;  %v458_v34 = vrot.slane %v448_v62, 4  ;;  %3432 = vmatprep.subr.msk.bf16.mxu1 %vm2177_vm13, %v3623_v16  ;;  %v2197_v37 = vsel %vm2177_vm13, %v3625_v30, 0  ;;  %3431 = vmatmul.mubr.msk.bf16.gmra.mrb[12].mxu0 %vm462_vm6, %v4706_v63  ;;  %v1142_v30 = vrot.slane %v5168_v36, 6 }
 0x1c3   :  { %v524_v50 = vsel %vm515_vm7, %v4741_v54, %v523_v11  ;;  %v5175_v32 = vpop.permute.xlu1 %396  ;;  %928 = vrot.lane.b32.xlu0 %v4999_v15, %s3949_s27  ;;  %2386 = vmatpush1.bf16.msra.mxu1 %v2197_v37 }
 0x1c4   :  { %540 = vst [vmem:[#allocation2 + $0xc8] sm:$0xcc] %v524_v50  ;;  %v470_v45 = vsel %vm195_vm0, %v457_v41, %v458_v34  ;;  %v406_v40 = vrot.slane %v5175_v32, 4  ;;  %2456 = vmatprep.mubr.bf16.mxu0 %v3961_v6 }
 0x1c5   :  { %v471_v54 = vsel %vm462_vm6, %v4754_v52, %v470_v45  ;;  %1096 = vrot.lane.b32.xlu1 %v5168_v36, %s3952_s30  ;;  %v5191_v18 = vpop.permute.xlu0 %343  ;;  %v3626_v60 = vld [vmem:[#allocation2 + $0x28] ss:$56 sps:$4 sm:$0xff]   ;;  %v3628_v16 = vld [vmem:[#allocation2 + $0x2c] ss:$56 sps:$4 sm:$0xff]  }
 0x1c6   :  { %487 = vst [vmem:[#allocation2 + $0xc8] sm:$0x33] %v471_v54  ;;  %v419_v41 = vsel %vm195_vm0, %v405_v51, %v406_v40  ;;  %v353_v47 = vrot.slane %v5191_v18, 4  ;;  %2475 = vmatprep.subr.bf16.mxu1 %v3628_v16  ;;  %3433 = vmatmul.mubr.msk.bf16.vlgmr.msra.gmra.mrb[8].mxu1 %vm462_vm6, %v4670_v28 }
 0x1c7   :  { %v420_v11 = vsel %vm409_vm5, %v395_v23, %v419_v41  ;;  %v5199_v52 = vpop.permute.xlu1 %502  ;;  %1034 = vrot.lane.b32.xlu0 %v4999_v15, %s3951_s29  ;;  %2476 = vmatpush1.bf16.msra.mxu1 %v3626_v60 }
 0x1c8   :  { %435 = vst [vmem:[#allocation2 + $0x98] sm:$0xcc] %v420_v11  ;;  %v366_v50 = vsel %vm195_vm0, %v352_v14, %v353_v47  ;;  %v512_v51 = vrot.slane %v5199_v52, 4  ;;  %2415 = vmatprep.mubr.bf16.mxu1 %v3961_v6 }
 0x1c9   :  { %v367_v23 = vsel %vm356_vm4, %v342_v10, %v366_v50  ;;  %1210 = vrot.lane.b32.xlu1 %v5168_v36, %s3954_s6  ;;  %v5213_v45 = vpop.permute.xlu0 %449 }
 0x1ca   :  { %382 = vst [vmem:[#allocation2 + $0x98] sm:$0x33] %v367_v23  ;;  %v525_v15 = vsel %vm195_vm0, %v511_v25, %v512_v51  ;;  %v459_v14 = vrot.slane %v5213_v45, 4 }
 0x1cb   :  { %v526_v37 = vsel %vm515_vm7, %v501_v4, %v525_v15  ;;  %v607_v28 = vpop.permute.xlu1 %606  ;;  %1157 = vrot.lane.b32.xlu0 %v1142_v30, %s3953_s5 }
 0x1cc   :  { %541 = vst [vmem:[#allocation2 + $0xd0] sm:$0xcc] %v526_v37  ;;  %v472_v10 = vsel %vm195_vm0, %v458_v34, %v459_v14  ;;  %v617_v54 = vrot.slane %v607_v28, 4 }
 0x1cd   :  { %v473_v60 = vsel %vm462_vm6, %v448_v62, %v472_v10  ;;  %1316 = vrot.lane.b32.xlu1 %v5168_v36, %s3956_s8  ;;  %v554_v25 = vpop.permute.xlu0 %553  ;;  %v3629_v16 = vld [vmem:[#allocation2 + $0x90] ss:$56 sps:$4 sm:$0xff]   ;;  %v3631_v41 = vld [vmem:[#allocation2 + $0x94] ss:$56 sps:$4 sm:$0xff]  }
 0x1ce   :  { %488 = vst [vmem:[#allocation2 + $0xd0] sm:$0x33] %v473_v60  ;;  %v629_v4 = vsel %vm195_vm0, %v616_v9, %v617_v54  ;;  %v564_v11 = vrot.slane %v554_v25, 4  ;;  %2426 = vmatprep.subr.bf16.mxu0 %v3631_v41  ;;  %3434 = vmatmul.mubr.msk.bf16.gmra.mrb[12].mxu1 %vm462_vm6, %v4706_v63 }
 0x1cf   :  { %v630_v50 = vsel %vm5817_vm9, %v4792_v43, %v629_v4  ;;  %v713_v23 = vpop.permute.xlu1 %712  ;;  %1263 = vrot.lane.b32.xlu0 %v1142_v30, %s3955_s7  ;;  %2427 = vmatpush1.bf16.msra.mxu0 %v3629_v16 }
 0x1d0   :  { %646 = vst [vmem:[#allocation2 + $0x100] sm:$0xcc] %v630_v50  ;;  %v576_v62 = vsel %vm195_vm0, %v563_v8, %v564_v11  ;;  %v723_v34 = vrot.slane %v713_v23, 4  ;;  %2507 = vmatprep.mubr.bf16.mxu1 %v3961_v6 }
 0x1d1   :  { %v577_v9 = vsel %vm568_vm8, %v4804_v13, %v576_v62  ;;  %1422 = vrot.lane.b32.xlu1 %v5168_v36, %s3958_s10  ;;  %v660_v43 = vpop.permute.xlu0 %659  ;;  %v1669_v62 = vld [vmem:[%s5784_s3 + $0x8] sm:$0xff] }
 0x1d2   :  { %593 = vst [vmem:[#allocation2 + $0x100] sm:$0x33] %v577_v9  ;;  %v735_v15 = vsel %vm195_vm0, %v722_v31, %v723_v34  ;;  %v670_v8 = vrot.slane %v660_v43, 4 }
 0x1d3   :  { %v736_v37 = vsel %vm5855_vm11, %v4811_v39, %v735_v15  ;;  %v5249_v10 = vpop.permute.xlu1 %608  ;;  %1369 = vrot.lane.b32.xlu0 %v1142_v30, %s3957_s9 }
 0x1d4   :  { %752 = vst [vmem:[#allocation2 + $0x138] sm:$0xcc] %v736_v37  ;;  %v682_v63 = vsel %vm195_vm0, %v669_v55, %v670_v8  ;;  %v618_v13 = vrot.slane %v5249_v10, 4  ;;  %v1668_v55 = vld [vmem:[%s5784_s3] sm:$0xff] }
 0x1d5   :  { %v683_v60 = vsel %vm5856_vm10, %v4822_v57, %v682_v63  ;;  %1528 = vrot.lane.b32.xlu1 %v5168_v36, %s3960_s12  ;;  %v5260_v31 = vpop.permute.xlu0 %555  ;;  %v3632_v39 = vld [vmem:[#allocation2 + $0x98] ss:$56 sps:$4 sm:$0xff]   ;;  %v3634_v16 = vld [vmem:[#allocation2 + $0x9c] ss:$56 sps:$4 sm:$0xff]  }
 0x1d6   :  { %699 = vst [vmem:[#allocation2 + $0x138] sm:$0x33] %v683_v60  ;;  %v631_v41 = vsel %vm195_vm0, %v617_v54, %v618_v13  ;;  %v565_v4 = vrot.slane %v5260_v31, 4  ;;  %2477 = vmatprep.subr.bf16.mxu1 %v3634_v16 }
 0x1d7   :  { %v632_v57 = vsel %vm5817_vm9, %v607_v28, %v631_v41  ;;  %v5270_v50 = vpop.permute.xlu1 %714  ;;  %1475 = vrot.lane.b32.xlu0 %v1142_v30, %s3959_s11  ;;  %2478 = vmatpush1.bf16.msra.mxu1 %v3632_v39  ;;  %vm5867_vm9 = vcmask 130048  }
 0x1d8   :  { %647 = vst [vmem:[#allocation2 + $0x108] sm:$0xcc] %v632_v57  ;;  %v578_v36 = vsel %vm195_vm0, %v564_v11, %v565_v4  ;;  %v724_v54 = vrot.slane %v5270_v50, 4  ;;  %v1670_v11 = vld [vmem:[%s5784_s3 + $0x10] sm:$0xff] }
 0x1d9   :  { %v579_v9 = vsel %vm568_vm8, %v554_v25, %v578_v36  ;;  %v5281_v28 = vpop.permute.xlu0 %661  ;;  %1673 = vperm.xlu1 %3533, %v1668_v55  }
 0x1da   :  { %594 = vst [vmem:[#allocation2 + $0x108] sm:$0x33] %v579_v9  ;;  %v737_v30 = vsel %vm195_vm0, %v723_v34, %v724_v54  ;;  %v671_v15 = vrot.slane %v5281_v28, 4 }
 0x1db   :  { %v738_v37 = vsel %vm5855_vm11, %v713_v23, %v737_v30  ;;  %v819_v63 = vpop.permute.xlu1 %818  ;;  %1678 = vperm.xlu0 %3532, %v1669_v62   ;;  %vm5857_vm11 = vcmask 138240  }
 0x1dc   :  { %753 = vst [vmem:[#allocation2 + $0x140] sm:$0xcc] %v738_v37  ;;  %v684_v25 = vsel %vm195_vm0, %v670_v8, %v671_v15  ;;  %v829_v60 = vrot.slane %v819_v63, 4  ;;  %v5858_v8 = vrot.slane %v4876_v48, 4 }
 0x1dd   :  { %v685_v39 = vsel %vm5856_vm10, %v660_v43, %v684_v25  ;;  %v766_v16 = vpop.permute.xlu0 %765  ;;  %v3635_v34 = vld [vmem:[#allocation2 + $0x100] ss:$56 sps:$4 sm:$0xff]   ;;  %v3637_v41 = vld [vmem:[#allocation2 + $0x104] ss:$56 sps:$4 sm:$0xff]   ;;  %1683 = vperm.xlu1 %3533, %v1670_v11   ;;  %vm5859_vm10 = vcmask 146432  }
 0x1de   :  { %700 = vst [vmem:[#allocation2 + $0x140] sm:$0x33] %v685_v39  ;;  %v841_v55 = vsel %vm195_vm0, %v828_v33, %v829_v60  ;;  %v776_v23 = vrot.slane %v766_v16, 4  ;;  %2428 = vmatprep.subr.bf16.mxu0 %v3637_v41  ;;  %v5860_v33 = vrot.slane %v4887_v58, 4  ;;  %v5862_v39 = vrot.slane %v4898_v3, 4 }
 0x1df   :  { %v842_v57 = vsel %vm5857_vm11, %v4864_v24, %v841_v55  ;;  %v925_v36 = vpop.permute.xlu1 %924  ;;  %2429 = vmatpush1.bf16.msra.mxu0 %v3635_v34  ;;  %vm5861_vm11 = vcmask 64512  }
 0x1e0   :  { %858 = vst [vmem:[#allocation2 + $0x170] sm:$0xcc] %v842_v57  ;;  %v788_v43 = vsel %vm195_vm0, %v5858_v8, %v776_v23  ;;  %v935_v62 = vrot.slane %v925_v36, 4 }
 0x1e1   :  { %v789_v9 = vsel %vm5859_vm10, %v4876_v48, %v788_v43  ;;  %v872_v30 = vpop.permute.xlu0 %871  ;;  %vm5863_vm10 = vcmask 130048  }
 0x1e2   :  { %805 = vst [vmem:[#allocation2 + $0x170] sm:$0x33] %v789_v9  ;;  %v947_v11 = vsel %vm195_vm0, %v5860_v33, %v935_v62  ;;  %v882_v37 = vrot.slane %v872_v30, 4 }
 0x1e3   :  { %v948_v24 = vsel %vm5861_vm11, %v4887_v58, %v947_v11  ;;  %v5310_v25 = vpop.permute.xlu1 %820  ;;  %vm5864_vm11 = vcmask 138240  }
 0x1e4   :  { %964 = vst [vmem:[#allocation2 + $0x1a8] sm:$0xcc] %v948_v24  ;;  %v894_v34 = vsel %vm195_vm0, %v5862_v39, %v882_v37  ;;  %v5819_v41 = vrot.slane %v5310_v25, 4 }
 0x1e5   :  { %v895_v48 = vsel %vm5863_vm10, %v4898_v3, %v894_v34  ;;  %v5318_v55 = vpop.permute.xlu0 %767  ;;  %v3638_v57 = vld [vmem:[#allocation2 + $0x108] ss:$56 sps:$4 sm:$0xff]   ;;  %v3640_v8 = vld [vmem:[#allocation2 + $0x10c] ss:$56 sps:$4 sm:$0xff]   ;;  %vm5865_vm10 = vcmask 146432  }
 0x1e6   :  { %911 = vst [vmem:[#allocation2 + $0x1a8] sm:$0x33] %v895_v48  ;;  %v843_v58 = vsel %vm195_vm0, %v829_v60, %v5819_v41  ;;  %v777_v43 = vrot.slane %v5318_v55, 4  ;;  %2479 = vmatprep.subr.bf16.mxu1 %v3640_v8 }
 0x1e7   :  { %v844_v9 = vsel %vm5864_vm11, %v819_v63, %v843_v58  ;;  %v5325_v33 = vpop.permute.xlu1 %926  ;;  %2480 = vmatpush1.bf16.msra.mxu1 %v3638_v57  ;;  %vm5866_vm11 = vcmask 64512  }
 0x1e8   :  { %859 = vst [vmem:[#allocation2 + $0x178] sm:$0xcc] %v844_v9  ;;  %v790_v3 = vsel %vm195_vm0, %v776_v23, %v777_v43  ;;  %v5818_v11 = vrot.slane %v5325_v33, 4 }
 0x1e9   :  { %v791_v24 = vsel %vm5865_vm10, %v766_v16, %v790_v3  ;;  %v5332_v39 = vpop.permute.xlu0 %873  ;;  %v5868_v3 = vrot.slane %v4935_v27, 4  ;;  %vm5869_vm10 = vcmask 48128  }
 0x1ea   :  { %806 = vst [vmem:[#allocation2 + $0x178] sm:$0x33] %v791_v24  ;;  %v949_v63 = vsel %vm195_vm0, %v935_v62, %v5818_v11  ;;  %v883_v60 = vrot.slane %v5332_v39, 4 }
 0x1eb   :  { %v950_v34 = vsel %vm5866_vm11, %v925_v36, %v949_v63  ;;  %v1031_v48 = vpop.permute.xlu1 %1030  ;;  %vm5873_vm11 = vcmask 449536  }
 0x1ec   :  { %965 = vst [vmem:[#allocation2 + $0x1b0] sm:$0xcc] %v950_v34  ;;  %v896_v23 = vsel %vm195_vm0, %v882_v37, %v883_v60  ;;  %v1041_v57 = vrot.slane %v1031_v48, 4  ;;  %v5870_v37 = vrot.slane %v4947_v22, 4 }
 0x1ed   :  { %v897_v16 = vsel %vm5867_vm9, %v872_v30, %v896_v23  ;;  %v978_v8 = vpop.permute.xlu0 %977  ;;  %v3641_v58 = vld [vmem:[#allocation2 + $0x170] ss:$56 sps:$4 sm:$0xff]   ;;  %v3643_v9 = vld [vmem:[#allocation2 + $0x174] ss:$56 sps:$4 sm:$0xff]   ;;  %vm5871_vm9 = vcmask 56320  }
 0x1ee   :  { %912 = vst [vmem:[#allocation2 + $0x1b0] sm:$0x33] %v897_v16  ;;  %v1053_v62 = vsel %vm195_vm0, %v5868_v3, %v1041_v57  ;;  %v988_v24 = vrot.slane %v978_v8, 4  ;;  %2430 = vmatprep.subr.bf16.mxu0 %v3643_v9  ;;  %v5872_v3 = vrot.slane %v4954_v2, 4 }
 0x1ef   :  { %v1054_v36 = vsel %vm5869_vm10, %v4935_v27, %v1053_v62  ;;  %v1154_v63 = vpop.permute.xlu1 %1153  ;;  %2431 = vmatpush1.bf16.msra.mxu0 %v3641_v58  ;;  %v5874_v62 = vrot.slane %v4965_v19, 4  ;;  %vm5875_vm10 = vcmask 457728  }
 0x1f0   :  { %1070 = vst [vmem:[#allocation2 + $0x1e0] sm:$0xcc] %v1054_v36  ;;  %v1000_v34 = vsel %vm195_vm0, %v5870_v37, %v988_v24  ;;  %v1164_v30 = vrot.slane %v1154_v63, 4 }
 0x1f1   :  { %v1001_v23 = vsel %vm5871_vm9, %v4947_v22, %v1000_v34  ;;  %v1093_v16 = vpop.permute.xlu0 %1092  ;;  %vm5876_vm9 = vcmask 48128  }
 0x1f2   :  { %1017 = vst [vmem:[#allocation2 + $0x1e0] sm:$0x33] %v1001_v23  ;;  %v1176_v11 = vsel %vm195_vm0, %v5872_v3, %v1164_v30  ;;  %v1103_v41 = vrot.slane %v1093_v16, 4 }
 0x1f3   :  { %v1177_v27 = vsel %vm5873_vm11, %v4954_v2, %v1176_v11  ;;  %v5358_v9 = vpop.permute.xlu1 %1032  ;;  %vm5877_vm11 = vcmask 56320  }
 0x1f4   :  { %1193 = vst [vmem:[#allocation2 + $0x218] sm:$0xcc] %v1177_v27  ;;  %v1115_v58 = vsel %vm195_vm0, %v5874_v62, %v1103_v41  ;;  %v1042_v36 = vrot.slane %v5358_v9, 4 }
 0x1f5   :  { %v1116_v22 = vsel %vm5875_vm10, %v4965_v19, %v1115_v58  ;;  %v5366_v37 = vpop.permute.xlu0 %979  ;;  %v3644_v34 = vld [vmem:[#allocation2 + $0x178] ss:$56 sps:$4 sm:$0xff]   ;;  %v3646_v23 = vld [vmem:[#allocation2 + $0x17c] ss:$56 sps:$4 sm:$0xff]   ;;  %vm5878_vm10 = vcmask 449536  }
 0x1f6   :  { %1132 = vst [vmem:[#allocation2 + $0x218] sm:$0x33] %v1116_v22  ;;  %v1055_v2 = vsel %vm195_vm0, %v1041_v57, %v1042_v36  ;;  %v989_v11 = vrot.slane %v5366_v37, 4  ;;  %2481 = vmatprep.subr.bf16.mxu1 %v3646_v23 }
 0x1f7   :  { %v1056_v3 = vsel %vm5876_vm9, %v1031_v48, %v1055_v2  ;;  %v5373_v27 = vpop.permute.xlu1 %1155  ;;  %2482 = vmatpush1.bf16.msra.mxu1 %v3644_v34  ;;  %vm5879_vm9 = vcmask 457728  }
 0x1f8   :  { %1071 = vst [vmem:[#allocation2 + $0x1e8] sm:$0xcc] %v1056_v3  ;;  %v1002_v19 = vsel %vm195_vm0, %v988_v24, %v989_v11  ;;  %v5820_v62 = vrot.slane %v5373_v27, 4 }
 0x1f9   :  { %v1003_v58 = vsel %vm5877_vm11, %v978_v8, %v1002_v19  ;;  %v5380_v22 = vpop.permute.xlu0 %1094  ;;  %vm5880_vm11 = vcmask 375808  }
 0x1fa   :  { %1018 = vst [vmem:[#allocation2 + $0x1e8] sm:$0x33] %v1003_v58  ;;  %v1178_v48 = vsel %vm195_vm0, %v1164_v30, %v5820_v62  ;;  %v1104_v57 = vrot.slane %v5380_v22, 4 }
 0x1fb   :  { %v1179_v23 = vsel %vm5878_vm10, %v1154_v63, %v1178_v48  ;;  %v1260_v2 = vpop.permute.xlu1 %1259  ;;  %vm5881_vm10 = vcmask 441344  }
 0x1fc   :  { %1194 = vst [vmem:[#allocation2 + $0x220] sm:$0xcc] %v1179_v23  ;;  %v1117_v24 = vsel %vm195_vm0, %v1103_v41, %v1104_v57  ;;  %v1270_v34 = vrot.slane %v1260_v2, 4 }
 0x1fd   :  { %v1118_v8 = vsel %vm5879_vm9, %v1093_v16, %v1117_v24  ;;  %v1207_v3 = vpop.permute.xlu0 %1206  ;;  %v3647_v19 = vld [vmem:[#allocation2 + $0x1e0] ss:$56 sps:$4 sm:$0xff]   ;;  %v3649_v58 = vld [vmem:[#allocation2 + $0x1e4] ss:$56 sps:$4 sm:$0xff]   ;;  %vm5882_vm9 = vcmask 359424  }
 0x1fe   :  { %1133 = vst [vmem:[#allocation2 + $0x220] sm:$0x33] %v1118_v8  ;;  %v1282_v30 = vsel %vm195_vm0, %v1269_v44, %v1270_v34  ;;  %v1217_v62 = vrot.slane %v1207_v3, 4  ;;  %2432 = vmatprep.subr.bf16.mxu0 %v3649_v58 }
 0x1ff   :  { %v1283_v63 = vsel %vm5880_vm11, %v5006_v17, %v1282_v30  ;;  %v1366_v48 = vpop.permute.xlu1 %1365  ;;  %2433 = vmatpush1.bf16.msra.mxu0 %v3647_v19  ;;  %vm5883_vm11 = vcmask 367616  }
 0x200   :  { %1299 = vst [vmem:[#allocation2 + $0x250] sm:$0xcc] %v1283_v63  ;;  %v1229_v41 = vsel %vm195_vm0, %v1216_v21, %v1217_v62  ;;  %v1376_v16 = vrot.slane %v1366_v48, 4 }
 0x201   :  { %v1230_v23 = vsel %vm5881_vm10, %v5018_v46, %v1229_v41  ;;  %v1313_v24 = vpop.permute.xlu0 %1312  ;;  %vm5884_vm10 = vcmask 375808  }
 0x202   :  { %1246 = vst [vmem:[#allocation2 + $0x250] sm:$0x33] %v1230_v23  ;;  %v1388_v44 = vsel %vm195_vm0, %v1375_v26, %v1376_v16  ;;  %v1323_v8 = vrot.slane %v1313_v24, 4 }
 0x203   :  { %v1389_v17 = vsel %vm5882_vm9, %v5025_v59, %v1388_v44  ;;  %v5406_v58 = vpop.permute.xlu1 %1261  ;;  %vm5885_vm9 = vcmask 441344  }
 0x204   :  { %1405 = vst [vmem:[#allocation2 + $0x288] sm:$0xcc] %v1389_v17  ;;  %v1335_v21 = vsel %vm195_vm0, %v1322_v53, %v1323_v8  ;;  %v1271_v19 = vrot.slane %v5406_v58, 4 }
 0x205   :  { %v1336_v46 = vsel %vm5883_vm11, %v5036_v5, %v1335_v21  ;;  %v5414_v30 = vpop.permute.xlu0 %1208  ;;  %v3650_v63 = vld [vmem:[#allocation2 + $0x1e8] ss:$56 sps:$4 sm:$0xff]   ;;  %v3652_v26 = vld [vmem:[#allocation2 + $0x1ec] ss:$56 sps:$4 sm:$0xff]   ;;  %vm5886_vm11 = vcmask 359424  }
 0x206   :  { %1352 = vst [vmem:[#allocation2 + $0x288] sm:$0x33] %v1336_v46  ;;  %v1284_v59 = vsel %vm195_vm0, %v1270_v34, %v1271_v19  ;;  %v1218_v41 = vrot.slane %v5414_v30, 4  ;;  %2483 = vmatprep.subr.bf16.mxu1 %v3652_v26 }
 0x207   :  { %v1285_v23 = vsel %vm5884_vm10, %v1260_v2, %v1284_v59  ;;  %v5421_v44 = vpop.permute.xlu1 %1367  ;;  %2484 = vmatpush1.bf16.msra.mxu1 %v3650_v63  ;;  %vm5887_vm10 = vcmask 367616  }
 0x208   :  { %1300 = vst [vmem:[#allocation2 + $0x258] sm:$0xcc] %v1285_v23  ;;  %v1231_v5 = vsel %vm195_vm0, %v1217_v62, %v1218_v41  ;;  %v1377_v53 = vrot.slane %v5421_v44, 4 }
 0x209   :  { %v1232_v17 = vsel %vm5885_vm9, %v1207_v3, %v1231_v5  ;;  %v5428_v21 = vpop.permute.xlu0 %1314  ;;  %vm5897_vm9 = vcmask 64512  }
 0x20a   :  { %1247 = vst [vmem:[#allocation2 + $0x258] sm:$0x33] %v1232_v17  ;;  %v1390_v2 = vsel %vm195_vm0, %v1376_v16, %v1377_v53  ;;  %v1324_v34 = vrot.slane %v5428_v21, 4 }
 0x20b   :  { %v1391_v46 = vsel %vm5886_vm11, %v1366_v48, %v1390_v2  ;;  %v1472_v26 = vpop.permute.xlu1 %1471  ;;  %vm5898_vm11 = vcmask 457728  }
 0x20c   :  { %1406 = vst [vmem:[#allocation2 + $0x290] sm:$0xcc] %v1391_v46  ;;  %v1337_v62 = vsel %vm195_vm0, %v1323_v8, %v1324_v34  ;;  %v1482_v63 = vrot.slane %v1472_v26, 4 }
 0x20d   :  { %v1338_v3 = vsel %vm5887_vm10, %v1313_v24, %v1337_v62  ;;  %v1419_v59 = vpop.permute.xlu0 %1418  ;;  %v3653_v23 = vld [vmem:[#allocation2 + $0x250] ss:$56 sps:$4 sm:$0xff]   ;;  %v3655_v5 = vld [vmem:[#allocation2 + $0x254] ss:$56 sps:$4 sm:$0xff]   ;;  %vm5899_vm10 = vcmask 48128  }
 0x20e   :  { %1353 = vst [vmem:[#allocation2 + $0x290] sm:$0x33] %v1338_v3  ;;  %v1494_v16 = vsel %vm195_vm0, %v1481_v1, %v1482_v63  ;;  %v1429_v17 = vrot.slane %v1419_v59, 4  ;;  %2434 = vmatprep.subr.bf16.mxu0 %v3655_v5 }
 0x20f   :  { %v1495_v48 = vsel %vm1486_vm15, %v5084_v20, %v1494_v16  ;;  %v186_v2 = vpop.permute.xlu1 %185  ;;  %2435 = vmatpush1.bf16.msra.mxu0 %v3653_v23 }
 0x210   :  { %1511 = vst [vmem:[#allocation2 + $0x2c0] sm:$0xcc] %v1495_v48  ;;  %v1441_v8 = vsel %vm195_vm0, %v1428_v29, %v1429_v17  ;;  %v194_v24 = vrot.slane %v186_v2, 4 }
 0x211   :  { %v1442_v46 = vsel %vm1433_vm14, %v5096_v49, %v1441_v8  ;;  %v1525_v62 = vpop.permute.xlu0 %1524 }
 0x212   :  { %1458 = vst [vmem:[#allocation2 + $0x2c0] sm:$0x33] %v1442_v46  ;;  %v209_v1 = vsel %vm195_vm0, %v193_v7, %v194_v24  ;;  %v1535_v3 = vrot.slane %v1525_v62, 4 }
 0x213   :  { %v210_v20 = vsel %vm197_vm3, %v5103_v0, %v209_v1  ;;  %v293_v5 = vpop.permute.xlu1 %292  ;;  %vm5890_vm3 = vcmask 146432  }
 0x214   :  { %224 = vst [vmem:[#allocation2 + $0x30] sm:$0xcc] %v210_v20  ;;  %v1547_v29 = vsel %vm195_vm0, %v1534_v61, %v1535_v3  ;;  %v301_v23 = vrot.slane %v293_v5, 4 }
 0x215   :  { %v1548_v49 = vsel %vm1539_vm12, %v5114_v38, %v1547_v29  ;;  %v240_v16 = vpop.permute.xlu0 %239  ;;  %v3656_v48 = vld [vmem:[#allocation2 + $0x258] ss:$56 sps:$4 sm:$0xff]   ;;  %v3658_v2 = vld [vmem:[#allocation2 + $0x25c] ss:$56 sps:$4 sm:$0xff]  }
 0x216   :  { %1564 = vst [vmem:[#allocation2 + $0x2f8] sm:$0x33] %v1548_v49  ;;  %v315_v7 = vsel %vm195_vm0, %v300_v56, %v301_v23  ;;  %v248_v8 = vrot.slane %v240_v16, 4  ;;  %2485 = vmatprep.subr.bf16.mxu1 %v3658_v2 }
 0x217   :  { %v316_v0 = vsel %vm303_vm2, %v5121_v42, %v315_v7  ;;  %v5464_v24 = vpop.permute.xlu1 %1473  ;;  %2486 = vmatpush1.bf16.msra.mxu1 %v3656_v48  ;;  %vm5889_vm2 = vcmask 228352  }
 0x218   :  { %330 = vst [vmem:[#allocation2 + $0x68] sm:$0xcc] %v316_v0  ;;  %v262_v38 = vsel %vm195_vm0, %v247_v35, %v248_v8  ;;  %v1483_v61 = vrot.slane %v5464_v24, 4 }
 0x219   :  { %v263_v46 = vsel %vm250_vm1, %v5134_v12, %v262_v38  ;;  %v5472_v1 = vpop.permute.xlu0 %1420  ;;  %vm5888_vm1 = vcmask 220160  }
 0x21a   :  { %277 = vst [vmem:[#allocation2 + $0x68] sm:$0x33] %v263_v46  ;;  %v1496_v42 = vsel %vm195_vm0, %v1482_v63, %v1483_v61  ;;  %v1430_v56 = vrot.slane %v5472_v1, 4 }
 0x21b   :  { %v1497_v20 = vsel %vm1486_vm15, %v1472_v26, %v1496_v42  ;;  %v346_v5 = vpop.permute.xlu1 %345 }
 0x21c   :  { %1512 = vst [vmem:[#allocation2 + $0x2c8] sm:$0xcc] %v1497_v20  ;;  %v1443_v35 = vsel %vm195_vm0, %v1429_v17, %v1430_v56  ;;  %v354_v29 = vrot.slane %v346_v5, 4  ;;  %v5510_v5 = vld [vmem:[%s5783_s2] sm:$0xff]  }
 0x21d   :  { %v1444_v12 = vsel %vm1433_vm14, %v1419_v59, %v1443_v35  ;;  %v5483_v23 = vpop.permute.xlu0 %1526  ;;  %v3659_v49 = vld [vmem:[#allocation2 + $0x2c4] ss:$56 sps:$4 sm:$0x3f]   ;;  %v3661_v26 = vld [vmem:[#allocation2 + $0x2c0] ss:$56 sps:$4 sm:$0x3f]  }
 0x21e   :  { %1459 = vst [vmem:[#allocation2 + $0x2c8] sm:$0x33] %v1444_v12  ;;  %v368_v63 = vsel %vm195_vm0, %v353_v47, %v354_v29  ;;  %v1536_v16 = vrot.slane %v5483_v23, 4  ;;  %3435 = vmatprep.subr.msk.bf16.mxu0 %vm2177_vm13, %v3659_v49  ;;  %v2203_v7 = vsel %vm2177_vm13, %v3661_v26, 0 }
 0x21f   :  { %v369_v48 = vsel %vm356_vm4, %v5191_v18, %v368_v63  ;;  %v452_v2 = vpop.permute.xlu1 %451  ;;  %2437 = vmatpush1.bf16.msra.mxu0 %v2203_v7  ;;  %vm5891_vm4 = vcmask 211968  }
 0x220   :  { %383 = vst [vmem:[#allocation2 + $0xa0] sm:$0x33] %v369_v48  ;;  %v1549_v59 = vsel %vm195_vm0, %v1535_v3, %v1536_v16  ;;  %v460_v17 = vrot.slane %v452_v2, 4 }
 0x221   :  { %v1550_v8 = vsel %vm1539_vm12, %v1525_v62, %v1549_v59  ;;  %v399_v47 = vpop.permute.xlu0 %398  ;;  %v5497_v0 = vld [vmem:[#allocation2 + $0x30] ss:$56 sps:$4 sm:$0xff]   ;;  %v3664_v38 = vld [vmem:[#allocation2 + $0x34] ss:$56 sps:$4 sm:$0xff]  }
 0x222   :  { %1565 = vst [vmem:[#allocation2 + $0x300] sm:$0x33] %v1550_v8  ;;  %v474_v18 = vsel %vm195_vm0, %v459_v14, %v460_v17  ;;  %v407_v46 = vrot.slane %v399_v47, 4  ;;  %2526 = vmatprep.subr.bf16.mxu0 %v3664_v38  ;;  %3436 = vmatmul.mubr.msk.bf16.vlgmr.msra.gmra.mrb[16].mxu0 %vm462_vm6, %v5510_v5 }
 0x223   :  { %v475_v42 = vsel %vm462_vm6, %v5213_v45, %v474_v18  ;;  %v558_v3 = vpop.permute.xlu1 %557  ;;  %2527 = vmatpush1.bf16.msra.mxu0 %v5497_v0  ;;  %2466 = vmatprep.mubr.bf16.mxu0 %v3961_v6 }
 0x224   :  { %489 = vst [vmem:[#allocation2 + $0xd8] sm:$0x33] %v475_v42  ;;  %v421_v62 = vsel %vm195_vm0, %v406_v40, %v407_v46  ;;  %v566_v20 = vrot.slane %v558_v3, 4 }
 0x225   :  { %v422_v14 = vsel %vm409_vm5, %v5175_v32, %v421_v62  ;;  %v505_v45 = vpop.permute.xlu0 %504  ;;  %v5523_v49 = vpop.f32.mrb[0].mxu0  ;;  %vm5892_vm5 = vcmask 130048  }
 0x226   :  { %436 = vst [vmem:[#allocation2 + $0xa0] sm:$0xcc] %v422_v14  ;;  %v580_v40 = vsel %vm195_vm0, %v565_v4, %v566_v20  ;;  %v513_v35 = vrot.slane %v505_v45, 4  ;;  %v5528_v26 = vpop.f32.mrb[1].mxu0 }
 0x227   :  { %v581_v29 = vsel %vm568_vm8, %v5260_v31, %v580_v40  ;;  %v664_v12 = vpop.permute.xlu1 %663  ;;  %v5532_v59 = vpop.f32.mrb[2].mxu0  ;;  %vm5895_vm8 = vcmask 56320  }
 0x228   :  { %595 = vst [vmem:[#allocation2 + $0x110] sm:$0x33] %v581_v29  ;;  %v527_v32 = vsel %vm195_vm0, %v512_v51, %v513_v35  ;;  %v672_v63 = vrot.slane %v664_v12, 4  ;;  %v5537_v8 = vpop.f32.mrb[3].mxu0 }
 0x229   :  { %v528_v48 = vsel %vm515_vm7, %v5199_v52, %v527_v32  ;;  %v611_v2 = vpop.permute.xlu0 %610  ;;  %v3665_v4 = vld [vmem:[#allocation2 + $0x2cc] ss:$56 sps:$4 sm:$0x3f]   ;;  %v3667_v7 = vld [vmem:[#allocation2 + $0x2c8] ss:$56 sps:$4 sm:$0x3f]  }
 0x22a   :  { %542 = vst [vmem:[#allocation2 + $0xd8] sm:$0xcc] %v528_v48  ;;  %v686_v31 = vsel %vm195_vm0, %v671_v15, %v672_v63  ;;  %v619_v17 = vrot.slane %v611_v2, 4  ;;  %3438 = vmatprep.subr.msk.bf16.mxu1 %vm2177_vm13, %v3665_v4  ;;  %v2209_v46 = vsel %vm2177_vm13, %v3667_v7, 0  ;;  %v5549_v15 = vld [vmem:[%s5783_s2 + $0x8] ss:$0 sps:$4 sm:$0xff]  }
 0x22b   :  { %v687_v51 = vsel %vm5888_vm1, %v5281_v28, %v686_v31  ;;  %v770_v47 = vpop.permute.xlu1 %769  ;;  %3437 = vmatmul.mubr.msk.bf16.gmra.mrb[20].mxu0 %vm462_vm6, %v5549_v15  ;;  %2488 = vmatpush1.bf16.msra.mxu1 %v2209_v46  ;;  %vm5894_vm7 = vcmask 138240   ;;  %v5896_v46 = vrot.slane %v5325_v33, 4  ;;  %vm5900_vm1 = vcmask 441344   ;;  %s3962_s2 = smov [#allocation8]  }
 0x22c   :  { %701 = vst [vmem:[#allocation2 + $0x148] sm:$0x33] %v687_v51  ;;  %v633_v52 = vsel %vm195_vm0, %v618_v13, %v619_v17  ;;  %v778_v18 = vrot.slane %v770_v47, 4  ;;  %2558 = vmatprep.mubr.bf16.mxu0 %v3961_v6  ;;  %3487 = vmatprep.subr.bf16.mxu1 %v3664_v38  ;;  %s3294_s22 = sshll.u32 %s3962_s2, 4  ;;  %s3295_s22 = int_to_ptr.vmem [resolvable:$true] %s3294_s22 }
 0x22d   :  { %v634_v28 = vsel %vm5889_vm2, %v5249_v10, %v633_v52  ;;  %v717_v42 = vpop.permute.xlu0 %716  ;;  %v5561_v14 = vpop.f32.mrb[4].mxu0  ;;  %vm5902_vm2 = vcmask 449536   ;;  %s3904_s23 = scalar_lea.vmem %s3295_s22, 896  ;;  %p3909_p9 = scmp.lt.s32.totalorder %s3295_s22, %s3295_s22 }
 0x22e   :  { %648 = vst [vmem:[#allocation2 + $0x110] sm:$0xcc] %v634_v28  ;;  %v792_v13 = vsel %vm195_vm0, %v777_v43, %v778_v18  ;;  %v725_v3 = vrot.slane %v717_v42, 4  ;;  %3439 = vmatmul.mubr.msk.bf16.vlgmr.msra.gmra.mrb[16].mxu1 %vm462_vm6, %v5510_v5  ;;  %v5568_v40 = vpop.f32.mrb[5].mxu0  ;;  %p3905_p8 = scmp.ne.s32.totalorder %s3295_s22, %s3904_s23  ;;  %p3910_p10 = scmp.lt.s32.totalorder %s3904_s23, %s3904_s23 }
 0x22f   :  { %v793_v62 = vsel %vm5890_vm3, %v5318_v55, %v792_v13  ;;  %v876_v20 = vpop.permute.xlu1 %875  ;;  %3494 = vmatpush1.bf16.msra.mxu1 %v5497_v0  ;;  %2517 = vmatprep.mubr.bf16.mxu1 %v3961_v6  ;;  %v2268_v29 = vpop.f32.mrb[6].mxu0  ;;  %v5893_v0 = vrot.slane %v5310_v25, 4  ;;  %vm5903_vm3 = vcmask 367616  }
 0x230   :  { %807 = vst [vmem:[#allocation2 + $0x180] sm:$0x33] %v793_v62  ;;  %v739_v10 = vsel %vm195_vm0, %v724_v54, %v725_v3  ;;  %v884_v45 = vrot.slane %v876_v20, 4  ;;  %v2269_v32 = vpop.f32.mrb[7].mxu0  ;;  %p3911_p11 = por %p3910_p10, %p3909_p9 }
 0x231   :  { %v740_v43 = vsel %vm5891_vm4, %v5270_v50, %v739_v10  ;;  %v823_v38 = vpop.permute.xlu0 %822  ;;  %v3668_v55 = vld [vmem:[#allocation2 + $0xa0] ss:$56 sps:$4 sm:$0xff]   ;;  %v3670_v35 = vld [vmem:[#allocation2 + $0xa4] ss:$56 sps:$4 sm:$0xff]   ;;  %v5579_v50 = vpop.f32.mrb[0].mxu1  ;;  %vm5904_vm4 = vcmask 375808  }
 0x232   :  { %754 = vst [vmem:[#allocation2 + $0x148] sm:$0xcc] %v740_v43  ;;  %v898_v54 = vsel %vm195_vm0, %v883_v60, %v884_v45  ;;  %v831_v12 = vrot.slane %v823_v38, 4  ;;  %2528 = vmatprep.subr.bf16.mxu0 %v3670_v35  ;;  %3488 = vmatprep.subr.bf16.mxu1 %v3670_v35  ;;  %v5584_v31 = vpop.f32.mrb[1].mxu1  ;;  %p3912_p12 = pnand %p3911_p11, %p3905_p8 }
 0x233   :  { %v899_v63 = vsel %vm5892_vm5, %v5332_v39, %v898_v54  ;;  %v982_v48 = vpop.permute.xlu1 %981  ;;  %2529 = vmatpush1.bf16.msra.mxu0 %v3668_v55  ;;  %3495 = vmatpush1.bf16.msra.mxu1 %v3668_v55  ;;  %v5588_v39 = vpop.f32.mrb[2].mxu1  ;;  %vm5905_vm5 = vcmask 359424  }
 0x234   :  { %913 = vst [vmem:[#allocation2 + $0x1b8] sm:$0x33] %v899_v63  ;;  %v845_v2 = vsel %vm195_vm0, %v5893_v0, %v831_v12  ;;  %v990_v4 = vrot.slane %v982_v48, 4  ;;  %v5593_v47 = vpop.f32.mrb[3].mxu1  ;;  %v5901_v12 = vrot.slane %v5373_v27, 4 }
 0x235   :  { %v846_v60 = vsel %vm5894_vm7, %v5310_v25, %v845_v2  ;;  %v929_v17 = vpop.permute.xlu0 %928 }
 0x236   :  { %860 = vst [vmem:[#allocation2 + $0x180] sm:$0xcc] %v846_v60  ;;  %v1004_v7 = vsel %vm195_vm0, %v989_v11, %v990_v4  ;;  %v937_v51 = vrot.slane %v929_v17, 4  ;;  %3440 = vmatmul.mubr.msk.bf16.gmra.mrb[20].mxu1 %vm462_vm6, %v5549_v15 }
 0x237   :  { %v1005_v52 = vsel %vm5895_vm8, %v5366_v37, %v1004_v7  ;;  %v1097_v18 = vpop.permute.xlu1 %1096  ;;  %2568 = vmatprep.mubr.bf16.mxu1 %v3961_v6 }
 0x238   :  { %1019 = vst [vmem:[#allocation2 + $0x1f0] sm:$0x33] %v1005_v52  ;;  %v951_v25 = vsel %vm195_vm0, %v5896_v46, %v937_v51  ;;  %v1105_v28 = vrot.slane %v1097_v18, 4 }
 0x239   :  { %v952_v42 = vsel %vm5897_vm9, %v5325_v33, %v951_v25  ;;  %v1035_v11 = vpop.permute.xlu0 %1034  ;;  %v3671_v13 = vld [vmem:[#allocation2 + $0x110] ss:$56 sps:$4 sm:$0xff]   ;;  %v3673_v3 = vld [vmem:[#allocation2 + $0x114] ss:$56 sps:$4 sm:$0xff]   ;;  %v5610_v45 = vpop.f32.mrb[4].mxu1 }
 0x23a   :  { %966 = vst [vmem:[#allocation2 + $0x1b8] sm:$0xcc] %v952_v42  ;;  %v1119_v37 = vsel %vm195_vm0, %v1104_v57, %v1105_v28  ;;  %v1043_v62 = vrot.slane %v1035_v11, 4  ;;  %2530 = vmatprep.subr.bf16.mxu0 %v3673_v3  ;;  %3489 = vmatprep.subr.bf16.mxu1 %v3673_v3  ;;  %v5615_v43 = vpop.f32.mrb[5].mxu1 }
 0x23b   :  { %v1120_v20 = vsel %vm5898_vm11, %v5380_v22, %v1119_v37  ;;  %v1211_v10 = vpop.permute.xlu1 %1210  ;;  %2531 = vmatpush1.bf16.msra.mxu0 %v3671_v13  ;;  %3496 = vmatpush1.bf16.msra.mxu1 %v3671_v13  ;;  %v2319_v22 = vpop.f32.mrb[6].mxu1 }
 0x23c   :  { %1134 = vst [vmem:[#allocation2 + $0x228] sm:$0x33] %v1120_v20  ;;  %v1057_v33 = vsel %vm195_vm0, %v1042_v36, %v1043_v62  ;;  %v1219_v6 = vrot.slane %v1211_v10, 4  ;;  %v2320_v29 = vpop.f32.mrb[7].mxu1 }
 0x23d   :  { %v1058_v57 = vsel %vm5899_vm10, %v5358_v9, %v1057_v33  ;;  %v1158_v38 = vpop.permute.xlu0 %1157 }
 0x23e   :  { %1072 = vst [vmem:[#allocation2 + $0x1f0] sm:$0xcc] %v1058_v57  ;;  %v1233_v55 = vsel %vm195_vm0, %v1218_v41, %v1219_v6  ;;  %v1166_v35 = vrot.slane %v1158_v38, 4 }
 0x23f   :  { %v1234_v36 = vsel %vm5900_vm1, %v5414_v30, %v1233_v55  ;;  %v1317_v54 = vpop.permute.xlu1 %1316 }
 0x240   :  { %1248 = vst [vmem:[#allocation2 + $0x260] sm:$0x33] %v1234_v36  ;;  %v1180_v32 = vsel %vm195_vm0, %v5901_v12, %v1166_v35  ;;  %v1325_v63 = vrot.slane %v1317_v54, 4 }
 0x241   :  { %v1181_v9 = vsel %vm5902_vm2, %v5373_v27, %v1180_v32  ;;  %v1264_v48 = vpop.permute.xlu0 %1263  ;;  %v3674_v0 = vld [vmem:[#allocation2 + $0x180] ss:$56 sps:$4 sm:$0xff]   ;;  %v3676_v2 = vld [vmem:[#allocation2 + $0x184] ss:$56 sps:$4 sm:$0xff]  }
 0x242   :  { %1195 = vst [vmem:[#allocation2 + $0x228] sm:$0xcc] %v1181_v9  ;;  %v1339_v41 = vsel %vm195_vm0, %v1324_v34, %v1325_v63  ;;  %v1272_v4 = vrot.slane %v1264_v48, 4  ;;  %2532 = vmatprep.subr.bf16.mxu0 %v3676_v2  ;;  %3490 = vmatprep.subr.bf16.mxu1 %v3676_v2 }
 0x243   :  { %v1340_v30 = vsel %vm5903_vm3, %v5428_v21, %v1339_v41  ;;  %v1423_v60 = vpop.permute.xlu1 %1422  ;;  %2533 = vmatpush1.bf16.msra.mxu0 %v3674_v0  ;;  %3497 = vmatpush1.bf16.msra.mxu1 %v3674_v0 }
 0x244   :  { %1354 = vst [vmem:[#allocation2 + $0x298] sm:$0x33] %v1340_v30  ;;  %v1286_v27 = vsel %vm195_vm0, %v1271_v19, %v1272_v4  ;;  %v1431_v17 = vrot.slane %v1423_v60, 4 }
 0x245   :  { %v1287_v7 = vsel %vm5904_vm4, %v5406_v58, %v1286_v27  ;;  %v1370_v51 = vpop.permute.xlu0 %1369 }
 0x246   :  { %1301 = vst [vmem:[#allocation2 + $0x260] sm:$0xcc] %v1287_v7  ;;  %v1445_v21 = vsel %vm195_vm0, %v1430_v56, %v1431_v17  ;;  %v1378_v34 = vrot.slane %v1370_v51, 4 }
 0x247   :  { %v1446_v52 = vsel %vm1433_vm14, %v5472_v1, %v1445_v21  ;;  %v1529_v18 = vpop.permute.xlu1 %1528 }
 0x248   :  { %1460 = vst [vmem:[#allocation2 + $0x2d0] sm:$0x33] %v1446_v52  ;;  %v1392_v19 = vsel %vm195_vm0, %v1377_v53, %v1378_v34  ;;  %v1537_v46 = vrot.slane %v1529_v18, 4 }
 0x249   :  { %v1393_v58 = vsel %vm5905_vm5, %v5421_v44, %v1392_v19  ;;  %v1476_v25 = vpop.permute.xlu0 %1475  ;;  %v3677_v28 = vld [vmem:[#allocation2 + $0x1f0] ss:$56 sps:$4 sm:$0xff]   ;;  %v3679_v42 = vld [vmem:[#allocation2 + $0x1f4] ss:$56 sps:$4 sm:$0xff]  }
 0x24a   :  { %1407 = vst [vmem:[#allocation2 + $0x298] sm:$0xcc] %v1393_v58  ;;  %v1551_v56 = vsel %vm195_vm0, %v1536_v16, %v1537_v46  ;;  %v1484_v11 = vrot.slane %v1476_v25, 4  ;;  %2534 = vmatprep.subr.bf16.mxu0 %v3679_v42  ;;  %3491 = vmatprep.subr.bf16.mxu1 %v3679_v42 }
 0x24b   :  { %v1552_v1 = vsel %vm1539_vm12, %v5483_v23, %v1551_v56  ;;  %2535 = vmatpush1.bf16.msra.mxu0 %v3677_v28  ;;  %3498 = vmatpush1.bf16.msra.mxu1 %v3677_v28  ;;  %vm3234_vm12 = vcmask 1042434  }
 0x24c   :  { %1566 = vst [vmem:[#allocation2 + $0x308] sm:$0x33] %v1552_v1  ;;  %v1498_v53 = vsel %vm195_vm0, %v1483_v61, %v1484_v11  ;;  %vm3229_vm0 = vcmask 1041409  }
 0x24d   :  { %v1499_v44 = vsel %vm1486_vm15, %v5464_v24, %v1498_v53 }
 0x24e   :  { %1513 = vst [vmem:[#allocation2 + $0x2d0] sm:$0xcc] %v1499_v44 }
 0x251   :  { %v3680_v13 = vld [vmem:[#allocation2 + $0x260] ss:$56 sps:$4 sm:$0xff]   ;;  %v3682_v3 = vld [vmem:[#allocation2 + $0x264] ss:$56 sps:$4 sm:$0xff]  }
 0x252   :  { %2536 = vmatprep.subr.bf16.mxu0 %v3682_v3  ;;  %3492 = vmatprep.subr.bf16.mxu1 %v3682_v3 }
 0x253   :  { %2537 = vmatpush1.bf16.msra.mxu0 %v3680_v13  ;;  %3499 = vmatpush1.bf16.msra.mxu1 %v3680_v13 }
 0x255   :  { %v3683_v23 = vld [vmem:[#allocation2 + $0x2d4] ss:$56 sps:$4 sm:$0x3f]   ;;  %v3685_v16 = vld [vmem:[#allocation2 + $0x2d0] ss:$56 sps:$4 sm:$0x3f]  }
 0x256   :  { %3441 = vmatprep.subr.msk.bf16.mxu0 %vm2177_vm13, %v3683_v23  ;;  %3493 = vmatprep.subr.msk.bf16.mxu1 %vm2177_vm13, %v3683_v23  ;;  %v2215_v61 = vsel %vm2177_vm13, %v3685_v16, 0  ;;  %vm3236_vm13 = vcmask 1046534  }
 0x257   :  { %2539 = vmatpush1.bf16.msra.mxu0 %v2215_v61  ;;  %3500 = vmatpush1.bf16.msra.mxu1 %v2215_v61 }
 0x258   :  { %v5662_v37 = vpop.permute.xlu1 %1673 }
 0x259   :  { %v2255_v24 = vadd.f32 %v5523_v49, %v5662_v37  ;;  %v2257_v62 = vadd.f32 %v5528_v26, %v5662_v37  ;;  %v2306_v20 = vadd.f32 %v5579_v50, %v5662_v37  ;;  %v2308_v33 = vadd.f32 %v5584_v31, %v5662_v37 }
 0x25a   :  { %v5670_v10 = vpop.permute.xlu0 %1678  ;;  %3442 = vmatmul.mubr.msk.bf16.vlgmr.msra.gmra.mrb[24].mxu0 %vm462_vm6, %v5510_v5  ;;  %3443 = vmatmul.mubr.msk.bf16.vlgmr.msra.gmra.mrb[24].mxu1 %vm462_vm6, %v5549_v15  ;;  %vm3231_vm6 = vcmask 1045509  }
 0x25b   :  { %v3444_v6 = vclamps-f32 %v2255_v24, 30.0  ;;  %v3445_v57 = vclamps-f32 %v2257_v62, 30.0  ;;  %v2259_v38 = vadd.f32 %v5532_v59, %v5670_v10  ;;  %v2261_v49 = vadd.f32 %v5537_v8, %v5670_v10 }
 0x25c   :  { %v3446_v26 = vclamps-f32 %v2306_v20, 30.0  ;;  %v5682_v50 = vpop.permute.xlu1 %1683  ;;  %v3447_v22 = vclamps-f32 %v2308_v33, 30.0  ;;  %v2310_v31 = vadd.f32 %v5588_v39, %v5670_v10  ;;  %v2312_v59 = vadd.f32 %v5593_v47, %v5670_v10 }
 0x25d   :  { %v2661_v55 = vsub.f32 0.0, %v3444_v6  ;;  %v2662_v35 = vsub.f32 0.0, %v3445_v57  ;;  %v3458_v29 = vclamps-f32 %v2259_v38, 30.0  ;;  %v2265_v15 = vadd.f32 %v5561_v14, %v5682_v50 }
 0x25e   :  { %v2663_v5 = vsub.f32 0.0, %v3446_v26  ;;  %v2267_v8 = vadd.f32 %v5568_v40, %v5682_v50  ;;  %v2664_v36 = vsub.f32 0.0, %v3447_v22  ;;  %v3459_v63 = vclamps-f32 %v2261_v49, 30.0 }
 0x25f   :  { %v2703_v54 = vmul.f32 1.442695, %v2661_v55  ;;  %v2705_v12 = vmul.f32 1.442695, %v2662_v35  ;;  %v2675_v32 = vsub.f32 0.0, %v3458_v29  ;;  %v3472_v39 = vclamps-f32 %v2265_v15, 30.0 }
 0x260   :  { %v2707_v9 = vmul.f32 1.442695, %v2663_v5  ;;  %v3473_v48 = vclamps-f32 %v2267_v8, 30.0  ;;  %v2709_v2 = vmul.f32 1.442695, %v2664_v36  ;;  %v3460_v41 = vclamps-f32 %v2310_v31, 30.0 }
 0x261   :  { %3686 = vpow2.f32 %v2703_v54  ;;  %v2731_v0 = vmul.f32 1.442695, %v2675_v32  ;;  %v2689_v47 = vsub.f32 0.0, %v3472_v39  ;;  %v3461_v30 = vclamps-f32 %v2312_v59, 30.0 }
 0x262   :  { %3688 = vpow2.f32 %v2705_v12  ;;  %v2690_v4 = vsub.f32 0.0, %v3473_v48  ;;  %v2677_v14 = vsub.f32 0.0, %v3460_v41  ;;  %v2316_v40 = vadd.f32 %v5610_v45, %v5682_v50 }
 0x263   :  { %3690 = vpow2.f32 %v2731_v0  ;;  %v2318_v60 = vadd.f32 %v5615_v43, %v5682_v50  ;;  %v2676_v27 = vsub.f32 0.0, %v3459_v63  ;;  %v2759_v17 = vmul.f32 1.442695, %v2689_v47 }
 0x264   :  { %v2761_v7 = vmul.f32 1.442695, %v2690_v4  ;;  %v2678_v51 = vsub.f32 0.0, %v3461_v30  ;;  %3692 = vpow2.f32 %v2707_v9  ;;  %v2735_v21 = vmul.f32 1.442695, %v2677_v14 }
 0x265   :  { %v3474_v34 = vclamps-f32 %v2316_v40, 30.0  ;;  %v3475_v52 = vclamps-f32 %v2318_v60, 30.0  ;;  %3694 = vpow2.f32 %v2759_v17  ;;  %v2733_v58 = vmul.f32 1.442695, %v2676_v27 }
 0x266   :  { %v2737_v18 = vmul.f32 1.442695, %v2678_v51  ;;  %3696 = vpow2.f32 %v2761_v7 }
 0x267   :  { %v2691_v19 = vsub.f32 0.0, %v3474_v34  ;;  %v2692_v46 = vsub.f32 0.0, %v3475_v52  ;;  %3698 = vpow2.f32 %v2709_v2 }
 0x268   :  { %3700 = vpow2.f32 %v2735_v21 }
 0x269   :  { %v2763_v45 = vmul.f32 1.442695, %v2691_v19  ;;  %v2765_v25 = vmul.f32 1.442695, %v2692_v46  ;;  %3702 = vpow2.f32 %v2737_v18 }
 0x26b   :  { %v3687_v43 = vpop.eup %3686  ;;  %3704 = vpow2.f32 %v2763_v45 }
 0x26c   :  { %v3689_v28 = vpop.eup %3688  ;;  %v2787_v42 = vadd.f32 1.0, %v3687_v43  ;;  %3706 = vpow2.f32 %v2765_v25 }
 0x26d   :  { %v3691_v56 = vpop.eup %3690  ;;  %v2788_v11 = vadd.f32 1.0, %v3689_v28  ;;  %3708 = vpow2.f32 %v2733_v58 }
 0x26e   :  { %3710 = vrcp.f32 %v2787_v42  ;;  %v3693_v1 = vpop.eup %3692  ;;  %v2801_v53 = vadd.f32 1.0, %v3691_v56 }
 0x26f   :  { %3712 = vrcp.f32 %v2788_v11  ;;  %v3695_v44 = vpop.eup %3694  ;;  %v2789_v13 = vadd.f32 1.0, %v3693_v1 }
 0x270   :  { %v3697_v3 = vpop.eup %3696  ;;  %v2815_v23 = vadd.f32 1.0, %v3695_v44  ;;  %3714 = vrcp.f32 %v2801_v53 }
 0x271   :  { %v3699_v16 = vpop.eup %3698  ;;  %3716 = vrcp.f32 %v2789_v13  ;;  %v2816_v61 = vadd.f32 1.0, %v3697_v3 }
 0x272   :  { %v3701_v24 = vpop.eup %3700  ;;  %3718 = vrcp.f32 %v2815_v23  ;;  %v2790_v62 = vadd.f32 1.0, %v3699_v16 }
 0x273   :  { %v3703_v20 = vpop.eup %3702  ;;  %3720 = vrcp.f32 %v2816_v61  ;;  %v2803_v33 = vadd.f32 1.0, %v3701_v24 }
 0x274   :  { %3722 = vrcp.f32 %v2790_v62  ;;  %v2804_v57 = vadd.f32 1.0, %v3703_v20 }
 0x275   :  { %v3705_v6 = vpop.eup %3704  ;;  %3724 = vrcp.f32 %v2803_v33 }
 0x276   :  { %v3707_v38 = vpop.eup %3706  ;;  %v2817_v49 = vadd.f32 1.0, %v3705_v6  ;;  %3726 = vrcp.f32 %v2804_v57 }
 0x277   :  { %v3709_v26 = vpop.eup %3708  ;;  %v2818_v35 = vadd.f32 1.0, %v3707_v38 }
 0x278   :  { %v3711_v22 = vpop.eup %3710  ;;  %3728 = vrcp.f32 %v2817_v49  ;;  %v2802_v15 = vadd.f32 1.0, %v3709_v26 }
 0x279   :  { %v3713_v31 = vpop.eup %3712  ;;  %v2871_v55 = vrot.slane %v3711_v22, 4  ;;  %3730 = vrcp.f32 %v2818_v35 }
 0x27a   :  { %v2877_v29 = vrot.slane %v3713_v31, 4  ;;  %v3715_v59 = vpop.eup %3714  ;;  %3732 = vrcp.f32 %v2802_v15 }
 0x27b   :  { %v2872_v5 = vadd.f32 %v3711_v22, %v2871_v55  ;;  %v3717_v8 = vpop.eup %3716  ;;  %v2955_v54 = vrot.slane %v3715_v59, 4 }
 0x27c   :  { %v2878_v36 = vadd.f32 %v3713_v31, %v2877_v29  ;;  %v3719_v12 = vpop.eup %3718  ;;  %v2883_v63 = vrot.slane %v3717_v8, 4 }
 0x27d   :  { %v2873_v32 = vrot.slane %v2872_v5, 2  ;;  %v3721_v9 = vpop.eup %3720  ;;  %v3039_v48 = vrot.slane %v3719_v12, 4  ;;  %v2956_v0 = vadd.f32 %v3715_v59, %v2955_v54 }
 0x27e   :  { %v2879_v39 = vrot.slane %v2878_v36, 2  ;;  %v3723_v2 = vpop.eup %3722  ;;  %v2884_v47 = vadd.f32 %v3717_v8, %v2883_v63  ;;  %v3045_v4 = vrot.slane %v3721_v9, 4 }
 0x27f   :  { %v2874_v41 = vadd.f32 %v2873_v32, %v2872_v5  ;;  %v3725_v30 = vpop.eup %3724  ;;  %v3040_v40 = vadd.f32 %v3719_v12, %v3039_v48  ;;  %v2889_v60 = vrot.slane %v3723_v2, 4  ;;  %v2957_v27 = vrot.slane %v2956_v0, 2 }
 0x280   :  { %v2880_v14 = vadd.f32 %v2879_v39, %v2878_v36  ;;  %v3727_v17 = vpop.eup %3726  ;;  %v2885_v51 = vrot.slane %v2884_v47, 2  ;;  %v3046_v21 = vadd.f32 %v3721_v9, %v3045_v4  ;;  %v2967_v34 = vrot.slane %v3725_v30, 4 }
 0x281   :  { %v2875_v7 = vrot.slane %v2874_v41, 1  ;;  %v3041_v18 = vrot.slane %v3040_v40, 2  ;;  %v2890_v19 = vadd.f32 %v3723_v2, %v2889_v60  ;;  %v2973_v46 = vrot.slane %v3727_v17, 4 }
 0x282   :  { %v2881_v52 = vrot.slane %v2880_v14, 1  ;;  %v2886_v45 = vadd.f32 %v2885_v51, %v2884_v47  ;;  %v3047_v25 = vrot.slane %v3046_v21, 2  ;;  %v2968_v43 = vadd.f32 %v3725_v30, %v2967_v34  ;;  %v3729_v28 = vpop.eup %3728 }
 0x283   :  { %v2876_v58 = vadd.f32 %v2875_v7, %v2874_v41  ;;  %v3042_v56 = vadd.f32 %v3041_v18, %v3040_v40  ;;  %v2891_v11 = vrot.slane %v2890_v19, 2  ;;  %v2974_v1 = vadd.f32 %v3727_v17, %v2973_v46  ;;  %v3731_v62 = vpop.eup %3730 }
 0x284   :  { %v2882_v42 = vadd.f32 %v2881_v52, %v2880_v14  ;;  %v2887_v44 = vrot.slane %v2886_v45, 1  ;;  %v3048_v13 = vadd.f32 %v3047_v25, %v3046_v21  ;;  %v2969_v3 = vrot.slane %v2968_v43, 2  ;;  %v3733_v31 = vpop.eup %3732 }
 0x285   :  { %v5696_v53 = vmul.f32 0.125, %v2876_v58  ;;  %v3043_v16 = vrot.slane %v3042_v56, 1  ;;  %v2892_v61 = vadd.f32 %v2891_v11, %v2890_v19  ;;  %v2975_v24 = vrot.slane %v2974_v1, 2 }
 0x286   :  { %v5698_v23 = vmul.f32 0.125, %v2882_v42  ;;  %v2888_v20 = vadd.f32 %v2887_v44, %v2886_v45  ;;  %v3049_v33 = vrot.slane %v3048_v13, 1  ;;  %v2970_v6 = vadd.f32 %v2969_v3, %v2968_v43 }
 0x287   :  { %v3051_v57 = vrot.slane %v3729_v28, 4  ;;  %v3044_v49 = vadd.f32 %v3043_v16, %v3042_v56  ;;  %v2893_v26 = vrot.slane %v2892_v61, 1  ;;  %v2976_v22 = vadd.f32 %v2975_v24, %v2974_v1 }
 0x288   :  { %v3207_v38 = vcombine.low %v5696_v53, %v5698_v23  ;;  %v3125_v55 = vmul.f32 0.125, %v2888_v20  ;;  %v3050_v35 = vadd.f32 %v3049_v33, %v3048_v13  ;;  %v2971_v29 = vrot.slane %v2970_v6, 1 }
 0x289   :  { %v3052_v59 = vadd.f32 %v3729_v28, %v3051_v57  ;;  %v5702_v5 = vmul.f32 0.125, %v3044_v49  ;;  %v2894_v15 = vadd.f32 %v2893_v26, %v2892_v61  ;;  %v2977_v8 = vrot.slane %v2976_v22, 1 }
 0x28a   :  { %v3057_v36 = vrot.slane %v3731_v62, 4  ;;  %v5704_v54 = vmul.f32 0.125, %v3050_v35  ;;  %v2972_v12 = vadd.f32 %v2971_v29, %v2970_v6  ;;  %v2958_v63 = vadd.f32 %v2957_v27, %v2956_v0 }
 0x28b   :  { %v3053_v32 = vrot.slane %v3052_v59, 2  ;;  %v3126_v9 = vmul.f32 0.125, %v2894_v15  ;;  %v2978_v39 = vadd.f32 %v2977_v8, %v2976_v22  ;;  %v2961_v2 = vrot.slane %v3733_v31, 4 }
 0x28c   :  { %v3058_v48 = vadd.f32 %v3731_v62, %v3057_v36  ;;  %v3221_v41 = vcombine.low %v5702_v5, %v5704_v54  ;;  %v3139_v47 = vmul.f32 0.125, %v2972_v12  ;;  %v2959_v30 = vrot.slane %v2958_v63, 1 }
 0x28d   :  { %v3054_v4 = vadd.f32 %v3053_v32, %v3052_v59  ;;  %v3208_v14 = vcombine.low %v3125_v55, %v3126_v9  ;;  %v3140_v40 = vmul.f32 0.125, %v2978_v39  ;;  %v2962_v17 = vadd.f32 %v3733_v31, %v2961_v2  ;;  %v2356_v51 = vpop.f32.mrb[8].mxu0 }
 0x28e   :  { %v3059_v60 = vrot.slane %v3058_v48, 2  ;;  %v2960_v21 = vadd.f32 %v2959_v30, %v2958_v63  ;;  %v2357_v0 = vadd.f32 %v2356_v51, %v5662_v37  ;;  %v2358_v27 = vpop.f32.mrb[9].mxu0  ;;  %v3233_v32 = vrot.slane %v3221_v41, 6 }
 0x28f   :  { %v3055_v7 = vrot.slane %v3054_v4, 1  ;;  %v3215_v34 = vcombine.low %v3139_v47, %v3140_v40  ;;  %v2963_v18 = vrot.slane %v2962_v17, 2  ;;  %v2359_v46 = vadd.f32 %v2358_v27, %v5662_v37  ;;  %v2360_v58 = vpop.f32.mrb[10].mxu0 }
 0x290   :  { %v3060_v52 = vadd.f32 %v3059_v60, %v3058_v48  ;;  %v3448_v43 = vclamps-f32 %v2357_v0, 30.0  ;;  %v2361_v28 = vadd.f32 %v2360_v58, %v5670_v10  ;;  %v2362_v42 = vpop.f32.mrb[11].mxu0  ;;  %v3137_v44 = vmul.f32 0.125, %v2960_v21 }
 0x291   :  { %v3056_v19 = vadd.f32 %v3055_v7, %v3054_v4  ;;  %v3238_v45 = vrot.slane %v3215_v34, 7  ;;  %v3449_v56 = vclamps-f32 %v2359_v46, 30.0  ;;  %v2363_v11 = vadd.f32 %v2362_v42, %v5670_v10 }
 0x292   :  { %v3061_v25 = vrot.slane %v3060_v52, 1  ;;  %v2964_v1 = vadd.f32 %v2963_v18, %v2962_v17  ;;  %v2665_v16 = vsub.f32 0.0, %v3448_v43  ;;  %v3462_v61 = vclamps-f32 %v2361_v28, 30.0 }
 0x293   :  { %v3153_v13 = vmul.f32 0.125, %v3056_v19  ;;  %v2666_v24 = vsub.f32 0.0, %v3449_v56  ;;  %v3463_v62 = vclamps-f32 %v2363_v11, 30.0  ;;  %v3239_v49 = vsel %vm3229_vm0, %v3238_v45, %v3208_v14 }
 0x294   :  { %v3062_v3 = vadd.f32 %v3061_v25, %v3060_v52  ;;  %v2965_v20 = vrot.slane %v2964_v1, 1  ;;  %v2711_v6 = vmul.f32 1.442695, %v2665_v16  ;;  %v2679_v57 = vsub.f32 0.0, %v3462_v61 }
 0x295   :  { %v2713_v26 = vmul.f32 1.442695, %v2666_v24  ;;  %v2680_v22 = vsub.f32 0.0, %v3463_v62  ;;  %v2366_v31 = vpop.f32.mrb[12].mxu0  ;;  %v3240_v35 = vsel %vm3231_vm6, %v3238_v45, %v3239_v49 }
 0x296   :  { %v3154_v33 = vmul.f32 0.125, %v3062_v3  ;;  %v2966_v55 = vadd.f32 %v2965_v20, %v2964_v1  ;;  %3734 = vpow2.f32 %v2711_v6  ;;  %v2739_v59 = vmul.f32 1.442695, %v2679_v57  ;;  %v2368_v15 = vpop.f32.mrb[13].mxu0 }
 0x297   :  { %v2367_v5 = vadd.f32 %v2366_v31, %v5682_v50  ;;  %3736 = vpow2.f32 %v2713_v26  ;;  %v2741_v8 = vmul.f32 1.442695, %v2680_v22  ;;  %v2369_v36 = vadd.f32 %v2368_v15, %v5682_v50  ;;  %v2370_v54 = vpop.f32.mrb[14].mxu0 }
 0x298   :  { %v3222_v29 = vcombine.low %v3153_v13, %v3154_v33  ;;  %v3138_v12 = vmul.f32 0.125, %v2966_v55  ;;  %3738 = vpow2.f32 %v2739_v59  ;;  %v2371_v39 = vpop.f32.mrb[15].mxu0 }
 0x299   :  { %v3476_v9 = vclamps-f32 %v2367_v5, 30.0  ;;  %3740 = vpow2.f32 %v2741_v8  ;;  %v2407_v48 = vpop.f32.mrb[8].mxu1  ;;  %v3477_v2 = vclamps-f32 %v2369_v36, 30.0 }
 0x29a   :  { %v3241_v63 = vrot.slane %v3222_v29, 6  ;;  %v3214_v47 = vcombine.low %v3137_v44, %v3138_v12  ;;  %v2408_v30 = vadd.f32 %v2407_v48, %v5662_v37  ;;  %v2409_v14 = vpop.f32.mrb[9].mxu1 }
 0x29b   :  { %v2693_v4 = vsub.f32 0.0, %v3476_v9  ;;  %v2694_v60 = vsub.f32 0.0, %v3477_v2  ;;  %v2410_v17 = vadd.f32 %v2409_v14, %v5662_v37  ;;  %v2411_v41 = vpop.f32.mrb[10].mxu1 }
 0x29c   :  { %v3242_v40 = vsel %vm3234_vm12, %v3241_v63, %v3240_v35  ;;  %v3228_v7 = vrot.slane %v3214_v47, 7  ;;  %v3450_v34 = vclamps-f32 %v2408_v30, 30.0  ;;  %v2412_v52 = vadd.f32 %v2411_v41, %v5670_v10  ;;  %v2413_v0 = vpop.f32.mrb[11].mxu1 }
 0x29d   :  { %v3243_v51 = vsel %vm3236_vm13, %v3241_v63, %v3242_v40  ;;  %v2767_v21 = vmul.f32 1.442695, %v2693_v4  ;;  %v2769_v27 = vmul.f32 1.442695, %v2694_v60  ;;  %v3451_v18 = vclamps-f32 %v2410_v17, 30.0 }
 0x29e   :  { %3282 = vst [vmem:[#allocation8 + $0x8] sm:$0x77] %v3243_v51  ;;  %v2414_v19 = vadd.f32 %v2413_v0, %v5670_v10  ;;  %v3230_v46 = vsel %vm3229_vm0, %v3228_v7, %v3207_v38  ;;  %v2667_v58 = vsub.f32 0.0, %v3450_v34  ;;  %v3464_v45 = vclamps-f32 %v2412_v52, 30.0 }
 0x29f   :  { %3742 = vpow2.f32 %v2767_v21  ;;  %v3232_v25 = vsel %vm3231_vm6, %v3228_v7, %v3230_v46  ;;  %v2668_v43 = vsub.f32 0.0, %v3451_v18 }
 0x2a0   :  { %3744 = vpow2.f32 %v2769_v27  ;;  %v3465_v28 = vclamps-f32 %v2414_v19, 30.0  ;;  %v3235_v42 = vsel %vm3234_vm12, %v3233_v32, %v3232_v25  ;;  %v3735_v56 = vpop.eup %3734  ;;  %v2715_v11 = vmul.f32 1.442695, %v2667_v58 }
 0x2a1   :  { %v2681_v1 = vsub.f32 0.0, %v3464_v45  ;;  %v3237_v44 = vsel %vm3236_vm13, %v3233_v32, %v3235_v42  ;;  %v3737_v13 = vpop.eup %3736  ;;  %v2791_v3 = vadd.f32 1.0, %v3735_v56  ;;  %v2417_v23 = vpop.f32.mrb[12].mxu1  ;;  %v2717_v33 = vmul.f32 1.442695, %v2668_v43 }
 0x2a2   :  { %v2682_v53 = vsub.f32 0.0, %v3465_v28  ;;  %3281 = vst [vmem:[#allocation8] sm:$0x77] %v3237_v44  ;;  %v3739_v38 = vpop.eup %3738  ;;  %v2792_v16 = vadd.f32 1.0, %v3737_v13  ;;  %3746 = vpow2.f32 %v2715_v11  ;;  %v2418_v61 = vadd.f32 %v2417_v23, %v5682_v50  ;;  %v2419_v24 = vpop.f32.mrb[13].mxu1 }
 0x2a3   :  { %v3741_v62 = vpop.eup %3740  ;;  %3748 = vrcp.f32 %v2791_v3  ;;  %v2805_v20 = vadd.f32 1.0, %v3739_v38  ;;  %v2420_v6 = vadd.f32 %v2419_v24, %v5682_v50  ;;  %v2421_v57 = vpop.f32.mrb[14].mxu1  ;;  %v2743_v26 = vmul.f32 1.442695, %v2681_v1 }
 0x2a4   :  { %3750 = vrcp.f32 %v2792_v16  ;;  %v2806_v49 = vadd.f32 1.0, %v3741_v62  ;;  %v3478_v22 = vclamps-f32 %v2418_v61, 30.0  ;;  %v2422_v31 = vpop.f32.mrb[15].mxu1  ;;  %v2745_v55 = vmul.f32 1.442695, %v2682_v53 }
 0x2a5   :  { %3752 = vrcp.f32 %v2805_v20  ;;  %v3479_v35 = vclamps-f32 %v2420_v6, 30.0 }
 0x2a6   :  { %3754 = vrcp.f32 %v2806_v49  ;;  %v2695_v29 = vsub.f32 0.0, %v3478_v22 }
 0x2a7   :  { %3756 = vpow2.f32 %v2717_v33  ;;  %v2696_v59 = vsub.f32 0.0, %v3479_v35 }
 0x2a8   :  { %3758 = vpow2.f32 %v2743_v26  ;;  %v2771_v15 = vmul.f32 1.442695, %v2695_v29 }
 0x2a9   :  { %v3743_v5 = vpop.eup %3742  ;;  %3760 = vpow2.f32 %v2745_v55  ;;  %v2773_v54 = vmul.f32 1.442695, %v2696_v59 }
 0x2aa   :  { %v3745_v8 = vpop.eup %3744  ;;  %v2819_v36 = vadd.f32 1.0, %v3743_v5  ;;  %3762 = vpow2.f32 %v2771_v15 }
 0x2ab   :  { %v2820_v12 = vadd.f32 1.0, %v3745_v8 }
 0x2ac   :  { %3764 = vrcp.f32 %v2819_v36  ;;  %v3747_v32 = vpop.eup %3746 }
 0x2ad   :  { %3766 = vrcp.f32 %v2820_v12  ;;  %v3749_v63 = vpop.eup %3748  ;;  %v2793_v9 = vadd.f32 1.0, %v3747_v32 }
 0x2ae   :  { %3768 = vpow2.f32 %v2773_v54  ;;  %v3751_v39 = vpop.eup %3750  ;;  %v2895_v48 = vrot.slane %v3749_v63, 4 }
 0x2af   :  { %v3753_v2 = vpop.eup %3752  ;;  %v2901_v47 = vrot.slane %v3751_v39, 4  ;;  %3770 = vrcp.f32 %v2793_v9 }
 0x2b0   :  { %v3755_v4 = vpop.eup %3754  ;;  %v2896_v30 = vadd.f32 %v3749_v63, %v2895_v48  ;;  %v2979_v14 = vrot.slane %v3753_v2, 4 }
 0x2b1   :  { %v3757_v40 = vpop.eup %3756  ;;  %v2902_v60 = vadd.f32 %v3751_v39, %v2901_v47  ;;  %v2985_v17 = vrot.slane %v3755_v4, 4 }
 0x2b2   :  { %v3759_v41 = vpop.eup %3758  ;;  %v2897_v7 = vrot.slane %v2896_v30, 2  ;;  %v2980_v51 = vadd.f32 %v3753_v2, %v2979_v14  ;;  %v2794_v21 = vadd.f32 1.0, %v3757_v40 }
 0x2b3   :  { %v3761_v34 = vpop.eup %3760  ;;  %v2903_v52 = vrot.slane %v2902_v60, 2  ;;  %v2986_v0 = vadd.f32 %v3755_v4, %v2985_v17  ;;  %v2807_v27 = vadd.f32 1.0, %v3759_v41 }
 0x2b4   :  { %v3763_v18 = vpop.eup %3762  ;;  %v2898_v19 = vadd.f32 %v2897_v7, %v2896_v30  ;;  %v2981_v46 = vrot.slane %v2980_v51, 2  ;;  %3772 = vrcp.f32 %v2794_v21  ;;  %v2808_v58 = vadd.f32 1.0, %v3761_v34 }
 0x2b5   :  { %v2904_v25 = vadd.f32 %v2903_v52, %v2902_v60  ;;  %v2987_v43 = vrot.slane %v2986_v0, 2  ;;  %3774 = vrcp.f32 %v2807_v27  ;;  %v2821_v28 = vadd.f32 1.0, %v3763_v18 }
 0x2b6   :  { %v3765_v45 = vpop.eup %3764  ;;  %v2899_v56 = vrot.slane %v2898_v19, 1  ;;  %v2982_v11 = vadd.f32 %v2981_v46, %v2980_v51  ;;  %3776 = vrcp.f32 %v2808_v58 }
 0x2b7   :  { %v3767_v42 = vpop.eup %3766  ;;  %v3063_v1 = vrot.slane %v3765_v45, 4  ;;  %v2905_v13 = vrot.slane %v2904_v25, 1  ;;  %v2988_v3 = vadd.f32 %v2987_v43, %v2986_v0  ;;  %3778 = vrcp.f32 %v2821_v28 }
 0x2b8   :  { %v3769_v44 = vpop.eup %3768  ;;  %v3069_v53 = vrot.slane %v3767_v42, 4  ;;  %v2900_v23 = vadd.f32 %v2899_v56, %v2898_v19  ;;  %v2983_v38 = vrot.slane %v2982_v11, 1 }
 0x2b9   :  { %v3064_v16 = vadd.f32 %v3765_v45, %v3063_v1  ;;  %v2822_v61 = vadd.f32 1.0, %v3769_v44  ;;  %v3771_v24 = vpop.eup %3770  ;;  %v2906_v62 = vadd.f32 %v2905_v13, %v2904_v25  ;;  %v2989_v20 = vrot.slane %v2988_v3, 1 }
 0x2ba   :  { %v3070_v33 = vadd.f32 %v3767_v42, %v3069_v53  ;;  %v3127_v6 = vmul.f32 0.125, %v2900_v23  ;;  %v2984_v57 = vadd.f32 %v2983_v38, %v2982_v11  ;;  %v2907_v26 = vrot.slane %v3771_v24, 4 }
 0x2bb   :  { %v3065_v49 = vrot.slane %v3064_v16, 2  ;;  %v3128_v22 = vmul.f32 0.125, %v2906_v62  ;;  %v2990_v31 = vadd.f32 %v2989_v20, %v2988_v3  ;;  %3780 = vrcp.f32 %v2822_v61 }
 0x2bc   :  { %v3071_v55 = vrot.slane %v3070_v33, 2  ;;  %v3141_v35 = vmul.f32 0.125, %v2984_v57  ;;  %v2908_v59 = vadd.f32 %v3771_v24, %v2907_v26 }
 0x2bd   :  { %v3066_v29 = vadd.f32 %v3065_v49, %v3064_v16  ;;  %v3209_v5 = vcombine.low %v3127_v6, %v3128_v22  ;;  %v3142_v15 = vmul.f32 0.125, %v2990_v31 }
 0x2be   :  { %v3072_v8 = vadd.f32 %v3071_v55, %v3070_v33  ;;  %v3773_v36 = vpop.eup %3772  ;;  %v2909_v12 = vrot.slane %v2908_v59, 2 }
 0x2bf   :  { %v3067_v54 = vrot.slane %v3066_v29, 1  ;;  %v3775_v32 = vpop.eup %3774  ;;  %v3216_v63 = vcombine.low %v3141_v35, %v3142_v15  ;;  %v2913_v39 = vrot.slane %v3773_v36, 4 }
 0x2c0   :  { %v3073_v9 = vrot.slane %v3072_v8, 1  ;;  %v3777_v48 = vpop.eup %3776  ;;  %v2910_v47 = vadd.f32 %v2909_v12, %v2908_v59  ;;  %v2991_v4 = vrot.slane %v3775_v32, 4 }
 0x2c1   :  { %v3068_v2 = vadd.f32 %v3067_v54, %v3066_v29  ;;  %v3779_v30 = vpop.eup %3778  ;;  %v3244_v14 = vrot.slane %v3216_v63, 7  ;;  %v2914_v60 = vadd.f32 %v3773_v36, %v2913_v39  ;;  %v2997_v17 = vrot.slane %v3777_v48, 4 }
 0x2c2   :  { %v3074_v40 = vadd.f32 %v3073_v9, %v3072_v8  ;;  %v2911_v7 = vrot.slane %v2910_v47, 1  ;;  %v2992_v51 = vadd.f32 %v3775_v32, %v2991_v4  ;;  %v3075_v21 = vrot.slane %v3779_v30, 4 }
 0x2c3   :  { %v3155_v41 = vmul.f32 0.125, %v3068_v2  ;;  %v2915_v52 = vrot.slane %v2914_v60, 2  ;;  %v2998_v0 = vadd.f32 %v3777_v48, %v2997_v17  ;;  %v3245_v27 = vsel %vm3229_vm0, %v3244_v14, %v3209_v5 }
 0x2c4   :  { %v3156_v34 = vmul.f32 0.125, %v3074_v40  ;;  %v2993_v18 = vrot.slane %v2992_v51, 2  ;;  %v3076_v19 = vadd.f32 %v3779_v30, %v3075_v21  ;;  %v3246_v46 = vsel %vm3231_vm6, %v3244_v14, %v3245_v27 }
 0x2c5   :  { %v3781_v58 = vpop.eup %3780  ;;  %v2912_v45 = vadd.f32 %v2911_v7, %v2910_v47  ;;  %v2916_v43 = vadd.f32 %v2915_v52, %v2914_v60  ;;  %v2999_v28 = vrot.slane %v2998_v0, 2 }
 0x2c6   :  { %v3223_v25 = vcombine.low %v3155_v41, %v3156_v34  ;;  %v2994_v42 = vadd.f32 %v2993_v18, %v2992_v51  ;;  %v3077_v56 = vrot.slane %v3076_v19, 2  ;;  %v3081_v11 = vrot.slane %v3781_v58, 4 }
 0x2c7   :  { %v2917_v44 = vrot.slane %v2916_v43, 1  ;;  %v3000_v13 = vadd.f32 %v2999_v28, %v2998_v0  ;;  %v3129_v38 = vmul.f32 0.125, %v2912_v45 }
 0x2c8   :  { %v3247_v1 = vrot.slane %v3223_v25, 6  ;;  %v2995_v3 = vrot.slane %v2994_v42, 1  ;;  %v3078_v53 = vadd.f32 %v3077_v56, %v3076_v19  ;;  %v3082_v23 = vadd.f32 %v3781_v58, %v3081_v11 }
 0x2c9   :  { %v2918_v16 = vadd.f32 %v2917_v44, %v2916_v43  ;;  %v3001_v61 = vrot.slane %v3000_v13, 1 }
 0x2ca   :  { %v3248_v24 = vsel %vm3234_vm12, %v3247_v1, %v3246_v46  ;;  %v2996_v62 = vadd.f32 %v2995_v3, %v2994_v42  ;;  %v3079_v20 = vrot.slane %v3078_v53, 1  ;;  %v3083_v33 = vrot.slane %v3082_v23, 2 }
 0x2cb   :  { %v3249_v6 = vsel %vm3236_vm13, %v3247_v1, %v3248_v24  ;;  %v3130_v57 = vmul.f32 0.125, %v2918_v16  ;;  %v3002_v49 = vadd.f32 %v3001_v61, %v3000_v13 }
 0x2cc   :  { %3283 = vst [vmem:[#allocation8 + $0x10] sm:$0x77] %v3249_v6  ;;  %v3143_v26 = vmul.f32 0.125, %v2996_v62  ;;  %v3080_v22 = vadd.f32 %v3079_v20, %v3078_v53  ;;  %v3084_v31 = vadd.f32 %v3083_v33, %v3082_v23 }
 0x2cd   :  { %v3210_v55 = vcombine.low %v3129_v38, %v3130_v57  ;;  %v3144_v35 = vmul.f32 0.125, %v3002_v49 }
 0x2ce   :  { %v3085_v29 = vrot.slane %v3084_v31, 1  ;;  %v3157_v5 = vmul.f32 0.125, %v3080_v22 }
 0x2cf   :  { %v3217_v59 = vcombine.low %v3143_v26, %v3144_v35 }
 0x2d0   :  { %v3086_v15 = vadd.f32 %v3085_v29, %v3084_v31 }
 0x2d1   :  { %v3250_v8 = vrot.slane %v3217_v59, 7 }
 0x2d2   :  { %v3158_v36 = vmul.f32 0.125, %v3086_v15 }
 0x2d3   :  { %v3251_v54 = vsel %vm3229_vm0, %v3250_v8, %v3210_v55 }
 0x2d4   :  { %v3224_v12 = vcombine.low %v3157_v5, %v3158_v36  ;;  %v3252_v32 = vsel %vm3231_vm6, %v3250_v8, %v3251_v54 }
 0x2d6   :  { %v3253_v63 = vrot.slane %v3224_v12, 6 }
 0x2d8   :  { %v3254_v9 = vsel %vm3234_vm12, %v3253_v63, %v3252_v32 }
 0x2d9   :  { %v3255_v39 = vsel %vm3236_vm13, %v3253_v63, %v3254_v9 }
 0x2da   :  { %3284 = vst [vmem:[#allocation8 + $0x18] sm:$0x77] %v3255_v39 }
 0x2f5   :  { %v2458_v48 = vpop.f32.mrb[16].mxu0 }
 0x2f6   :  { %v2459_v2 = vadd.f32 %v2458_v48, %v5662_v37  ;;  %v2460_v47 = vpop.f32.mrb[17].mxu0 }
 0x2f7   :  { %v2461_v4 = vadd.f32 %v2460_v47, %v5662_v37  ;;  %v2462_v30 = vpop.f32.mrb[18].mxu0 }
 0x2f8   :  { %v3452_v14 = vclamps-f32 %v2459_v2, 30.0  ;;  %v2463_v40 = vadd.f32 %v2462_v30, %v5670_v10  ;;  %v2464_v60 = vpop.f32.mrb[19].mxu0 }
 0x2f9   :  { %v3453_v17 = vclamps-f32 %v2461_v4, 30.0  ;;  %v2465_v41 = vadd.f32 %v2464_v60, %v5670_v10 }
 0x2fa   :  { %v2669_v7 = vsub.f32 0.0, %v3452_v14  ;;  %v3466_v51 = vclamps-f32 %v2463_v40, 30.0 }
 0x2fb   :  { %v2670_v21 = vsub.f32 0.0, %v3453_v17  ;;  %v3467_v34 = vclamps-f32 %v2465_v41, 30.0 }
 0x2fc   :  { %v2719_v52 = vmul.f32 1.442695, %v2669_v7  ;;  %v2683_v0 = vsub.f32 0.0, %v3466_v51 }
 0x2fd   :  { %v2721_v27 = vmul.f32 1.442695, %v2670_v21  ;;  %v2684_v18 = vsub.f32 0.0, %v3467_v34 }
 0x2fe   :  { %v2468_v19 = vpop.f32.mrb[20].mxu0  ;;  %3782 = vpow2.f32 %v2719_v52  ;;  %v2747_v46 = vmul.f32 1.442695, %v2683_v0 }
 0x2ff   :  { %v2469_v58 = vadd.f32 %v2468_v19, %v5682_v50  ;;  %v2470_v45 = vpop.f32.mrb[21].mxu0  ;;  %3784 = vpow2.f32 %v2721_v27  ;;  %v2749_v25 = vmul.f32 1.442695, %v2684_v18 }
 0x300   :  { %v2471_v43 = vadd.f32 %v2470_v45, %v5682_v50  ;;  %v2472_v28 = vpop.f32.mrb[22].mxu0  ;;  %3786 = vpow2.f32 %v2747_v46 }
 0x301   :  { %v3480_v42 = vclamps-f32 %v2469_v58, 30.0  ;;  %v2473_v56 = vpop.f32.mrb[23].mxu0  ;;  %3788 = vpow2.f32 %v2749_v25  ;;  %v2509_v11 = vpop.f32.mrb[16].mxu1 }
 0x302   :  { %v3481_v1 = vclamps-f32 %v2471_v43, 30.0  ;;  %v2510_v13 = vadd.f32 %v2509_v11, %v5662_v37  ;;  %v2511_v3 = vpop.f32.mrb[17].mxu1 }
 0x303   :  { %v2697_v44 = vsub.f32 0.0, %v3480_v42  ;;  %v2512_v23 = vadd.f32 %v2511_v3, %v5662_v37  ;;  %v2513_v38 = vpop.f32.mrb[18].mxu1 }
 0x304   :  { %v2698_v53 = vsub.f32 0.0, %v3481_v1  ;;  %v3454_v61 = vclamps-f32 %v2510_v13, 30.0  ;;  %v2514_v24 = vadd.f32 %v2513_v38, %v5670_v10  ;;  %v2515_v62 = vpop.f32.mrb[19].mxu1 }
 0x305   :  { %v2775_v16 = vmul.f32 1.442695, %v2697_v44  ;;  %v3455_v33 = vclamps-f32 %v2512_v23, 30.0  ;;  %v2516_v6 = vadd.f32 %v2515_v62, %v5670_v10 }
 0x306   :  { %v2777_v20 = vmul.f32 1.442695, %v2698_v53  ;;  %v2671_v57 = vsub.f32 0.0, %v3454_v61  ;;  %v3468_v49 = vclamps-f32 %v2514_v24, 30.0 }
 0x307   :  { %3790 = vpow2.f32 %v2775_v16  ;;  %v2672_v26 = vsub.f32 0.0, %v3455_v33  ;;  %v3469_v22 = vclamps-f32 %v2516_v6, 30.0 }
 0x308   :  { %3792 = vpow2.f32 %v2777_v20  ;;  %v3783_v31 = vpop.eup %3782  ;;  %v2723_v55 = vmul.f32 1.442695, %v2671_v57  ;;  %v2685_v35 = vsub.f32 0.0, %v3468_v49 }
 0x309   :  { %v3785_v29 = vpop.eup %3784  ;;  %v2795_v59 = vadd.f32 1.0, %v3783_v31  ;;  %v2686_v5 = vsub.f32 0.0, %v3469_v22  ;;  %v2519_v15 = vpop.f32.mrb[20].mxu1  ;;  %v2725_v9 = vmul.f32 1.442695, %v2672_v26 }
 0x30a   :  { %v3787_v8 = vpop.eup %3786  ;;  %v2796_v36 = vadd.f32 1.0, %v3785_v29  ;;  %3794 = vpow2.f32 %v2723_v55  ;;  %v2520_v54 = vadd.f32 %v2519_v15, %v5682_v50  ;;  %v2521_v12 = vpop.f32.mrb[21].mxu1  ;;  %v2751_v47 = vmul.f32 1.442695, %v2685_v35 }
 0x30b   :  { %v3789_v32 = vpop.eup %3788  ;;  %3796 = vrcp.f32 %v2795_v59  ;;  %v2809_v63 = vadd.f32 1.0, %v3787_v8  ;;  %v2522_v39 = vadd.f32 %v2521_v12, %v5682_v50  ;;  %v2523_v48 = vpop.f32.mrb[22].mxu1  ;;  %v2753_v14 = vmul.f32 1.442695, %v2686_v5 }
 0x30c   :  { %3798 = vrcp.f32 %v2796_v36  ;;  %v2810_v2 = vadd.f32 1.0, %v3789_v32  ;;  %v3482_v4 = vclamps-f32 %v2520_v54, 30.0  ;;  %v2524_v30 = vpop.f32.mrb[23].mxu1 }
 0x30d   :  { %3800 = vrcp.f32 %v2809_v63  ;;  %v3483_v40 = vclamps-f32 %v2522_v39, 30.0 }
 0x30e   :  { %3802 = vrcp.f32 %v2810_v2  ;;  %v2699_v60 = vsub.f32 0.0, %v3482_v4 }
 0x30f   :  { %3804 = vpow2.f32 %v2725_v9  ;;  %v2700_v17 = vsub.f32 0.0, %v3483_v40 }
 0x310   :  { %3806 = vpow2.f32 %v2751_v47  ;;  %v2779_v7 = vmul.f32 1.442695, %v2699_v60 }
 0x311   :  { %v3791_v41 = vpop.eup %3790  ;;  %3808 = vpow2.f32 %v2753_v14  ;;  %v2781_v34 = vmul.f32 1.442695, %v2700_v17 }
 0x312   :  { %v3793_v51 = vpop.eup %3792  ;;  %v2823_v21 = vadd.f32 1.0, %v3791_v41  ;;  %3810 = vpow2.f32 %v2779_v7 }
 0x313   :  { %v2824_v52 = vadd.f32 1.0, %v3793_v51 }
 0x314   :  { %3812 = vrcp.f32 %v2823_v21  ;;  %v3795_v0 = vpop.eup %3794 }
 0x315   :  { %3814 = vrcp.f32 %v2824_v52  ;;  %v3797_v27 = vpop.eup %3796  ;;  %v2797_v18 = vadd.f32 1.0, %v3795_v0 }
 0x316   :  { %3816 = vpow2.f32 %v2781_v34  ;;  %v3799_v19 = vpop.eup %3798  ;;  %v2919_v46 = vrot.slane %v3797_v27, 4 }
 0x317   :  { %v3801_v58 = vpop.eup %3800  ;;  %v2925_v45 = vrot.slane %v3799_v19, 4  ;;  %3818 = vrcp.f32 %v2797_v18 }
 0x318   :  { %v3803_v25 = vpop.eup %3802  ;;  %v2920_v43 = vadd.f32 %v3797_v27, %v2919_v46  ;;  %v3003_v28 = vrot.slane %v3801_v58, 4 }
 0x319   :  { %v3805_v42 = vpop.eup %3804  ;;  %v2926_v56 = vadd.f32 %v3799_v19, %v2925_v45  ;;  %v3009_v11 = vrot.slane %v3803_v25, 4 }
 0x31a   :  { %v3807_v1 = vpop.eup %3806  ;;  %v2921_v44 = vrot.slane %v2920_v43, 2  ;;  %v3004_v13 = vadd.f32 %v3801_v58, %v3003_v28  ;;  %v2798_v3 = vadd.f32 1.0, %v3805_v42 }
 0x31b   :  { %v3809_v53 = vpop.eup %3808  ;;  %v2927_v23 = vrot.slane %v2926_v56, 2  ;;  %v3010_v38 = vadd.f32 %v3803_v25, %v3009_v11  ;;  %v2811_v16 = vadd.f32 1.0, %v3807_v1 }
 0x31c   :  { %v3811_v61 = vpop.eup %3810  ;;  %v2922_v24 = vadd.f32 %v2921_v44, %v2920_v43  ;;  %v3005_v62 = vrot.slane %v3004_v13, 2  ;;  %3820 = vrcp.f32 %v2798_v3  ;;  %v2812_v20 = vadd.f32 1.0, %v3809_v53 }
 0x31d   :  { %v2928_v6 = vadd.f32 %v2927_v23, %v2926_v56  ;;  %v3011_v57 = vrot.slane %v3010_v38, 2  ;;  %3822 = vrcp.f32 %v2811_v16  ;;  %v2825_v49 = vadd.f32 1.0, %v3811_v61 }
 0x31e   :  { %v3813_v33 = vpop.eup %3812  ;;  %v2923_v22 = vrot.slane %v2922_v24, 1  ;;  %v3006_v31 = vadd.f32 %v3005_v62, %v3004_v13  ;;  %3824 = vrcp.f32 %v2812_v20 }
 0x31f   :  { %v3815_v26 = vpop.eup %3814  ;;  %v3087_v55 = vrot.slane %v3813_v33, 4  ;;  %v2929_v29 = vrot.slane %v2928_v6, 1  ;;  %v3012_v59 = vadd.f32 %v3011_v57, %v3010_v38  ;;  %3826 = vrcp.f32 %v2825_v49 }
 0x320   :  { %v3817_v35 = vpop.eup %3816  ;;  %v3093_v5 = vrot.slane %v3815_v26, 4  ;;  %v2924_v15 = vadd.f32 %v2923_v22, %v2922_v24  ;;  %v3007_v8 = vrot.slane %v3006_v31, 1 }
 0x321   :  { %v3088_v36 = vadd.f32 %v3813_v33, %v3087_v55  ;;  %v2826_v54 = vadd.f32 1.0, %v3817_v35  ;;  %v3819_v12 = vpop.eup %3818  ;;  %v2930_v32 = vadd.f32 %v2929_v29, %v2928_v6  ;;  %v3013_v63 = vrot.slane %v3012_v59, 1 }
 0x322   :  { %v3094_v9 = vadd.f32 %v3815_v26, %v3093_v5  ;;  %v3131_v39 = vmul.f32 0.125, %v2924_v15  ;;  %v3008_v48 = vadd.f32 %v3007_v8, %v3006_v31  ;;  %v2931_v47 = vrot.slane %v3819_v12, 4 }
 0x323   :  { %v3089_v2 = vrot.slane %v3088_v36, 2  ;;  %v3132_v4 = vmul.f32 0.125, %v2930_v32  ;;  %v3014_v30 = vadd.f32 %v3013_v63, %v3012_v59  ;;  %3828 = vrcp.f32 %v2826_v54 }
 0x324   :  { %v3095_v14 = vrot.slane %v3094_v9, 2  ;;  %v3145_v40 = vmul.f32 0.125, %v3008_v48  ;;  %v2932_v17 = vadd.f32 %v3819_v12, %v2931_v47 }
 0x325   :  { %v3090_v60 = vadd.f32 %v3089_v2, %v3088_v36  ;;  %v3211_v41 = vcombine.low %v3131_v39, %v3132_v4  ;;  %v3146_v7 = vmul.f32 0.125, %v3014_v30 }
 0x326   :  { %v3096_v51 = vadd.f32 %v3095_v14, %v3094_v9  ;;  %v3821_v21 = vpop.eup %3820  ;;  %v2933_v52 = vrot.slane %v2932_v17, 2 }
 0x327   :  { %v3091_v34 = vrot.slane %v3090_v60, 1  ;;  %v3823_v0 = vpop.eup %3822  ;;  %v3218_v27 = vcombine.low %v3145_v40, %v3146_v7  ;;  %v2937_v19 = vrot.slane %v3821_v21, 4 }
 0x328   :  { %v3097_v18 = vrot.slane %v3096_v51, 1  ;;  %v3825_v46 = vpop.eup %3824  ;;  %v2934_v45 = vadd.f32 %v2933_v52, %v2932_v17  ;;  %v3015_v25 = vrot.slane %v3823_v0, 4 }
 0x329   :  { %v3092_v58 = vadd.f32 %v3091_v34, %v3090_v60  ;;  %v3827_v43 = vpop.eup %3826  ;;  %v3256_v28 = vrot.slane %v3218_v27, 7  ;;  %v2938_v56 = vadd.f32 %v3821_v21, %v2937_v19  ;;  %v3021_v11 = vrot.slane %v3825_v46, 4 }
 0x32a   :  { %v3098_v42 = vadd.f32 %v3097_v18, %v3096_v51  ;;  %v2935_v44 = vrot.slane %v2934_v45, 1  ;;  %v3016_v13 = vadd.f32 %v3823_v0, %v3015_v25  ;;  %v3099_v3 = vrot.slane %v3827_v43, 4 }
 0x32b   :  { %v3159_v1 = vmul.f32 0.125, %v3092_v58  ;;  %v2939_v23 = vrot.slane %v2938_v56, 2  ;;  %v3022_v38 = vadd.f32 %v3825_v46, %v3021_v11  ;;  %v3257_v16 = vsel %vm3229_vm0, %v3256_v28, %v3211_v41 }
 0x32c   :  { %v3160_v53 = vmul.f32 0.125, %v3098_v42  ;;  %v2936_v61 = vadd.f32 %v2935_v44, %v2934_v45  ;;  %v3017_v24 = vrot.slane %v3016_v13, 2  ;;  %v3100_v62 = vadd.f32 %v3827_v43, %v3099_v3 }
 0x32d   :  { %v3258_v20 = vsel %vm3231_vm6, %v3256_v28, %v3257_v16  ;;  %v3829_v33 = vpop.eup %3828  ;;  %v2940_v57 = vadd.f32 %v2939_v23, %v2938_v56  ;;  %v3023_v49 = vrot.slane %v3022_v38, 2  ;;  %v2560_v26 = vpop.f32.mrb[24].mxu0 }
 0x32e   :  { %v3225_v6 = vcombine.low %v3159_v1, %v3160_v53  ;;  %v2570_v22 = vpop.f32.mrb[24].mxu1  ;;  %v3133_v31 = vmul.f32 0.125, %v2936_v61  ;;  %v3018_v55 = vadd.f32 %v3017_v24, %v3016_v13  ;;  %v3101_v35 = vrot.slane %v3100_v62, 2  ;;  %v2562_v59 = vpop.f32.mrb[25].mxu0 }
 0x32f   :  { %v3105_v29 = vrot.slane %v3829_v33, 4  ;;  %v2572_v5 = vpop.f32.mrb[25].mxu1  ;;  %v2941_v8 = vrot.slane %v2940_v57, 1  ;;  %v3024_v36 = vadd.f32 %v3023_v49, %v3022_v38  ;;  %v2561_v54 = vadd.f32 %v2560_v26, %v5662_v37  ;;  %v2564_v12 = vpop.f32.mrb[26].mxu0 }
 0x330   :  { %v3259_v15 = vrot.slane %v3225_v6, 6  ;;  %v2574_v32 = vpop.f32.mrb[26].mxu1  ;;  %v3019_v63 = vrot.slane %v3018_v55, 1  ;;  %v3102_v9 = vadd.f32 %v3101_v35, %v3100_v62  ;;  %v2571_v48 = vadd.f32 %v2570_v22, %v5682_v50  ;;  %v2566_v2 = vpop.f32.mrb[27].mxu0 }
 0x331   :  { %v3106_v39 = vadd.f32 %v3829_v33, %v3105_v29  ;;  %v2575_v47 = vpop.f32.mrb[27].mxu1  ;;  %v2942_v4 = vadd.f32 %v2941_v8, %v2940_v57  ;;  %v3025_v30 = vrot.slane %v3024_v36, 1  ;;  %v3456_v14 = vclamps-f32 %v2561_v54, 30.0 }
 0x332   :  { %v2563_v40 = vadd.f32 %v2562_v59, %v5662_v37  ;;  %v3020_v60 = vadd.f32 %v3019_v63, %v3018_v55  ;;  %v3103_v17 = vrot.slane %v3102_v9, 1  ;;  %v3484_v7 = vclamps-f32 %v2571_v48, 30.0 }
 0x333   :  { %v3107_v41 = vrot.slane %v3106_v39, 2  ;;  %v3134_v51 = vmul.f32 0.125, %v2942_v4  ;;  %v3026_v21 = vadd.f32 %v3025_v30, %v3024_v36  ;;  %v2673_v34 = vsub.f32 0.0, %v3456_v14 }
 0x334   :  { %v3457_v52 = vclamps-f32 %v2563_v40, 30.0  ;;  %v3147_v0 = vmul.f32 0.125, %v3020_v60  ;;  %v3104_v27 = vadd.f32 %v3103_v17, %v3102_v9  ;;  %v2701_v19 = vsub.f32 0.0, %v3484_v7 }
 0x335   :  { %v3108_v18 = vadd.f32 %v3107_v41, %v3106_v39  ;;  %v3212_v46 = vcombine.low %v3133_v31, %v3134_v51  ;;  %v3148_v58 = vmul.f32 0.125, %v3026_v21  ;;  %v2727_v45 = vmul.f32 1.442695, %v2673_v34 }
 0x336   :  { %v2674_v25 = vsub.f32 0.0, %v3457_v52  ;;  %v3161_v43 = vmul.f32 0.125, %v3104_v27  ;;  %v2783_v42 = vmul.f32 1.442695, %v2701_v19  ;;  %v2573_v37 = vadd.f32 %v2572_v5, %v5682_v50 }
 0x337   :  { %v3109_v28 = vrot.slane %v3108_v18, 1  ;;  %v3219_v56 = vcombine.low %v3147_v0, %v3148_v58  ;;  %3830 = vpow2.f32 %v2727_v45  ;;  %v2565_v1 = vadd.f32 %v2564_v12, %v5670_v10 }
 0x338   :  { %v2729_v11 = vmul.f32 1.442695, %v2674_v25  ;;  %3832 = vpow2.f32 %v2783_v42  ;;  %v3485_v13 = vclamps-f32 %v2573_v37, 30.0  ;;  %v2567_v3 = vadd.f32 %v2566_v2, %v5670_v10 }
 0x339   :  { %v3110_v44 = vadd.f32 %v3109_v28, %v3108_v18  ;;  %v3262_v53 = vrot.slane %v3219_v56, 7  ;;  %v3470_v23 = vclamps-f32 %v2565_v1, 30.0  ;;  %v3260_v38 = vsel %vm3234_vm12, %v3259_v15, %v3258_v20 }
 0x33a   :  { %3834 = vpow2.f32 %v2729_v11  ;;  %v2702_v61 = vsub.f32 0.0, %v3485_v13  ;;  %v3471_v24 = vclamps-f32 %v2567_v3, 30.0  ;;  %v3261_v50 = vsel %vm3236_vm13, %v3259_v15, %v3260_v38 }
 0x33b   :  { %v3162_v16 = vmul.f32 0.125, %v3110_v44  ;;  %v2687_v62 = vsub.f32 0.0, %v3470_v23  ;;  %v3263_v33 = vsel %vm3229_vm0, %v3262_v53, %v3212_v46  ;;  %3285 = vst [vmem:[#allocation8 + $0x20] sm:$0x77] %v3261_v50 }
 0x33c   :  { %v2785_v57 = vmul.f32 1.442695, %v2702_v61  ;;  %v2688_v49 = vsub.f32 0.0, %v3471_v24  ;;  %v3264_v26 = vsel %vm3231_vm6, %v3262_v53, %v3263_v33 }
 0x33d   :  { %v3226_v6 = vcombine.low %v3161_v43, %v3162_v16  ;;  %v2755_v10 = vmul.f32 1.442695, %v2687_v62 }
 0x33e   :  { %3836 = vpow2.f32 %v2785_v57  ;;  %v2757_v31 = vmul.f32 1.442695, %v2688_v49 }
 0x33f   :  { %v3265_v22 = vrot.slane %v3226_v6, 6  ;;  %3838 = vpow2.f32 %v2755_v10 }
 0x340   :  { %3840 = vpow2.f32 %v2757_v31 }
 0x341   :  { %v3266_v20 = vsel %vm3234_vm12, %v3265_v22, %v3264_v26  ;;  %v3831_v55 = vpop.eup %3830 }
 0x342   :  { %v3267_v35 = vsel %vm3236_vm13, %v3265_v22, %v3266_v20  ;;  %v3833_v29 = vpop.eup %3832  ;;  %v2799_v59 = vadd.f32 1.0, %v3831_v55 }
 0x343   :  { %3286 = vst [vmem:[#allocation8 + $0x28] sm:$0x77] %v3267_v35  ;;  %v2827_v15 = vadd.f32 1.0, %v3833_v29 }
 0x344   :  { %v3835_v5 = vpop.eup %3834  ;;  %3842 = vrcp.f32 %v2799_v59 }
 0x345   :  { %v2800_v8 = vadd.f32 1.0, %v3835_v5  ;;  %3844 = vrcp.f32 %v2827_v15 }
 0x347   :  { %3846 = vrcp.f32 %v2800_v8 }
 0x348   :  { %v3837_v36 = vpop.eup %3836 }
 0x349   :  { %v3839_v54 = vpop.eup %3838  ;;  %v2828_v12 = vadd.f32 1.0, %v3837_v36 }
 0x34a   :  { %v3841_v32 = vpop.eup %3840  ;;  %v2813_v63 = vadd.f32 1.0, %v3839_v54 }
 0x34b   :  { %3848 = vrcp.f32 %v2828_v12  ;;  %v2814_v9 = vadd.f32 1.0, %v3841_v32 }
 0x34c   :  { %3850 = vrcp.f32 %v2813_v63 }
 0x34d   :  { %3852 = vrcp.f32 %v2814_v9 }
 0x34e   :  { %v3843_v39 = vpop.eup %3842 }
 0x34f   :  { %v3845_v48 = vpop.eup %3844  ;;  %v2943_v2 = vrot.slane %v3843_v39, 4 }
 0x350   :  { %v3111_v4 = vrot.slane %v3845_v48, 4 }
 0x351   :  { %v3847_v47 = vpop.eup %3846  ;;  %v2944_v30 = vadd.f32 %v3843_v39, %v2943_v2 }
 0x352   :  { %v2949_v14 = vrot.slane %v3847_v47, 4  ;;  %v3112_v40 = vadd.f32 %v3845_v48, %v3111_v4 }
 0x353   :  { %v2945_v60 = vrot.slane %v2944_v30, 2 }
 0x354   :  { %v2950_v17 = vadd.f32 %v3847_v47, %v2949_v14  ;;  %v3113_v41 = vrot.slane %v3112_v40, 2 }
 0x355   :  { %v3849_v7 = vpop.eup %3848  ;;  %v2946_v51 = vadd.f32 %v2945_v60, %v2944_v30 }
 0x356   :  { %v2951_v21 = vrot.slane %v2950_v17, 2  ;;  %v3851_v34 = vpop.eup %3850  ;;  %v3114_v52 = vadd.f32 %v3113_v41, %v3112_v40  ;;  %v3117_v0 = vrot.slane %v3849_v7, 4 }
 0x357   :  { %v3853_v27 = vpop.eup %3852  ;;  %v2947_v18 = vrot.slane %v2946_v51, 1  ;;  %v3027_v46 = vrot.slane %v3851_v34, 4 }
 0x358   :  { %v2952_v19 = vadd.f32 %v2951_v21, %v2950_v17  ;;  %v3115_v58 = vrot.slane %v3114_v52, 1  ;;  %v3118_v45 = vadd.f32 %v3849_v7, %v3117_v0  ;;  %v3033_v25 = vrot.slane %v3853_v27, 4 }
 0x359   :  { %v2948_v43 = vadd.f32 %v2947_v18, %v2946_v51  ;;  %v3028_v42 = vadd.f32 %v3851_v34, %v3027_v46 }
 0x35a   :  { %v2953_v28 = vrot.slane %v2952_v19, 1  ;;  %v3119_v37 = vrot.slane %v3118_v45, 2  ;;  %v3034_v56 = vadd.f32 %v3853_v27, %v3033_v25  ;;  %v3116_v13 = vadd.f32 %v3115_v58, %v3114_v52 }
 0x35b   :  { %v3135_v11 = vmul.f32 0.125, %v2948_v43  ;;  %v3029_v44 = vrot.slane %v3028_v42, 2 }
 0x35c   :  { %v2954_v1 = vadd.f32 %v2953_v28, %v2952_v19  ;;  %v3120_v3 = vadd.f32 %v3119_v37, %v3118_v45  ;;  %v3035_v53 = vrot.slane %v3034_v56, 2  ;;  %v3163_v62 = vmul.f32 0.125, %v3116_v13 }
 0x35d   :  { %v3030_v38 = vadd.f32 %v3029_v44, %v3028_v42 }
 0x35e   :  { %v3136_v23 = vmul.f32 0.125, %v2954_v1  ;;  %v3121_v16 = vrot.slane %v3120_v3, 1  ;;  %v3036_v61 = vadd.f32 %v3035_v53, %v3034_v56 }
 0x35f   :  { %v3031_v50 = vrot.slane %v3030_v38, 1 }
 0x360   :  { %v3213_v24 = vcombine.low %v3135_v11, %v3136_v23  ;;  %v3122_v33 = vadd.f32 %v3121_v16, %v3120_v3  ;;  %v3037_v6 = vrot.slane %v3036_v61, 1 }
 0x361   :  { %v3032_v57 = vadd.f32 %v3031_v50, %v3030_v38 }
 0x362   :  { %v3164_v49 = vmul.f32 0.125, %v3122_v33  ;;  %v3038_v26 = vadd.f32 %v3037_v6, %v3036_v61 }
 0x363   :  { %v3149_v10 = vmul.f32 0.125, %v3032_v57 }
 0x364   :  { %v3227_v22 = vcombine.low %v3163_v62, %v3164_v49  ;;  %v3150_v31 = vmul.f32 0.125, %v3038_v26 }
 0x366   :  { %v3220_v20 = vcombine.low %v3149_v10, %v3150_v31  ;;  %v3271_v35 = vrot.slane %v3227_v22, 6 }
 0x368   :  { %v3268_v55 = vrot.slane %v3220_v20, 7 }
 0x36a   :  { %v3269_v29 = vsel %vm3229_vm0, %v3268_v55, %v3213_v24 }
 0x36b   :  { %v3270_v59 = vsel %vm3231_vm6, %v3268_v55, %v3269_v29 }
 0x36c   :  { %v3272_v5 = vsel %vm3234_vm12, %v3271_v35, %v3270_v59 }
 0x36d   :  { %v3273_v15 = vsel %vm3236_vm13, %v3271_v35, %v3272_v5 }
 0x36e   :  { %3287 = vst [vmem:[#allocation8 + $0x30] sm:$0x77] %v3273_v15 }
 0x36f   :  { %3915 = shalt.err (!%p3912_p12)
}
 0x370   :  { %s3916_s26 = scalar_lea.hbm %s5785_s4, 896 }
 0x371   :  { %p3917_p13 = scmp.ne.s32.totalorder %s5785_s4, %s3916_s26  ;;  %p3920_p0 = scmp.lt.u32.totalorder %s3916_s26, %s5785_s4 }
 0x373   :  { %p3922_p1 = pnand %p3920_p0, %p3917_p13 }
 0x375   :  { %3925 = shalt.err (!%p3922_p1)
}
 0x376   :  { %3297 = dma.vmem_to_hbm [thread:$0]  %s3295_s22, 896, %s5785_s4, [#allocation5]  }
 0x377   :  { %3930 = dma.done.wait [#allocation5], 896  }
 0x378   :  { %3931 = vsyncadd [#allocation5], 4294966400 }
 0x379   :  { %3301 = vsyncpa [#allocation4], 1 }
 0x37a   :  { %3302 = vsyncpa [#allocation7], 1 }
 0x37b   :  { %3303 = vsyncpa [#allocation5], 1 }

</bundles_post_ra>
